<compile_context>
chip_gen: v5e
topology: v5e:2x2
jax: 0.10.0
libtpu: 0.0.40
codegen_flags: <defaults>
</compile_context>

<pallas_src>
import functools

import jax
import jax.numpy as jnp
from jax.experimental import pallas as pl
from jax.experimental.pallas import tpu as pltpu


# --------------------------------------------------------------------------
# Tiling helpers (shared by init-time weight padding and the GEMM wrapper)
# --------------------------------------------------------------------------

_TK_MAX = 1024        # max reduction covered by one k step
_ROW_SUM = 0          # row inside the packed stats block holding the sum
_ROW_SSQ = 4          # row holding the sum of squares


def _round_up(x, m):
    return (x + m - 1) // m * m


def _kn_dims(K, N):
    """Padded K/N and tile sizes for a [M,K]x[K,N] GEMM (independent of M)."""
    if K <= _TK_MAX:
        Kp, tk = K, K                      # single full-K step, no padding
    else:
        Kp = _round_up(K, 128)
        tk = 128
        for cand in (1024, 512, 256):      # largest 128-multiple dividing Kp
            if Kp % cand == 0:
                tk = cand
                break
    if N < 128:
        Np, tn = N, N                      # full-dim block, no 4x pad / slice
    else:
        Np = _round_up(N, 128)
        tn = 256 if Np % 256 == 0 else 128
    return Kp, Np, tk, tn


def _m_dims(M):
    if M <= 256:
        Mp = _round_up(M, 8)
        return Mp, Mp
    Mp = _round_up(M, 128)
    tm = 256 if Mp % 256 == 0 else 128
    return Mp, tm


def _ew_row_tile(Mp):
    """Row tile for the elementwise (BN apply / tail) kernels."""
    if Mp <= 512:
        return Mp
    for cand in (512, 256, 128):
        if Mp % cand == 0:
            return cand
    return Mp


def _ew_col_tile(Cp):
    if Cp % 256 == 0:
        return 256
    if Cp % 128 == 0:
        return 128
    return Cp


def _unpad(x, M, C):
    return x if x.shape == (M, C) else x[:M, :C]


def _pad_rows_cols(x, shape):
    if x.shape == shape:
        return x
    return jnp.pad(x, ((0, shape[0] - x.shape[0]), (0, shape[1] - x.shape[1])))


# --------------------------------------------------------------------------
# Pallas kernels
# --------------------------------------------------------------------------

def _emit_tile_and_stats(acc, o_ref, stats_ref):
    """Store bf16 output tile + packed per-channel partial BN stats.

    stats block is (1, 8, tn): row _ROW_SUM holds sum(acc, rows), row
    _ROW_SSQ holds sum(acc**2, rows); all computed from the f32 accumulator.
    """
    o_ref[...] = acc.astype(o_ref.dtype)
    s = jnp.sum(acc, axis=0, keepdims=True)           # (1, tn)
    sq = jnp.sum(acc * acc, axis=0, keepdims=True)    # (1, tn)
    rows = jax.lax.broadcasted_iota(jnp.int32, (8, acc.shape[1]), 0)
    packed = jnp.where(rows < _ROW_SSQ,
                       jnp.broadcast_to(s, (8, acc.shape[1])),
                       jnp.broadcast_to(sq, (8, acc.shape[1])))
    stats_ref[...] = packed[None]


def _gemm_stats_kernel_1k(a_ref, b_ref, o_ref, stats_ref):
    """Single-k GEMM: no accumulator scratch, no pl.when."""
    acc = jnp.dot(a_ref[...], b_ref[...], preferred_element_type=jnp.float32)
    _emit_tile_and_stats(acc, o_ref, stats_ref)


def _gemm_stats_kernel(a_ref, b_ref, o_ref, stats_ref, acc_ref):
    """Multi-k GEMM: f32 accumulator resident over k, stores on the last k."""
    k = pl.program_id(2)

    @pl.when(k == 0)
    def _():
        acc_ref[...] = jnp.zeros_like(acc_ref)

    acc_ref[...] += jnp.dot(a_ref[...], b_ref[...],
                            preferred_element_type=jnp.float32)

    @pl.when(k == pl.num_programs(2) - 1)
    def _():
        _emit_tile_and_stats(acc_ref[...], o_ref, stats_ref)


def _bn_apply_kernel(x_ref, sc_ref, sh_ref, o_ref, *, relu):
    """Apply precomputed per-channel BN scale/shift (+ ReLU); math in f32."""
    y = x_ref[...].astype(jnp.float32) * sc_ref[...] + sh_ref[...]
    if relu:
        y = jnp.maximum(y, 0.0)
    o_ref[...] = y.astype(o_ref.dtype)


def _tail_kernel(y_ref, sc3_ref, sh3_ref, idn_ref, scd_ref, shd_ref, o_ref):
    """Fused tail: relu(bn3(y)) + bn_d(identity), then final ReLU.

    The identity BN is the downsample BN when present; otherwise scale=1,
    shift=0 make it a plain residual add.
    """
    y = y_ref[...].astype(jnp.float32) * sc3_ref[...] + sh3_ref[...]
    y = jnp.maximum(y, 0.0)                           # ReLU inside self.block
    idn = idn_ref[...].astype(jnp.float32) * scd_ref[...] + shd_ref[...]
    o_ref[...] = jnp.maximum(y + idn, 0.0)            # add + final ReLU


# --------------------------------------------------------------------------
# Pallas wrappers
# --------------------------------------------------------------------------

def pallas_gemm_stats(a, b_p, M, K, N):
    """bf16 a:[M,K] x pre-padded bf16 b_p:[Kp,Np] -> (bf16 y:[Mp,Np],
    f32 stats:[Mp//tm, 8, Np]) with per-row-tile partial BN sums."""
    Kp, Np, tk, tn = _kn_dims(K, N)
    Mp, tm = _m_dims(M)
    assert b_p.shape == (Kp, Np), (b_p.shape, (Kp, Np))
    if a.shape != (Mp, Kp):
        a = jnp.pad(a, ((0, Mp - M), (0, Kp - K)))

    ni, nj, nk = Mp // tm, Np // tn, Kp // tk
    out_shape = (jax.ShapeDtypeStruct((Mp, Np), jnp.bfloat16),
                 jax.ShapeDtypeStruct((ni, 8, Np), jnp.float32))

    if nk == 1:
        return pl.pallas_call(
            _gemm_stats_kernel_1k,
            out_shape=out_shape,
            grid=(ni, nj),
            in_specs=[pl.BlockSpec((tm, Kp), lambda i, j: (i, 0)),
                      pl.BlockSpec((Kp, tn), lambda i, j: (0, j))],
            out_specs=(pl.BlockSpec((tm, tn), lambda i, j: (i, j)),
                       pl.BlockSpec((1, 8, tn), lambda i, j: (i, 0, j))),
            compiler_params=pltpu.CompilerParams(
                dimension_semantics=("parallel", "parallel")),
        )(a, b_p)

    return pl.pallas_call(
        _gemm_stats_kernel,
        out_shape=out_shape,
        grid=(ni, nj, nk),
        in_specs=[pl.BlockSpec((tm, tk), lambda i, j, k: (i, k)),
                  pl.BlockSpec((tk, tn), lambda i, j, k: (k, j))],
        out_specs=(pl.BlockSpec((tm, tn), lambda i, j, k: (i, j)),
                   pl.BlockSpec((1, 8, tn), lambda i, j, k: (i, 0, j))),
        scratch_shapes=[pltpu.VMEM((tm, tn), jnp.float32)],
        compiler_params=pltpu.CompilerParams(
            dimension_semantics=("parallel", "parallel", "arbitrary")),
    )(a, b_p)


def bn_scale_shift(stats, gamma, beta, m_count, eps=1e-5):
    """Combine per-tile partial sums into per-channel BN scale/shift (f32).

    Training-mode BN: per-batch mean, biased variance.  Tiny (C,)-sized math.
    """
    C = gamma.shape[0]
    s = jnp.sum(stats[:, _ROW_SUM, :C], axis=0)
    sq = jnp.sum(stats[:, _ROW_SSQ, :C], axis=0)
    mean = s / m_count
    var = jnp.maximum(sq / m_count - mean * mean, 0.0)
    scale = gamma * jax.lax.rsqrt(var + eps)
    shift = beta - mean * scale
    return scale, shift


def _pad_vec(v, Cp):
    C = v.shape[0]
    v = v if C == Cp else jnp.pad(v, (0, Cp - C))
    return v.reshape(1, Cp)


def bn_apply(y_pad, scale, shift, *, relu, out_dtype):
    """Elementwise BN apply (+ ReLU), tiled over M and C, fully parallel."""
    Mp, Cp = y_pad.shape
    tm, tc = _ew_row_tile(Mp), _ew_col_tile(Cp)
    spec_x = pl.BlockSpec((tm, tc), lambda i, j: (i, j))
    spec_v = pl.BlockSpec((1, tc), lambda i, j: (0, j))
    return pl.pallas_call(
        functools.partial(_bn_apply_kernel, relu=relu),
        out_shape=jax.ShapeDtypeStruct((Mp, Cp), out_dtype),
        grid=(Mp // tm, Cp // tc),
        in_specs=[spec_x, spec_v, spec_v],
        out_specs=spec_x,
        compiler_params=pltpu.CompilerParams(
            dimension_semantics=("parallel", "parallel")),
    )(y_pad, _pad_vec(scale, Cp), _pad_vec(shift, Cp))


def fused_tail(y3, sc3, sh3, idn, scd, shd):
    """bn3 + ReLU + identity-BN + residual add + final ReLU, f32 output."""
    Mp, Cp = y3.shape
    tm, tc = _ew_row_tile(Mp), _ew_col_tile(Cp)
    spec_x = pl.BlockSpec((tm, tc), lambda i, j: (i, j))
    spec_v = pl.BlockSpec((1, tc), lambda i, j: (0, j))
    return pl.pallas_call(
        _tail_kernel,
        out_shape=jax.ShapeDtypeStruct((Mp, Cp), jnp.float32),
        grid=(Mp // tm, Cp // tc),
        in_specs=[spec_x, spec_v, spec_v, spec_x, spec_v, spec_v],
        out_specs=spec_x,
        compiler_params=pltpu.CompilerParams(
            dimension_semantics=("parallel", "parallel")),
    )(y3, _pad_vec(sc3, Cp), _pad_vec(sh3, Cp),
      idn, _pad_vec(scd, Cp), _pad_vec(shd, Cp))


# --------------------------------------------------------------------------
# Conv building blocks (patch extraction / decimation = pure data movement)
# --------------------------------------------------------------------------

def conv3x3_patches(x_nhwc, stride):
    """3x3 / pad=1 / stride=s bf16 patch slab [N*OH*OW, 9*C] (tap-major)."""
    # TODO(synk): replace this 9x im2col slab with a tap-accumulating GEMM
    # (a 9-long reduction grid axis indexing the padded NHWC input per tap).
    N, H, W, C = x_nhwc.shape
    OH = (H + 2 - 3) // stride + 1
    OW = (W + 2 - 3) // stride + 1
    xp = jnp.pad(x_nhwc, ((0, 0), (1, 1), (1, 1), (0, 0)))
    cols = []
    for kh in range(3):
        for kw in range(3):
            v = jax.lax.slice(
                xp,
                (0, kh, kw, 0),
                (N, kh + stride * (OH - 1) + 1, kw + stride * (OW - 1) + 1, C),
                (1, stride, stride, 1))
            cols.append(v.reshape(N * OH * OW, C))
    return jnp.concatenate(cols, axis=1), (OH, OW)


# --------------------------------------------------------------------------
# Bottleneck forward
# --------------------------------------------------------------------------

def bottleneck_forward(params, x_nchw, *, stride):
    mid = params["g1"].shape[0]
    cout = params["g3"].shape[0]

    # PyTorch layout NCHW -> NHWC once (channels on lanes); bf16 feed for MXU.
    x_nhwc = jnp.transpose(x_nchw, (0, 2, 3, 1)).astype(jnp.float32)
    N, H, W, Cin = x_nhwc.shape
    x_bf = x_nhwc.astype(jnp.bfloat16)
    M1 = N * H * W

    # conv1: 1x1 (GEMM + BN1 stats in epilogue) -> BN1 apply + ReLU (bf16)
    y1, st1 = pallas_gemm_stats(x_bf.reshape(M1, Cin), params["w1"],
                                M1, Cin, mid)
    sc1, sh1 = bn_scale_shift(st1, params["g1"], params["b1"], M1)
    a1 = bn_apply(y1, sc1, sh1, relu=True, out_dtype=jnp.bfloat16)
    a1 = _unpad(a1, M1, mid).reshape(N, H, W, mid)

    # conv2: 3x3, stride s, pad 1 (bf16 im2col GEMM) -> BN2 apply + ReLU
    patches, (OH, OW) = conv3x3_patches(a1, stride)
    M2 = N * OH * OW
    y2, st2 = pallas_gemm_stats(patches, params["w2"], M2, 9 * mid, mid)
    sc2, sh2 = bn_scale_shift(st2, params["g2"], params["b2"], M2)
    a2 = bn_apply(y2, sc2, sh2, relu=True, out_dtype=jnp.bfloat16)
    a2 = _unpad(a2, M2, mid)

    # conv3: 1x1 (GEMM + BN3 stats); BN3 apply + ReLU + residual + final ReLU
    # are fused into the tail kernel.
    y3, st3 = pallas_gemm_stats(a2, params["w3"], M2, mid, cout)
    sc3, sh3 = bn_scale_shift(st3, params["g3"], params["b3"], M2)

    if "wd" in params:
        # downsample: 1x1 stride-s conv (decimate + GEMM) + BN (fused in tail)
        xd = x_bf[:, ::stride, ::stride, :].reshape(M2, Cin)
        yd, std = pallas_gemm_stats(xd, params["wd"], M2, Cin, cout)
        scd, shd = bn_scale_shift(std, params["gd"], params["bd"], M2)
        idn = yd
    else:
        scd = jnp.ones((cout,), jnp.float32)
        shd = jnp.zeros((cout,), jnp.float32)
        idn = _pad_rows_cols(x_nhwc.reshape(M1, Cin), y3.shape)

    out = fused_tail(y3, sc3, sh3, idn, scd, shd)
    out = _unpad(out, M2, cout).reshape(N, OH, OW, cout)
    # Back to NCHW to match the PyTorch module's output layout.
    return jnp.transpose(out, (0, 3, 1, 2))


# --------------------------------------------------------------------------
# Deterministic parameter initialization (shapes follow the nn.Module)
# --------------------------------------------------------------------------

def init_params(key, in_channel, out_channel, stride):
    expansion = 4
    mid, cout = out_channel, out_channel * expansion
    keys = jax.random.split(key, 4)

    def conv_w_oihw(k, oc, ic, kh, kw):
        fan_in = ic * kh * kw
        return jax.random.normal(k, (oc, ic, kh, kw),
                                 jnp.float32) * (2.0 / fan_in) ** 0.5

    def to_gemm_weight(w):
        # OIHW -> [KH*KW*IC, OC]; cast to bf16 and pad to the GEMM (Kp, Np)
        # tile grid ONCE here (no per-forward pad/cast of B).
        oc, ic, kh, kw = w.shape
        mat = jnp.transpose(w, (2, 3, 1, 0)).reshape(kh * kw * ic, oc)
        K, Nc = mat.shape
        Kp, Np, _, _ = _kn_dims(K, Nc)
        mat = jnp.pad(mat, ((0, Kp - K), (0, Np - Nc)))
        return mat.astype(jnp.bfloat16)

    def bn(c):
        return jnp.ones((c,), jnp.float32), jnp.zeros((c,), jnp.float32)

    p = {"w1": to_gemm_weight(conv_w_oihw(keys[0], mid, in_channel, 1, 1))}
    p["g1"], p["b1"] = bn(mid)
    p["w2"] = to_gemm_weight(conv_w_oihw(keys[1], mid, mid, 3, 3))
    p["g2"], p["b2"] = bn(mid)
    p["w3"] = to_gemm_weight(conv_w_oihw(keys[2], cout, mid, 1, 1))
    p["g3"], p["b3"] = bn(cout)
    if stride != 1 or in_channel != cout:
        p["wd"] = to_gemm_weight(conv_w_oihw(keys[3], cout, in_channel, 1, 1))
        p["gd"], p["bd"] = bn(cout)
    return p


# --------------------------------------------------------------------------

if __name__ == "__main__":
    key = jax.random.PRNGKey(0)
    k1, k2, k3, k4 = jax.random.split(key, 4)

    # Config 1: downsample path; conv2's K = 9*128 = 1152 exercises the
    # multi-k accumulating GEMM, conv3/downsample exercise tn=256 tiles.
    IN_CH, OUT_CH, STRIDE = 64, 128, 2
    params = init_params(k1, IN_CH, OUT_CH, STRIDE)
    x = jax.random.normal(k2, (2, IN_CH, 16, 16), jnp.float32)
    fwd = jax.jit(functools.partial(bottleneck_forward, stride=STRIDE))
    out = jax.block_until_ready(fwd(params, x))
    assert out.shape == (2, OUT_CH * 4, 8, 8) and out.dtype == jnp.float32
    assert bool(jnp.all(jnp.isfinite(out)))
    assert bool(jnp.all(out >= 0.0))          # final ReLU

    # Config 2: identity path (stride 1, in_channel == out_channel*4),
    # single-k GEMMs with narrow-N (32) full-dim blocks.
    IN_CH2, OUT_CH2, STRIDE2 = 128, 32, 1
    params2 = init_params(k3, IN_CH2, OUT_CH2, STRIDE2)
    x2 = jax.random.normal(k4, (2, IN_CH2, 16, 16), jnp.float32)
    fwd2 = jax.jit(functools.partial(bottleneck_forward, stride=STRIDE2))
    out2 = jax.block_until_ready(fwd2(params2, x2))
    assert out2.shape == (2, OUT_CH2 * 4, 16, 16) and out2.dtype == jnp.float32
    assert bool(jnp.all(jnp.isfinite(out2)))

    print("KERNEL_OK")
</pallas_src>

<mosaic_0001>
module attributes {stable_mosaic.version = 11 : i64} {
  func.func @_gemm_stats_kernel_1k(%arg0: i32, %arg1: i32, %arg2: memref<256x64xbf16, #tpu.memory_space<vmem>>, %arg3: memref<64x128xbf16, #tpu.memory_space<vmem>>, %arg4: memref<256x128xbf16, #tpu.memory_space<vmem>>, %arg5: memref<1x8x128xf32, #tpu.memory_space<vmem>>) attributes {dimension_semantics = [#tpu.dimension_semantics<parallel>, #tpu.dimension_semantics<parallel>], iteration_bounds = array<i64: 2, 1>, scalar_prefetch = 0 : i64, scratch_operands = 0 : i64, tpu.core_type = #tpu.core_type<tc>, window_params = [{transform_indices = @transform_0, window_bounds = array<i64: 256, 64>}, {transform_indices = @transform_1, window_bounds = array<i64: 64, 128>}, {transform_indices = @transform_2, window_bounds = array<i64: 256, 128>}, {transform_indices = @transform_3, window_bounds = array<i64: 1, 8, 128>}]} {
    %c0 = arith.constant 0 : index
    %c0_0 = arith.constant 0 : index
    %0 = vector.load %arg2[%c0, %c0_0] : memref<256x64xbf16, #tpu.memory_space<vmem>>, vector<256x64xbf16>
    %c0_1 = arith.constant 0 : index
    %c0_2 = arith.constant 0 : index
    %1 = vector.load %arg3[%c0_1, %c0_2] : memref<64x128xbf16, #tpu.memory_space<vmem>>, vector<64x128xbf16>
    %cst = arith.constant dense<0.000000e+00> : vector<256x128xf32>
    %2 = tpu.matmul %0, %1, %cst {dimension_numbers = #tpu.dot_dimension_numbers<[1], [0], [0], [1], [0, 0, 1, 1], [], []>} : vector<256x64xbf16>, vector<64x128xbf16>, vector<256x128xf32> -> vector<256x128xf32>
    %3 = arith.truncf %2 : vector<256x128xf32> to vector<256x128xbf16>
    %c0_3 = arith.constant 0 : index
    %c0_4 = arith.constant 0 : index
    %4 = vector.load %arg4[%c0_3, %c0_4] : memref<256x128xbf16, #tpu.memory_space<vmem>>, vector<256x128xbf16>
    tpu.vector_store %arg4[%c0_3, %c0_4], %3 {strides = array<i32>} : memref<256x128xbf16, #tpu.memory_space<vmem>>, vector<256x128xbf16>,
    %cst_5 = arith.constant dense<0.000000e+00> : vector<128xf32>
    %5 = vector.multi_reduction <add>, %2, %cst_5 [0] : vector<256x128xf32> to vector<128xf32>
    %6 = vector.shape_cast %5 : vector<128xf32> to vector<1x128xf32>
    %7 = arith.mulf %2, %2 : vector<256x128xf32>
    %cst_6 = arith.constant dense<0.000000e+00> : vector<128xf32>
    %8 = vector.multi_reduction <add>, %7, %cst_6 [0] : vector<256x128xf32> to vector<128xf32>
    %9 = vector.shape_cast %8 : vector<128xf32> to vector<1x128xf32>
    %10 = tpu.iota {dimensions = array<i32: 0>} : vector<8x128xi32>
    %c4_i32 = arith.constant 4 : i32
    %11 = vector.broadcast %c4_i32 : i32 to vector<8x128xi32>
    %12 = arith.cmpi slt, %10, %11 : vector<8x128xi32>
    %13 = vector.shape_cast %6 : vector<1x128xf32> to vector<1x128xf32>
    %14 = vector.broadcast %13 : vector<1x128xf32> to vector<8x128xf32>
    %15 = vector.shape_cast %9 : vector<1x128xf32> to vector<1x128xf32>
    %16 = vector.broadcast %15 : vector<1x128xf32> to vector<8x128xf32>
    %17 = arith.select %12, %14, %16 : vector<8x128xi1>, vector<8x128xf32>
    %18 = vector.shape_cast %17 : vector<8x128xf32> to vector<1x8x128xf32>
    %c0_7 = arith.constant 0 : index
    %c0_8 = arith.constant 0 : index
    %c0_9 = arith.constant 0 : index
    %19 = vector.load %arg5[%c0_7, %c0_8, %c0_9] : memref<1x8x128xf32, #tpu.memory_space<vmem>>, vector<1x8x128xf32>
    tpu.vector_store %arg5[%c0_7, %c0_8, %c0_9], %18 {strides = array<i32>} : memref<1x8x128xf32, #tpu.memory_space<vmem>>, vector<1x8x128xf32>,
    return
  }
  func.func @transform_0(%arg0: i32, %arg1: i32) -> (i32, i32) {
    %c0_i32 = arith.constant 0 : i32
    %c0_i32_0 = arith.constant 0 : i32
    return %arg0, %c0_i32 : i32, i32
  }
  func.func @transform_1(%arg0: i32, %arg1: i32) -> (i32, i32) {
    %c0_i32 = arith.constant 0 : i32
    %c0_i32_0 = arith.constant 0 : i32
    return %c0_i32, %arg1 : i32, i32
  }
  func.func @transform_2(%arg0: i32, %arg1: i32) -> (i32, i32) {
    %c0_i32 = arith.constant 0 : i32
    return %arg0, %arg1 : i32, i32
  }
  func.func @transform_3(%arg0: i32, %arg1: i32) -> (i32, i32, i32) {
    %c0_i32 = arith.constant 0 : i32
    %c0_i32_0 = arith.constant 0 : i32
    return %arg0, %c0_i32, %arg1 : i32, i32, i32
  }
}

module attributes {stable_mosaic.version = 11 : i64} {
  func.func @_bn_apply_kernel(%arg0: i32, %arg1: i32, %arg2: memref<512x128xbf16, #tpu.memory_space<vmem>>, %arg3: memref<1x128xf32, #tpu.memory_space<vmem>>, %arg4: memref<1x128xf32, #tpu.memory_space<vmem>>, %arg5: memref<512x128xbf16, #tpu.memory_space<vmem>>) attributes {dimension_semantics = [#tpu.dimension_semantics<parallel>, #tpu.dimension_semantics<parallel>], iteration_bounds = array<i64: 1, 1>, scalar_prefetch = 0 : i64, scratch_operands = 0 : i64, tpu.core_type = #tpu.core_type<tc>, window_params = [{transform_indices = @transform_0, window_bounds = array<i64: 512, 128>}, {transform_indices = @transform_1, window_bounds = array<i64: 1, 128>}, {transform_indices = @transform_2, window_bounds = array<i64: 1, 128>}, {transform_indices = @transform_3, window_bounds = array<i64: 512, 128>}]} {
    %c0 = arith.constant 0 : index
    %c0_0 = arith.constant 0 : index
    %0 = vector.load %arg2[%c0, %c0_0] : memref<512x128xbf16, #tpu.memory_space<vmem>>, vector<512x128xbf16>
    %1 = arith.extf %0 : vector<512x128xbf16> to vector<512x128xf32>
    %c0_1 = arith.constant 0 : index
    %c0_2 = arith.constant 0 : index
    %2 = vector.load %arg3[%c0_1, %c0_2] : memref<1x128xf32, #tpu.memory_space<vmem>>, vector<1x128xf32>
    %3 = vector.broadcast %2 : vector<1x128xf32> to vector<512x128xf32>
    %4 = arith.mulf %1, %3 : vector<512x128xf32>
    %c0_3 = arith.constant 0 : index
    %c0_4 = arith.constant 0 : index
    %5 = vector.load %arg4[%c0_3, %c0_4] : memref<1x128xf32, #tpu.memory_space<vmem>>, vector<1x128xf32>
    %6 = vector.broadcast %5 : vector<1x128xf32> to vector<512x128xf32>
    %7 = arith.addf %4, %6 : vector<512x128xf32>
    %cst = arith.constant 0.000000e+00 : f32
    %8 = vector.broadcast %cst : f32 to vector<512x128xf32>
    %9 = arith.maximumf %7, %8 : vector<512x128xf32>
    %10 = arith.truncf %9 : vector<512x128xf32> to vector<512x128xbf16>
    %c0_5 = arith.constant 0 : index
    %c0_6 = arith.constant 0 : index
    %11 = vector.load %arg5[%c0_5, %c0_6] : memref<512x128xbf16, #tpu.memory_space<vmem>>, vector<512x128xbf16>
    tpu.vector_store %arg5[%c0_5, %c0_6], %10 {strides = array<i32>} : memref<512x128xbf16, #tpu.memory_space<vmem>>, vector<512x128xbf16>,
    return
  }
  func.func @transform_0(%arg0: i32, %arg1: i32) -> (i32, i32) {
    %c0_i32 = arith.constant 0 : i32
    return %arg0, %arg1 : i32, i32
  }
  func.func @transform_1(%arg0: i32, %arg1: i32) -> (i32, i32) {
    %c0_i32 = arith.constant 0 : i32
    %c0_i32_0 = arith.constant 0 : i32
    return %c0_i32, %arg1 : i32, i32
  }
  func.func @transform_2(%arg0: i32, %arg1: i32) -> (i32, i32) {
    %c0_i32 = arith.constant 0 : i32
    %c0_i32_0 = arith.constant 0 : i32
    return %c0_i32, %arg1 : i32, i32
  }
  func.func @transform_3(%arg0: i32, %arg1: i32) -> (i32, i32) {
    %c0_i32 = arith.constant 0 : i32
    return %arg0, %arg1 : i32, i32
  }
}

module attributes {stable_mosaic.version = 11 : i64} {
  func.func @_gemm_stats_kernel(%arg0: i32, %arg1: i32, %arg2: i32, %arg3: memref<128x128xbf16, #tpu.memory_space<vmem>>, %arg4: memref<128x128xbf16, #tpu.memory_space<vmem>>, %arg5: memref<128x128xbf16, #tpu.memory_space<vmem>>, %arg6: memref<1x8x128xf32, #tpu.memory_space<vmem>>, %arg7: memref<128x128xf32, #tpu.memory_space<vmem>>) attributes {dimension_semantics = [#tpu.dimension_semantics<parallel>, #tpu.dimension_semantics<parallel>, #tpu.dimension_semantics<arbitrary>], iteration_bounds = array<i64: 1, 1, 9>, scalar_prefetch = 0 : i64, scratch_operands = 1 : i64, tpu.core_type = #tpu.core_type<tc>, window_params = [{transform_indices = @transform_0, window_bounds = array<i64: 128, 128>}, {transform_indices = @transform_1, window_bounds = array<i64: 128, 128>}, {transform_indices = @transform_2, window_bounds = array<i64: 128, 128>}, {transform_indices = @transform_3, window_bounds = array<i64: 1, 8, 128>}]} {
    %c0_i32 = arith.constant 0 : i32
    %0 = arith.cmpi eq, %arg2, %c0_i32 : i32
    %1 = arith.extui %0 : i1 to i32
    %c0_i32_0 = arith.constant 0 : i32
    %2 = arith.cmpi ne, %1, %c0_i32_0 : i32
    scf.if %2 {
      %cst_9 = arith.constant 0.000000e+00 : f32
      %12 = vector.broadcast %cst_9 : f32 to vector<128x128xf32>
      %c0_10 = arith.constant 0 : index
      %c0_11 = arith.constant 0 : index
      %13 = vector.load %arg7[%c0_10, %c0_11] : memref<128x128xf32, #tpu.memory_space<vmem>>, vector<128x128xf32>
      tpu.vector_store %arg7[%c0_10, %c0_11], %12 {strides = array<i32>} : memref<128x128xf32, #tpu.memory_space<vmem>>, vector<128x128xf32>,
    } else {
    }
    %c0 = arith.constant 0 : index
    %c0_1 = arith.constant 0 : index
    %3 = vector.load %arg7[%c0, %c0_1] : memref<128x128xf32, #tpu.memory_space<vmem>>, vector<128x128xf32>
    %c0_2 = arith.constant 0 : index
    %c0_3 = arith.constant 0 : index
    %4 = vector.load %arg3[%c0_2, %c0_3] : memref<128x128xbf16, #tpu.memory_space<vmem>>, vector<128x128xbf16>
    %c0_4 = arith.constant 0 : index
    %c0_5 = arith.constant 0 : index
    %5 = vector.load %arg4[%c0_4, %c0_5] : memref<128x128xbf16, #tpu.memory_space<vmem>>, vector<128x128xbf16>
    %cst = arith.constant dense<0.000000e+00> : vector<128x128xf32>
    %6 = tpu.matmul %4, %5, %cst {dimension_numbers = #tpu.dot_dimension_numbers<[1], [0], [0], [1], [0, 0, 1, 1], [], []>} : vector<128x128xbf16>, vector<128x128xbf16>, vector<128x128xf32> -> vector<128x128xf32>
    %7 = arith.addf %3, %6 : vector<128x128xf32>
    %c0_6 = arith.constant 0 : index
    %c0_7 = arith.constant 0 : index
    %8 = vector.load %arg7[%c0_6, %c0_7] : memref<128x128xf32, #tpu.memory_space<vmem>>, vector<128x128xf32>
    tpu.vector_store %arg7[%c0_6, %c0_7], %7 {strides = array<i32>} : memref<128x128xf32, #tpu.memory_space<vmem>>, vector<128x128xf32>,
    %c8_i32 = arith.constant 8 : i32
    %9 = arith.cmpi eq, %arg2, %c8_i32 : i32
    %10 = arith.extui %9 : i1 to i32
    %c0_i32_8 = arith.constant 0 : i32
    %11 = arith.cmpi ne, %10, %c0_i32_8 : i32
    scf.if %11 {
      %c0_9 = arith.constant 0 : index
      %c0_10 = arith.constant 0 : index
      %12 = vector.load %arg7[%c0_9, %c0_10] : memref<128x128xf32, #tpu.memory_space<vmem>>, vector<128x128xf32>
      %13 = arith.truncf %12 : vector<128x128xf32> to vector<128x128xbf16>
      %c0_11 = arith.constant 0 : index
      %c0_12 = arith.constant 0 : index
      %14 = vector.load %arg5[%c0_11, %c0_12] : memref<128x128xbf16, #tpu.memory_space<vmem>>, vector<128x128xbf16>
      tpu.vector_store %arg5[%c0_11, %c0_12], %13 {strides = array<i32>} : memref<128x128xbf16, #tpu.memory_space<vmem>>, vector<128x128xbf16>,
      %cst_13 = arith.constant dense<0.000000e+00> : vector<128xf32>
      %15 = vector.multi_reduction <add>, %12, %cst_13 [0] : vector<128x128xf32> to vector<128xf32>
      %16 = vector.shape_cast %15 : vector<128xf32> to vector<1x128xf32>
      %17 = arith.mulf %12, %12 : vector<128x128xf32>
      %cst_14 = arith.constant dense<0.000000e+00> : vector<128xf32>
      %18 = vector.multi_reduction <add>, %17, %cst_14 [0] : vector<128x128xf32> to vector<128xf32>
      %19 = vector.shape_cast %18 : vector<128xf32> to vector<1x128xf32>
      %20 = tpu.iota {dimensions = array<i32: 0>} : vector<8x128xi32>
      %c4_i32 = arith.constant 4 : i32
      %21 = vector.broadcast %c4_i32 : i32 to vector<8x128xi32>
      %22 = arith.cmpi slt, %20, %21 : vector<8x128xi32>
      %23 = vector.shape_cast %16 : vector<1x128xf32> to vector<1x128xf32>
      %24 = vector.broadcast %23 : vector<1x128xf32> to vector<8x128xf32>
      %25 = vector.shape_cast %19 : vector<1x128xf32> to vector<1x128xf32>
      %26 = vector.broadcast %25 : vector<1x128xf32> to vector<8x128xf32>
      %27 = arith.select %22, %24, %26 : vector<8x128xi1>, vector<8x128xf32>
      %28 = vector.shape_cast %27 : vector<8x128xf32> to vector<1x8x128xf32>
      %c0_15 = arith.constant 0 : index
      %c0_16 = arith.constant 0 : index
      %c0_17 = arith.constant 0 : index
      %29 = vector.load %arg6[%c0_15, %c0_16, %c0_17] : memref<1x8x128xf32, #tpu.memory_space<vmem>>, vector<1x8x128xf32>
      tpu.vector_store %arg6[%c0_15, %c0_16, %c0_17], %28 {strides = array<i32>} : memref<1x8x128xf32, #tpu.memory_space<vmem>>, vector<1x8x128xf32>,
    } else {
    }
    return
  }
  func.func @transform_0(%arg0: i32, %arg1: i32, %arg2: i32) -> (i32, i32) {
    %c0_i32 = arith.constant 0 : i32
    return %arg0, %arg2 : i32, i32
  }
  func.func @transform_1(%arg0: i32, %arg1: i32, %arg2: i32) -> (i32, i32) {
    %c0_i32 = arith.constant 0 : i32
    return %arg2, %arg1 : i32, i32
  }
  func.func @transform_2(%arg0: i32, %arg1: i32, %arg2: i32) -> (i32, i32) {
    %c0_i32 = arith.constant 0 : i32
    return %arg0, %arg1 : i32, i32
  }
  func.func @transform_3(%arg0: i32, %arg1: i32, %arg2: i32) -> (i32, i32, i32) {
    %c0_i32 = arith.constant 0 : i32
    %c0_i32_0 = arith.constant 0 : i32
    return %arg0, %c0_i32, %arg1 : i32, i32, i32
  }
}

module attributes {stable_mosaic.version = 11 : i64} {
  func.func @_bn_apply_kernel(%arg0: i32, %arg1: i32, %arg2: memref<128x128xbf16, #tpu.memory_space<vmem>>, %arg3: memref<1x128xf32, #tpu.memory_space<vmem>>, %arg4: memref<1x128xf32, #tpu.memory_space<vmem>>, %arg5: memref<128x128xbf16, #tpu.memory_space<vmem>>) attributes {dimension_semantics = [#tpu.dimension_semantics<parallel>, #tpu.dimension_semantics<parallel>], iteration_bounds = array<i64: 1, 1>, scalar_prefetch = 0 : i64, scratch_operands = 0 : i64, tpu.core_type = #tpu.core_type<tc>, window_params = [{transform_indices = @transform_0, window_bounds = array<i64: 128, 128>}, {transform_indices = @transform_1, window_bounds = array<i64: 1, 128>}, {transform_indices = @transform_2, window_bounds = array<i64: 1, 128>}, {transform_indices = @transform_3, window_bounds = array<i64: 128, 128>}]} {
    %c0 = arith.constant 0 : index
    %c0_0 = arith.constant 0 : index
    %0 = vector.load %arg2[%c0, %c0_0] : memref<128x128xbf16, #tpu.memory_space<vmem>>, vector<128x128xbf16>
    %1 = arith.extf %0 : vector<128x128xbf16> to vector<128x128xf32>
    %c0_1 = arith.constant 0 : index
    %c0_2 = arith.constant 0 : index
    %2 = vector.load %arg3[%c0_1, %c0_2] : memref<1x128xf32, #tpu.memory_space<vmem>>, vector<1x128xf32>
    %3 = vector.broadcast %2 : vector<1x128xf32> to vector<128x128xf32>
    %4 = arith.mulf %1, %3 : vector<128x128xf32>
    %c0_3 = arith.constant 0 : index
    %c0_4 = arith.constant 0 : index
    %5 = vector.load %arg4[%c0_3, %c0_4] : memref<1x128xf32, #tpu.memory_space<vmem>>, vector<1x128xf32>
    %6 = vector.broadcast %5 : vector<1x128xf32> to vector<128x128xf32>
    %7 = arith.addf %4, %6 : vector<128x128xf32>
    %cst = arith.constant 0.000000e+00 : f32
    %8 = vector.broadcast %cst : f32 to vector<128x128xf32>
    %9 = arith.maximumf %7, %8 : vector<128x128xf32>
    %10 = arith.truncf %9 : vector<128x128xf32> to vector<128x128xbf16>
    %c0_5 = arith.constant 0 : index
    %c0_6 = arith.constant 0 : index
    %11 = vector.load %arg5[%c0_5, %c0_6] : memref<128x128xbf16, #tpu.memory_space<vmem>>, vector<128x128xbf16>
    tpu.vector_store %arg5[%c0_5, %c0_6], %10 {strides = array<i32>} : memref<128x128xbf16, #tpu.memory_space<vmem>>, vector<128x128xbf16>,
    return
  }
  func.func @transform_0(%arg0: i32, %arg1: i32) -> (i32, i32) {
    %c0_i32 = arith.constant 0 : i32
    return %arg0, %arg1 : i32, i32
  }
  func.func @transform_1(%arg0: i32, %arg1: i32) -> (i32, i32) {
    %c0_i32 = arith.constant 0 : i32
    %c0_i32_0 = arith.constant 0 : i32
    return %c0_i32, %arg1 : i32, i32
  }
  func.func @transform_2(%arg0: i32, %arg1: i32) -> (i32, i32) {
    %c0_i32 = arith.constant 0 : i32
    %c0_i32_0 = arith.constant 0 : i32
    return %c0_i32, %arg1 : i32, i32
  }
  func.func @transform_3(%arg0: i32, %arg1: i32) -> (i32, i32) {
    %c0_i32 = arith.constant 0 : i32
    return %arg0, %arg1 : i32, i32
  }
}

module attributes {stable_mosaic.version = 11 : i64} {
  func.func @_gemm_stats_kernel_1k(%arg0: i32, %arg1: i32, %arg2: memref<128x128xbf16, #tpu.memory_space<vmem>>, %arg3: memref<128x256xbf16, #tpu.memory_space<vmem>>, %arg4: memref<128x256xbf16, #tpu.memory_space<vmem>>, %arg5: memref<1x8x256xf32, #tpu.memory_space<vmem>>) attributes {dimension_semantics = [#tpu.dimension_semantics<parallel>, #tpu.dimension_semantics<parallel>], iteration_bounds = array<i64: 1, 2>, scalar_prefetch = 0 : i64, scratch_operands = 0 : i64, tpu.core_type = #tpu.core_type<tc>, window_params = [{transform_indices = @transform_0, window_bounds = array<i64: 128, 128>}, {transform_indices = @transform_1, window_bounds = array<i64: 128, 256>}, {transform_indices = @transform_2, window_bounds = array<i64: 128, 256>}, {transform_indices = @transform_3, window_bounds = array<i64: 1, 8, 256>}]} {
    %c0 = arith.constant 0 : index
    %c0_0 = arith.constant 0 : index
    %0 = vector.load %arg2[%c0, %c0_0] : memref<128x128xbf16, #tpu.memory_space<vmem>>, vector<128x128xbf16>
    %c0_1 = arith.constant 0 : index
    %c0_2 = arith.constant 0 : index
    %1 = vector.load %arg3[%c0_1, %c0_2] : memref<128x256xbf16, #tpu.memory_space<vmem>>, vector<128x256xbf16>
    %cst = arith.constant dense<0.000000e+00> : vector<128x256xf32>
    %2 = tpu.matmul %0, %1, %cst {dimension_numbers = #tpu.dot_dimension_numbers<[1], [0], [0], [1], [0, 0, 1, 1], [], []>} : vector<128x128xbf16>, vector<128x256xbf16>, vector<128x256xf32> -> vector<128x256xf32>
    %3 = arith.truncf %2 : vector<128x256xf32> to vector<128x256xbf16>
    %c0_3 = arith.constant 0 : index
    %c0_4 = arith.constant 0 : index
    %4 = vector.load %arg4[%c0_3, %c0_4] : memref<128x256xbf16, #tpu.memory_space<vmem>>, vector<128x256xbf16>
    tpu.vector_store %arg4[%c0_3, %c0_4], %3 {strides = array<i32>} : memref<128x256xbf16, #tpu.memory_space<vmem>>, vector<128x256xbf16>,
    %cst_5 = arith.constant dense<0.000000e+00> : vector<256xf32>
    %5 = vector.multi_reduction <add>, %2, %cst_5 [0] : vector<128x256xf32> to vector<256xf32>
    %6 = vector.shape_cast %5 : vector<256xf32> to vector<1x256xf32>
    %7 = arith.mulf %2, %2 : vector<128x256xf32>
    %cst_6 = arith.constant dense<0.000000e+00> : vector<256xf32>
    %8 = vector.multi_reduction <add>, %7, %cst_6 [0] : vector<128x256xf32> to vector<256xf32>
    %9 = vector.shape_cast %8 : vector<256xf32> to vector<1x256xf32>
    %10 = tpu.iota {dimensions = array<i32: 0>} : vector<8x256xi32>
    %c4_i32 = arith.constant 4 : i32
    %11 = vector.broadcast %c4_i32 : i32 to vector<8x256xi32>
    %12 = arith.cmpi slt, %10, %11 : vector<8x256xi32>
    %13 = vector.shape_cast %6 : vector<1x256xf32> to vector<1x256xf32>
    %14 = vector.broadcast %13 : vector<1x256xf32> to vector<8x256xf32>
    %15 = vector.shape_cast %9 : vector<1x256xf32> to vector<1x256xf32>
    %16 = vector.broadcast %15 : vector<1x256xf32> to vector<8x256xf32>
    %17 = arith.select %12, %14, %16 : vector<8x256xi1>, vector<8x256xf32>
    %18 = vector.shape_cast %17 : vector<8x256xf32> to vector<1x8x256xf32>
    %c0_7 = arith.constant 0 : index
    %c0_8 = arith.constant 0 : index
    %c0_9 = arith.constant 0 : index
    %19 = vector.load %arg5[%c0_7, %c0_8, %c0_9] : memref<1x8x256xf32, #tpu.memory_space<vmem>>, vector<1x8x256xf32>
    tpu.vector_store %arg5[%c0_7, %c0_8, %c0_9], %18 {strides = array<i32>} : memref<1x8x256xf32, #tpu.memory_space<vmem>>, vector<1x8x256xf32>,
    return
  }
  func.func @transform_0(%arg0: i32, %arg1: i32) -> (i32, i32) {
    %c0_i32 = arith.constant 0 : i32
    %c0_i32_0 = arith.constant 0 : i32
    return %arg0, %c0_i32 : i32, i32
  }
  func.func @transform_1(%arg0: i32, %arg1: i32) -> (i32, i32) {
    %c0_i32 = arith.constant 0 : i32
    %c0_i32_0 = arith.constant 0 : i32
    return %c0_i32, %arg1 : i32, i32
  }
  func.func @transform_2(%arg0: i32, %arg1: i32) -> (i32, i32) {
    %c0_i32 = arith.constant 0 : i32
    return %arg0, %arg1 : i32, i32
  }
  func.func @transform_3(%arg0: i32, %arg1: i32) -> (i32, i32, i32) {
    %c0_i32 = arith.constant 0 : i32
    %c0_i32_0 = arith.constant 0 : i32
    return %arg0, %c0_i32, %arg1 : i32, i32, i32
  }
}

module attributes {stable_mosaic.version = 11 : i64} {
  func.func @_gemm_stats_kernel_1k(%arg0: i32, %arg1: i32, %arg2: memref<128x64xbf16, #tpu.memory_space<vmem>>, %arg3: memref<64x256xbf16, #tpu.memory_space<vmem>>, %arg4: memref<128x256xbf16, #tpu.memory_space<vmem>>, %arg5: memref<1x8x256xf32, #tpu.memory_space<vmem>>) attributes {dimension_semantics = [#tpu.dimension_semantics<parallel>, #tpu.dimension_semantics<parallel>], iteration_bounds = array<i64: 1, 2>, scalar_prefetch = 0 : i64, scratch_operands = 0 : i64, tpu.core_type = #tpu.core_type<tc>, window_params = [{transform_indices = @transform_0, window_bounds = array<i64: 128, 64>}, {transform_indices = @transform_1, window_bounds = array<i64: 64, 256>}, {transform_indices = @transform_2, window_bounds = array<i64: 128, 256>}, {transform_indices = @transform_3, window_bounds = array<i64: 1, 8, 256>}]} {
    %c0 = arith.constant 0 : index
    %c0_0 = arith.constant 0 : index
    %0 = vector.load %arg2[%c0, %c0_0] : memref<128x64xbf16, #tpu.memory_space<vmem>>, vector<128x64xbf16>
    %c0_1 = arith.constant 0 : index
    %c0_2 = arith.constant 0 : index
    %1 = vector.load %arg3[%c0_1, %c0_2] : memref<64x256xbf16, #tpu.memory_space<vmem>>, vector<64x256xbf16>
    %cst = arith.constant dense<0.000000e+00> : vector<128x256xf32>
    %2 = tpu.matmul %0, %1, %cst {dimension_numbers = #tpu.dot_dimension_numbers<[1], [0], [0], [1], [0, 0, 1, 1], [], []>} : vector<128x64xbf16>, vector<64x256xbf16>, vector<128x256xf32> -> vector<128x256xf32>
    %3 = arith.truncf %2 : vector<128x256xf32> to vector<128x256xbf16>
    %c0_3 = arith.constant 0 : index
    %c0_4 = arith.constant 0 : index
    %4 = vector.load %arg4[%c0_3, %c0_4] : memref<128x256xbf16, #tpu.memory_space<vmem>>, vector<128x256xbf16>
    tpu.vector_store %arg4[%c0_3, %c0_4], %3 {strides = array<i32>} : memref<128x256xbf16, #tpu.memory_space<vmem>>, vector<128x256xbf16>,
    %cst_5 = arith.constant dense<0.000000e+00> : vector<256xf32>
    %5 = vector.multi_reduction <add>, %2, %cst_5 [0] : vector<128x256xf32> to vector<256xf32>
    %6 = vector.shape_cast %5 : vector<256xf32> to vector<1x256xf32>
    %7 = arith.mulf %2, %2 : vector<128x256xf32>
    %cst_6 = arith.constant dense<0.000000e+00> : vector<256xf32>
    %8 = vector.multi_reduction <add>, %7, %cst_6 [0] : vector<128x256xf32> to vector<256xf32>
    %9 = vector.shape_cast %8 : vector<256xf32> to vector<1x256xf32>
    %10 = tpu.iota {dimensions = array<i32: 0>} : vector<8x256xi32>
    %c4_i32 = arith.constant 4 : i32
    %11 = vector.broadcast %c4_i32 : i32 to vector<8x256xi32>
    %12 = arith.cmpi slt, %10, %11 : vector<8x256xi32>
    %13 = vector.shape_cast %6 : vector<1x256xf32> to vector<1x256xf32>
    %14 = vector.broadcast %13 : vector<1x256xf32> to vector<8x256xf32>
    %15 = vector.shape_cast %9 : vector<1x256xf32> to vector<1x256xf32>
    %16 = vector.broadcast %15 : vector<1x256xf32> to vector<8x256xf32>
    %17 = arith.select %12, %14, %16 : vector<8x256xi1>, vector<8x256xf32>
    %18 = vector.shape_cast %17 : vector<8x256xf32> to vector<1x8x256xf32>
    %c0_7 = arith.constant 0 : index
    %c0_8 = arith.constant 0 : index
    %c0_9 = arith.constant 0 : index
    %19 = vector.load %arg5[%c0_7, %c0_8, %c0_9] : memref<1x8x256xf32, #tpu.memory_space<vmem>>, vector<1x8x256xf32>
    tpu.vector_store %arg5[%c0_7, %c0_8, %c0_9], %18 {strides = array<i32>} : memref<1x8x256xf32, #tpu.memory_space<vmem>>, vector<1x8x256xf32>,
    return
  }
  func.func @transform_0(%arg0: i32, %arg1: i32) -> (i32, i32) {
    %c0_i32 = arith.constant 0 : i32
    %c0_i32_0 = arith.constant 0 : i32
    return %arg0, %c0_i32 : i32, i32
  }
  func.func @transform_1(%arg0: i32, %arg1: i32) -> (i32, i32) {
    %c0_i32 = arith.constant 0 : i32
    %c0_i32_0 = arith.constant 0 : i32
    return %c0_i32, %arg1 : i32, i32
  }
  func.func @transform_2(%arg0: i32, %arg1: i32) -> (i32, i32) {
    %c0_i32 = arith.constant 0 : i32
    return %arg0, %arg1 : i32, i32
  }
  func.func @transform_3(%arg0: i32, %arg1: i32) -> (i32, i32, i32) {
    %c0_i32 = arith.constant 0 : i32
    %c0_i32_0 = arith.constant 0 : i32
    return %arg0, %c0_i32, %arg1 : i32, i32, i32
  }
}

module attributes {stable_mosaic.version = 11 : i64} {
  func.func @_tail_kernel(%arg0: i32, %arg1: i32, %arg2: memref<128x256xbf16, #tpu.memory_space<vmem>>, %arg3: memref<1x256xf32, #tpu.memory_space<vmem>>, %arg4: memref<1x256xf32, #tpu.memory_space<vmem>>, %arg5: memref<128x256xbf16, #tpu.memory_space<vmem>>, %arg6: memref<1x256xf32, #tpu.memory_space<vmem>>, %arg7: memref<1x256xf32, #tpu.memory_space<vmem>>, %arg8: memref<128x256xf32, #tpu.memory_space<vmem>>) attributes {dimension_semantics = [#tpu.dimension_semantics<parallel>, #tpu.dimension_semantics<parallel>], iteration_bounds = array<i64: 1, 2>, scalar_prefetch = 0 : i64, scratch_operands = 0 : i64, tpu.core_type = #tpu.core_type<tc>, window_params = [{transform_indices = @transform_0, window_bounds = array<i64: 128, 256>}, {transform_indices = @transform_1, window_bounds = array<i64: 1, 256>}, {transform_indices = @transform_2, window_bounds = array<i64: 1, 256>}, {transform_indices = @transform_3, window_bounds = array<i64: 128, 256>}, {transform_indices = @transform_4, window_bounds = array<i64: 1, 256>}, {transform_indices = @transform_5, window_bounds = array<i64: 1, 256>}, {transform_indices = @transform_6, window_bounds = array<i64: 128, 256>}]} {
    %c0 = arith.constant 0 : index
    %c0_0 = arith.constant 0 : index
    %0 = vector.load %arg2[%c0, %c0_0] : memref<128x256xbf16, #tpu.memory_space<vmem>>, vector<128x256xbf16>
    %1 = arith.extf %0 : vector<128x256xbf16> to vector<128x256xf32>
    %c0_1 = arith.constant 0 : index
    %c0_2 = arith.constant 0 : index
    %2 = vector.load %arg3[%c0_1, %c0_2] : memref<1x256xf32, #tpu.memory_space<vmem>>, vector<1x256xf32>
    %3 = vector.broadcast %2 : vector<1x256xf32> to vector<128x256xf32>
    %4 = arith.mulf %1, %3 : vector<128x256xf32>
    %c0_3 = arith.constant 0 : index
    %c0_4 = arith.constant 0 : index
    %5 = vector.load %arg4[%c0_3, %c0_4] : memref<1x256xf32, #tpu.memory_space<vmem>>, vector<1x256xf32>
    %6 = vector.broadcast %5 : vector<1x256xf32> to vector<128x256xf32>
    %7 = arith.addf %4, %6 : vector<128x256xf32>
    %cst = arith.constant 0.000000e+00 : f32
    %8 = vector.broadcast %cst : f32 to vector<128x256xf32>
    %9 = arith.maximumf %7, %8 : vector<128x256xf32>
    %c0_5 = arith.constant 0 : index
    %c0_6 = arith.constant 0 : index
    %10 = vector.load %arg5[%c0_5, %c0_6] : memref<128x256xbf16, #tpu.memory_space<vmem>>, vector<128x256xbf16>
    %11 = arith.extf %10 : vector<128x256xbf16> to vector<128x256xf32>
    %c0_7 = arith.constant 0 : index
    %c0_8 = arith.constant 0 : index
    %12 = vector.load %arg6[%c0_7, %c0_8] : memref<1x256xf32, #tpu.memory_space<vmem>>, vector<1x256xf32>
    %13 = vector.broadcast %12 : vector<1x256xf32> to vector<128x256xf32>
    %14 = arith.mulf %11, %13 : vector<128x256xf32>
    %c0_9 = arith.constant 0 : index
    %c0_10 = arith.constant 0 : index
    %15 = vector.load %arg7[%c0_9, %c0_10] : memref<1x256xf32, #tpu.memory_space<vmem>>, vector<1x256xf32>
    %16 = vector.broadcast %15 : vector<1x256xf32> to vector<128x256xf32>
    %17 = arith.addf %14, %16 : vector<128x256xf32>
    %18 = arith.addf %9, %17 : vector<128x256xf32>
    %cst_11 = arith.constant 0.000000e+00 : f32
    %19 = vector.broadcast %cst_11 : f32 to vector<128x256xf32>
    %20 = arith.maximumf %18, %19 : vector<128x256xf32>
    %c0_12 = arith.constant 0 : index
    %c0_13 = arith.constant 0 : index
    %21 = vector.load %arg8[%c0_12, %c0_13] : memref<128x256xf32, #tpu.memory_space<vmem>>, vector<128x256xf32>
    tpu.vector_store %arg8[%c0_12, %c0_13], %20 {strides = array<i32>} : memref<128x256xf32, #tpu.memory_space<vmem>>, vector<128x256xf32>,
    return
  }
  func.func @transform_0(%arg0: i32, %arg1: i32) -> (i32, i32) {
    %c0_i32 = arith.constant 0 : i32
    return %arg0, %arg1 : i32, i32
  }
  func.func @transform_1(%arg0: i32, %arg1: i32) -> (i32, i32) {
    %c0_i32 = arith.constant 0 : i32
    %c0_i32_0 = arith.constant 0 : i32
    return %c0_i32, %arg1 : i32, i32
  }
  func.func @transform_2(%arg0: i32, %arg1: i32) -> (i32, i32) {
    %c0_i32 = arith.constant 0 : i32
    %c0_i32_0 = arith.constant 0 : i32
    return %c0_i32, %arg1 : i32, i32
  }
  func.func @transform_3(%arg0: i32, %arg1: i32) -> (i32, i32) {
    %c0_i32 = arith.constant 0 : i32
    return %arg0, %arg1 : i32, i32
  }
  func.func @transform_4(%arg0: i32, %arg1: i32) -> (i32, i32) {
    %c0_i32 = arith.constant 0 : i32
    %c0_i32_0 = arith.constant 0 : i32
    return %c0_i32, %arg1 : i32, i32
  }
  func.func @transform_5(%arg0: i32, %arg1: i32) -> (i32, i32) {
    %c0_i32 = arith.constant 0 : i32
    %c0_i32_0 = arith.constant 0 : i32
    return %c0_i32, %arg1 : i32, i32
  }
  func.func @transform_6(%arg0: i32, %arg1: i32) -> (i32, i32) {
    %c0_i32 = arith.constant 0 : i32
    return %arg0, %arg1 : i32, i32
  }
}

</mosaic_0001>

<bundles_post_ra>
// kernel: bottleneck_forward.7
= control target key start
LH: loop header
LB: loop body
LE: loop exit
PB: predicated region body
PF: predicated region fallthrough
CT: control target
= control target key end

     0   :  { %s1123_s12 = smov 0   ;;  %s1125_s13 = smov 0   ;;  %s1349_s0 = inlined_call_operand.vmem [shape: bf16[512,64], index: 0, kind: input, shape index: {}]   ;;  %s1350_s1 = inlined_call_operand.vmem [shape: bf16[64,128], index: 1, kind: input, shape index: {}]   ;;  %s1351_s2 = inlined_call_operand.vmem [shape: bf16[512,128], index: 2, kind: output, shape index: {0}]   ;;  %s1352_s3 = inlined_call_operand.vmem [shape: f32[2,8,128], index: 3, kind: output, shape index: {1}]  }
   0x1   :  { %s1127_s14 = smov 0  }
   0x2 LB: > { %s26_s15 = sadd.s32 1, %s1097_s13  ;;  %p824_p0 = scmp.ge.s32.totalorder %s1101_s14, 1  ;;  %s1101_s14 = sphi %s1127_s14, %s14_s14   ;;  %s1097_s13 = sphi %s1125_s13, %s1354_s13   ;;  %s1093_s12 = sphi %s1123_s12, %s1353_s12  }
   0x3   : > { %p28_p1 = scmp.ge.s32.totalorder %s26_s15, 2  ;;  %p166_p2 = scmp.lt.s32.totalorder %s1101_s14, 3 }
   0x5   : > { %s1356_s15 = smov (%p28_p1, %s26_s15), 0  ;;  %p167_p3 = pnand %p824_p0, %p166_p2 }
   0x6   : > { %s825_s18 = sshll.u32 (!%p167_p3), %s1093_s12, 5  ;;  %p223_p5 = scmp.lt.s32.totalorder (!%p167_p3), %s1093_s12, 1 }
   0x7   : > { %170 = sbr.rel (%p167_p3) target bundleno = 276 (0x114), region = 28  ;;  %p205_p4 = scmp.lt.s32.totalorder (!%p167_p3), %s825_s18, 63 }
   0xc   : > { %v947_v0 = vld [vmem:[%s1350_s1 + $0x18] sm:$0xff]  ;;  %v946_v1 = vld [vmem:[%s1350_s1 + $0x10] sm:$0xff]  ;;  %s1358_s18 = smov (!%p205_p4, %s825_s18), 63  ;;  %v945_v2 = vld [vmem:[%s1350_s1 + $0x8] sm:$0xff]  ;;  %vm375_vm0 = vcmask 523264   ;;  %s1360_s12 = smov (!%p223_p5, %s1093_s12), 1 }
   0xd   : > { %428 = vmatpush.bf16.msra.mxu0 %v947_v0  ;;  %1043 = vmatpush.bf16.msra.mxu1 %v947_v0  ;;  %s826_s23 = sshll.u32 %s1358_s18, 2  ;;  %v944_v3 = vld [vmem:[%s1350_s1] sm:$0xff]  ;;  %s829_s5 = sshll.u32 %s1360_s12, 3 }
   0xe   : > { %1044 = vmatpush.bf16.msra.mxu2 %v947_v0  ;;  %1045 = vmatpush.bf16.msra.mxu3 %v947_v0  ;;  %s1164_s28 = scalar_lea.vmem %s1349_s0, %s826_s23  ;;  %s1207_s4 = scalar_lea.vmem %s1351_s2, %s826_s23 }
   0xf   : > { %v928_v4 = vld [vmem:[%s1164_s28] sm:$0xff]  ;;  %v929_v8 = vld [vmem:[%s1164_s28 + $0x8] sm:$0xff]  ;;  %v930_v12 = vld [vmem:[%s1164_s28 + $0x10] sm:$0xff]  ;;  %s229_s8 = scalar_lea.vmem %s1352_s3, %s829_s5 }
  0x10   : > { %v932_v5 = vld [vmem:[%s1164_s28 + $0x20] sm:$0xff]  ;;  %v933_v9 = vld [vmem:[%s1164_s28 + $0x28] sm:$0xff]  ;;  %v934_v13 = vld [vmem:[%s1164_s28 + $0x30] sm:$0xff] }
  0x11   : > { %429 = vmatpush.bf16.msra.mxu0 %v946_v1  ;;  %1046 = vmatpush.bf16.msra.mxu1 %v946_v1  ;;  %v936_v6 = vld [vmem:[%s1164_s28 + $0x40] sm:$0xff]  ;;  %v937_v10 = vld [vmem:[%s1164_s28 + $0x48] sm:$0xff]  ;;  %v938_v14 = vld [vmem:[%s1164_s28 + $0x50] sm:$0xff] }
  0x12   : > { %1047 = vmatpush.bf16.msra.mxu2 %v946_v1  ;;  %1048 = vmatpush.bf16.msra.mxu3 %v946_v1  ;;  %v940_v7 = vld [vmem:[%s1164_s28 + $0x60] sm:$0xff]  ;;  %v941_v11 = vld [vmem:[%s1164_s28 + $0x68] sm:$0xff]  ;;  %v942_v15 = vld [vmem:[%s1164_s28 + $0x70] sm:$0xff] }
  0x13   : > { %v931_v16 = vld [vmem:[%s1164_s28 + $0x18] sm:$0xff] }
  0x14   : > { %v935_v17 = vld [vmem:[%s1164_s28 + $0x38] sm:$0xff] }
  0x15   : > { %430 = vmatpush.bf16.msra.mxu0 %v945_v2  ;;  %1049 = vmatpush.bf16.msra.mxu1 %v945_v2  ;;  %v939_v18 = vld [vmem:[%s1164_s28 + $0x58] sm:$0xff] }
  0x16   : > { %1050 = vmatpush.bf16.msra.mxu2 %v945_v2  ;;  %1051 = vmatpush.bf16.msra.mxu3 %v945_v2  ;;  %v943_v19 = vld [vmem:[%s1164_s28 + $0x78] sm:$0xff] }
  0x19   : > { %431 = vmatpush.bf16.msra.mxu0 %v944_v3  ;;  %1052 = vmatpush.bf16.msra.mxu1 %v944_v3 }
  0x1a   : > { %1053 = vmatpush.bf16.msra.mxu2 %v944_v3  ;;  %1054 = vmatpush.bf16.msra.mxu3 %v944_v3 }
  0x1c   : > { %910 = vmatmul.msk.bf16.vlgmr.msra.gmra.mxu0 %vm375_vm0, %v928_v4  ;;  %914 = vmatmul.msk.bf16.vlgmr.msra.gmra.mxu1 %vm375_vm0, %v932_v5 }
  0x1d   : > { %918 = vmatmul.msk.bf16.vlgmr.msra.gmra.mxu2 %vm375_vm0, %v936_v6  ;;  %922 = vmatmul.msk.bf16.vlgmr.msra.gmra.mxu3 %vm375_vm0, %v940_v7 }
  0x2c   : > { %911 = vmatmul.msk.bf16.gmra.mxu0 %vm375_vm0, %v929_v8  ;;  %915 = vmatmul.msk.bf16.gmra.mxu1 %vm375_vm0, %v933_v9 }
  0x2d   : > { %919 = vmatmul.msk.bf16.gmra.mxu2 %vm375_vm0, %v937_v10  ;;  %923 = vmatmul.msk.bf16.gmra.mxu3 %vm375_vm0, %v941_v11 }
  0x3c   : > { %912 = vmatmul.msk.bf16.gmra.mxu0 %vm375_vm0, %v930_v12  ;;  %916 = vmatmul.msk.bf16.gmra.mxu1 %vm375_vm0, %v934_v13 }
  0x3d   : > { %920 = vmatmul.msk.bf16.gmra.mxu2 %vm375_vm0, %v938_v14  ;;  %924 = vmatmul.msk.bf16.gmra.mxu3 %vm375_vm0, %v942_v15 }
  0x4c   : > { %913 = vmatmul.msk.bf16.gmra.mxu0 %vm375_vm0, %v931_v16  ;;  %917 = vmatmul.msk.bf16.gmra.mxu1 %vm375_vm0, %v935_v17 }
  0x4d   : > { %921 = vmatmul.msk.bf16.gmra.mxu2 %vm375_vm0, %v939_v18  ;;  %925 = vmatmul.msk.bf16.gmra.mxu3 %vm375_vm0, %v943_v19 }
  0x99   : > { %v433_v20 = vpop.f32.mrf.mxu0  ;;  %v1198_v21 = vpop.f32.mrf.mxu1 }
  0x9a   : > { %v614_v53 = vmul.f32 %v433_v20, %v433_v20 }
  0xa0   : > { %v1200_v22 = vpop.f32.mrf.mxu2  ;;  %v1213_v27 = vpop.f32.mrf.mxu3 }
  0xa1   : > { %v435_v23 = vpop.f32.mrf.mxu0  ;;  %v1209_v24 = vpop.f32.mrf.mxu1 }
  0xa2   : > { %v951_v25 = vpack.c.bf16 %v435_v23, %v433_v20  ;;  %v971_v26 = vpack.c.bf16 %v1209_v24, %v1198_v21  ;;  %v615_v52 = vmul.f32 %v435_v23, %v435_v23  ;;  %v577_v55 = vadd.f32 %v435_v23, %v433_v20 }
  0xa3   : > { %v622_v23 = vmul.f32 %v1198_v21, %v1198_v21 }
  0xa4   : > { %952 = vst [vmem:[%s1207_s4] sm:$0xff] %v951_v25   ;;  %v646_v56 = vadd.f32 %v615_v52, %v614_v53 }
  0xa5   : > { %1031 = vst [vmem:[%s1207_s4 + $0x20] sm:$0xff] %v971_v26  }
  0xa8   : > { %v1217_v28 = vpop.f32.mrf.mxu2  ;;  %v1223_v32 = vpop.f32.mrf.mxu3 }
  0xa9   : > { %v438_v29 = vpop.f32.mrf.mxu0  ;;  %v1219_v30 = vpop.f32.mrf.mxu1  ;;  %v991_v31 = vpack.c.bf16 %v1217_v28, %v1200_v22  ;;  %v1011_v33 = vpack.c.bf16 %v1223_v32, %v1213_v27 }
  0xaa   : > { %v616_v54 = vmul.f32 %v438_v29, %v438_v29  ;;  %v578_v58 = vadd.f32 %v577_v55, %v438_v29 }
  0xab   : > { %1035 = vst [vmem:[%s1207_s4 + $0x40] sm:$0xff] %v991_v31  }
  0xac   : > { %1039 = vst [vmem:[%s1207_s4 + $0x60] sm:$0xff] %v1011_v33   ;;  %v647_v60 = vadd.f32 %v646_v56, %v616_v54 }
  0xb0   : > { %v1229_v34 = vpop.f32.mrf.mxu2  ;;  %v1235_v39 = vpop.f32.mrf.mxu3 }
  0xb1   : > { %v440_v35 = vpop.f32.mrf.mxu0  ;;  %v1231_v36 = vpop.f32.mrf.mxu1 }
  0xb2   : > { %v956_v37 = vpack.c.bf16 %v440_v35, %v438_v29  ;;  %v976_v38 = vpack.c.bf16 %v1231_v36, %v1219_v30  ;;  %v617_v57 = vmul.f32 %v440_v35, %v440_v35  ;;  %v579_v1 = vadd.f32 %v578_v58, %v440_v35 }
  0xb3   : > { %v623_v29 = vmul.f32 %v1209_v24, %v1209_v24  ;;  %v624_v35 = vmul.f32 %v1219_v30, %v1219_v30 }
  0xb4   : > { %1028 = vst [vmem:[%s1207_s4 + $0x8] sm:$0xff] %v956_v37   ;;  %v648_v3 = vadd.f32 %v647_v60, %v617_v57 }
  0xb5   : > { %1032 = vst [vmem:[%s1207_s4 + $0x28] sm:$0xff] %v976_v38  }
  0xb8   : > { %v1239_v40 = vpop.f32.mrf.mxu2  ;;  %v1245_v44 = vpop.f32.mrf.mxu3 }
  0xb9   : > { %v443_v41 = vpop.f32.mrf.mxu0  ;;  %v1241_v42 = vpop.f32.mrf.mxu1  ;;  %v996_v43 = vpack.c.bf16 %v1239_v40, %v1229_v34  ;;  %v1016_v45 = vpack.c.bf16 %v1245_v44, %v1235_v39 }
  0xba   : > { %v618_v61 = vmul.f32 %v443_v41, %v443_v41  ;;  %v580_v6 = vadd.f32 %v579_v1, %v443_v41  ;;  %v631_v1 = vmul.f32 %v1217_v28, %v1217_v28 }
  0xbb   : > { %1036 = vst [vmem:[%s1207_s4 + $0x48] sm:$0xff] %v996_v43  }
  0xbc   : > { %1040 = vst [vmem:[%s1207_s4 + $0x68] sm:$0xff] %v1016_v45   ;;  %v649_v7 = vadd.f32 %v648_v3, %v618_v61 }
  0xc0   : > { %v1251_v46 = vpop.f32.mrf.mxu2  ;;  %v1257_v51 = vpop.f32.mrf.mxu3 }
  0xc1   : > { %v445_v47 = vpop.f32.mrf.mxu0  ;;  %v1253_v48 = vpop.f32.mrf.mxu1 }
  0xc2   : > { %v961_v49 = vpack.c.bf16 %v445_v47, %v443_v41  ;;  %v981_v50 = vpack.c.bf16 %v1253_v48, %v1241_v42  ;;  %v619_v4 = vmul.f32 %v445_v47, %v445_v47  ;;  %v581_v9 = vadd.f32 %v580_v6, %v445_v47 }
  0xc3   : > { %v633_v6 = vmul.f32 %v1239_v40, %v1239_v40 }
  0xc4   : > { %1029 = vst [vmem:[%s1207_s4 + $0x10] sm:$0xff] %v961_v49   ;;  %v650_v10 = vadd.f32 %v649_v7, %v619_v4 }
  0xc5   : > { %1033 = vst [vmem:[%s1207_s4 + $0x30] sm:$0xff] %v981_v50   ;;  %v626_v50 = vmul.f32 %v1241_v42, %v1241_v42 }
  0xc8   : > { %v1261_v59 = vpop.f32.mrf.mxu2  ;;  %v1265_v2 = vpop.f32.mrf.mxu3 }
  0xc9   : > { %v448_v62 = vpop.f32.mrf.mxu0  ;;  %v468_v63 = vpop.f32.mrf.mxu1  ;;  %v1001_v0 = vpack.c.bf16 %v1261_v59, %v1251_v46  ;;  %v1021_v5 = vpack.c.bf16 %v1265_v2, %v1257_v51 }
  0xca   : > { %v620_v8 = vmul.f32 %v448_v62, %v448_v62  ;;  %v582_v11 = vadd.f32 %v581_v9, %v448_v62  ;;  %v628_v57 = vmul.f32 %v468_v63, %v468_v63 }
  0xcb   : > { %1037 = vst [vmem:[%s1207_s4 + $0x50] sm:$0xff] %v1001_v0  }
  0xcc   : > { %1041 = vst [vmem:[%s1207_s4 + $0x70] sm:$0xff] %v1021_v5   ;;  %v651_v13 = vadd.f32 %v650_v10, %v620_v8 }
  0xd0   : > { %v488_v12 = vpop.f32.mrf.mxu2  ;;  %v1271_v20 = vpop.f32.mrf.mxu3 }
  0xd1   : > { %v450_v14 = vpop.f32.mrf.mxu0  ;;  %v470_v15 = vpop.f32.mrf.mxu1 }
  0xd2   : > { %v966_v16 = vpack.c.bf16 %v450_v14, %v448_v62  ;;  %v583_v17 = vadd.f32 %v582_v11, %v450_v14  ;;  %v621_v18 = vmul.f32 %v450_v14, %v450_v14  ;;  %v986_v19 = vpack.c.bf16 %v470_v15, %v468_v63 }
  0xd3   : > { %v629_v61 = vmul.f32 %v470_v15, %v470_v15  ;;  %v630_v62 = vmul.f32 %v1200_v22, %v1200_v22  ;;  %v635_v11 = vmul.f32 %v1261_v59, %v1261_v59 }
  0xd4   : > { %1030 = vst [vmem:[%s1207_s4 + $0x18] sm:$0xff] %v966_v16   ;;  %v584_v25 = vadd.f32 %v583_v17, %v1198_v21  ;;  %v652_v26 = vadd.f32 %v651_v13, %v621_v18  ;;  %v625_v21 = vmul.f32 %v1231_v36, %v1231_v36 }
  0xd5   : > { %1034 = vst [vmem:[%s1207_s4 + $0x38] sm:$0xff] %v986_v19  }
  0xd6   : > { %v585_v31 = vadd.f32 %v584_v25, %v1209_v24  ;;  %v653_v33 = vadd.f32 %v652_v26, %v622_v23 }
  0xd8   : > { %v586_v37 = vadd.f32 %v585_v31, %v1219_v30  ;;  %v654_v38 = vadd.f32 %v653_v33, %v623_v29  ;;  %v490_v41 = vpop.f32.mrf.mxu2  ;;  %v510_v49 = vpop.f32.mrf.mxu3  ;;  %v627_v30 = vmul.f32 %v1253_v48, %v1253_v48  ;;  %v641_v31 = vmul.f32 %v1245_v44, %v1245_v44 }
  0xd9   : > { %v1006_v43 = vpack.c.bf16 %v490_v41, %v488_v12  ;;  %v1026_v24 = vpack.c.bf16 %v510_v49, %v1271_v20  ;;  %v637_v18 = vmul.f32 %v490_v41, %v490_v41 }
  0xda   : > { %v655_v45 = vadd.f32 %v654_v38, %v624_v35  ;;  %v587_v47 = vadd.f32 %v586_v37, %v1231_v36  ;;  %v642_v35 = vmul.f32 %v1257_v51, %v1257_v51 }
  0xdb   : > { %1038 = vst [vmem:[%s1207_s4 + $0x58] sm:$0xff] %v1006_v43  }
  0xdc   : > { %v588_v52 = vadd.f32 %v587_v47, %v1241_v42  ;;  %v656_v53 = vadd.f32 %v655_v45, %v625_v21  ;;  %1042 = vst [vmem:[%s1207_s4 + $0x78] sm:$0xff] %v1026_v24   ;;  %v644_v45 = vmul.f32 %v1271_v20, %v1271_v20  ;;  %v645_v24 = vmul.f32 %v510_v49, %v510_v49 }
  0xde   : > { %v589_v54 = vadd.f32 %v588_v52, %v1253_v48  ;;  %v657_v55 = vadd.f32 %v656_v53, %v626_v50  ;;  %v632_v48 = vmul.f32 %v1229_v34, %v1229_v34 }
  0xe0   : > { %v590_v56 = vadd.f32 %v589_v54, %v468_v63  ;;  %v658_v36 = vadd.f32 %v657_v55, %v627_v30  ;;  %v683_v30 = vlaneseq }
  0xe2   : > { %v659_v58 = vadd.f32 %v658_v36, %v628_v57  ;;  %v591_v60 = vadd.f32 %v590_v56, %v470_v15  ;;  %v636_v15 = vmul.f32 %v488_v12, %v488_v12  ;;  %v684_v57 = vshrl.u32 %v683_v30, 7 }
  0xe4   : > { %v592_v0 = vadd.f32 %v591_v60, %v1200_v22  ;;  %v660_v42 = vadd.f32 %v659_v58, %v629_v61  ;;  %v634_v22 = vmul.f32 %v1251_v46, %v1251_v46  ;;  %vm685_vm1 = vcmp.lt.s32.totalorder %v684_v57, 4 }
  0xe6   : > { %v593_v3 = vadd.f32 %v592_v0, %v1217_v28  ;;  %v661_v4 = vadd.f32 %v660_v42, %v630_v62 }
  0xe8   : > { %v594_v63 = vadd.f32 %v593_v3, %v1229_v34  ;;  %v662_v5 = vadd.f32 %v661_v4, %v631_v1 }
  0xea   : > { %v663_v7 = vadd.f32 %v662_v5, %v632_v48  ;;  %v595_v8 = vadd.f32 %v594_v63, %v1239_v40  ;;  %v638_v40 = vmul.f32 %v1213_v27, %v1213_v27 }
  0xec   : > { %v596_v9 = vadd.f32 %v595_v8, %v1251_v46  ;;  %v664_v10 = vadd.f32 %v663_v7, %v633_v6  ;;  %v639_v46 = vmul.f32 %v1223_v32, %v1223_v32 }
  0xee   : > { %v597_v28 = vadd.f32 %v596_v9, %v1261_v59  ;;  %v665_v13 = vadd.f32 %v664_v10, %v634_v22  ;;  %v640_v59 = vmul.f32 %v1235_v39, %v1235_v39 }
  0xf0   : > { %v666_v34 = vadd.f32 %v665_v13, %v635_v11  ;;  %v598_v14 = vadd.f32 %v597_v28, %v488_v12 }
  0xf2   : > { %v667_v16 = vadd.f32 %v666_v34, %v636_v15  ;;  %v599_v17 = vadd.f32 %v598_v14, %v490_v41  ;;  %v643_v41 = vmul.f32 %v1265_v2, %v1265_v2 }
  0xf4   : > { %v600_v19 = vadd.f32 %v599_v17, %v1213_v27  ;;  %v668_v23 = vadd.f32 %v667_v16, %v637_v18 }
  0xf6   : > { %v601_v25 = vadd.f32 %v600_v19, %v1223_v32  ;;  %v669_v26 = vadd.f32 %v668_v23, %v638_v40 }
  0xf8   : > { %v602_v12 = vadd.f32 %v601_v25, %v1235_v39  ;;  %v670_v29 = vadd.f32 %v669_v26, %v639_v46 }
  0xfa   : > { %v671_v33 = vadd.f32 %v670_v29, %v640_v59  ;;  %v603_v27 = vadd.f32 %v602_v12, %v1245_v44 }
  0xfc   : > { %v604_v37 = vadd.f32 %v603_v27, %v1257_v51  ;;  %v672_v32 = vadd.f32 %v671_v33, %v641_v31 }
  0xfe   : > { %v605_v38 = vadd.f32 %v604_v37, %v1265_v2  ;;  %v673_v39 = vadd.f32 %v672_v32, %v642_v35 }
 0x100   : > { %v674_v43 = vadd.f32 %v673_v39, %v643_v41  ;;  %v606_v21 = vadd.f32 %v605_v38, %v1271_v20 }
 0x102   : > { %v675_v44 = vadd.f32 %v674_v43, %v644_v45  ;;  %v607_v47 = vadd.f32 %v606_v21, %v510_v49 }
 0x104   : > { %v608_v50 = vrot.slane %v607_v47, 4  ;;  %v676_v52 = vadd.f32 %v675_v44, %v645_v24 }
 0x106   : > { %v609_v51 = vadd.f32 %v608_v50, %v607_v47  ;;  %v677_v53 = vrot.slane %v676_v52, 4 }
 0x108   : > { %v610_v54 = vrot.slane %v609_v51, 2  ;;  %v678_v55 = vadd.f32 %v677_v53, %v676_v52 }
 0x10a   : > { %v611_v2 = vadd.f32 %v610_v54, %v609_v51  ;;  %v679_v56 = vrot.slane %v678_v55, 2 }
 0x10c   : > { %v612_v36 = vrot.slane %v611_v2, 1  ;;  %v680_v58 = vadd.f32 %v679_v56, %v678_v55 }
 0x10e   : > { %v681_v60 = vrot.slane %v680_v58, 1  ;;  %v613_v20 = vadd.f32 %v612_v36, %v611_v2 }
 0x110   : > { %v682_v49 = vadd.f32 %v681_v60, %v680_v58 }
 0x112   : > { %v686_v61 = vsel %vm685_vm1, %v613_v20, %v682_v49 }
 0x113   : > { %687 = vst [vmem:[%s229_s8] sm:$0xff] %v686_v61 }
 0x114 PF: > { %s14_s14 = sadd.s32 1, %s1101_s14   ;;  %s1353_s12 = smov %s1097_s13 }
 0x115   : > { %p11_p6 = scmp.ge.s32.totalorder %s14_s14, 4   ;;  %s1354_s13 = smov %s1356_s15 }
 0x117   :  { %13 = sbr.rel (!%p11_p6) target bundleno = 2 (0x2), region = 73 }

// kernel: bottleneck_forward.8
= control target key start
LH: loop header
LB: loop body
LE: loop exit
PB: predicated region body
PF: predicated region fallthrough
CT: control target
= control target key end

     0   :  { %s1176_s0 = inlined_call_operand.vmem [shape: bf16[512,128], index: 0, kind: input, shape index: {}]   ;;  %s1177_s1 = inlined_call_operand.vmem [shape: f32[1,128], index: 1, kind: input, shape index: {}]   ;;  %s1178_s2 = inlined_call_operand.vmem [shape: f32[1,128], index: 2, kind: input, shape index: {}]   ;;  %s1179_s3 = inlined_call_operand.vmem [shape: bf16[512,128], index: 3, kind: output, shape index: {}]  }
   0x1   :  { %v475_v0 = vld [vmem:[%s1176_s0] sm:$0xff]   ;;  %v762_v5 = vld [vmem:[%s1176_s0 + $0x8] sm:$0xff]   ;;  %v763_v8 = vld [vmem:[%s1176_s0 + $0x10] sm:$0xff]  }
   0x2   :  { %v852_v1 = vld [vmem:[%s1177_s1] ss:$0 sm:$0xff]  ;;  %v476_v2 = vunpack.c.l.bf16 %v475_v0  ;;  %v477_v3 = vunpack.c.h.bf16 %v475_v0  ;;  %v480_v6 = vunpack.c.l.bf16 %v762_v5  ;;  %v481_v7 = vunpack.c.h.bf16 %v762_v5  ;;  %v764_v9 = vld [vmem:[%s1176_s0 + $0x18] sm:$0xff]   ;;  %v766_v35 = vld [vmem:[%s1176_s0 + $0x28] sm:$0xff]  }
   0x3   :  { %v857_v4 = vld [vmem:[%s1178_s2] ss:$0 sm:$0xff]  ;;  %v484_v12 = vunpack.c.l.bf16 %v763_v8  ;;  %v485_v13 = vunpack.c.h.bf16 %v763_v8  ;;  %v488_v16 = vunpack.c.l.bf16 %v764_v9  ;;  %v489_v17 = vunpack.c.h.bf16 %v764_v9  ;;  %v767_v40 = vld [vmem:[%s1176_s0 + $0x30] sm:$0xff]   ;;  %v768_v45 = vld [vmem:[%s1176_s0 + $0x38] sm:$0xff]  }
   0x4   :  { %v146_v10 = vmul.f32 %v852_v1, %v476_v2  ;;  %v147_v11 = vmul.f32 %v852_v1, %v477_v3  ;;  %v148_v14 = vmul.f32 %v852_v1, %v480_v6  ;;  %v149_v15 = vmul.f32 %v852_v1, %v481_v7  ;;  %v765_v26 = vld [vmem:[%s1176_s0 + $0x20] sm:$0xff]  }
   0x5   :  { %v150_v20 = vmul.f32 %v852_v1, %v484_v12  ;;  %v151_v21 = vmul.f32 %v852_v1, %v485_v13  ;;  %v152_v24 = vmul.f32 %v852_v1, %v488_v16  ;;  %v153_v25 = vmul.f32 %v852_v1, %v489_v17  ;;  %v769_v62 = vld [vmem:[%s1176_s0 + $0x40] sm:$0xff]   ;;  %v770_v13 = vld [vmem:[%s1176_s0 + $0x48] sm:$0xff]  }
   0x6   :  { %v214_v18 = vadd.f32 %v857_v4, %v146_v10  ;;  %v215_v19 = vadd.f32 %v857_v4, %v147_v11  ;;  %v216_v22 = vadd.f32 %v857_v4, %v148_v14  ;;  %v217_v23 = vadd.f32 %v857_v4, %v149_v15 }
   0x7   :  { %v218_v29 = vadd.f32 %v857_v4, %v150_v20  ;;  %v219_v30 = vadd.f32 %v857_v4, %v151_v21  ;;  %v220_v33 = vadd.f32 %v857_v4, %v152_v24  ;;  %v221_v34 = vadd.f32 %v857_v4, %v153_v25 }
   0x8   :  { %v278_v27 = vmax.f32 %v214_v18, 0.0  ;;  %v279_v28 = vmax.f32 %v215_v19, 0.0  ;;  %v280_v31 = vmax.f32 %v216_v22, 0.0  ;;  %v281_v32 = vmax.f32 %v217_v23, 0.0  ;;  %v771_v18 = vld [vmem:[%s1176_s0 + $0x50] sm:$0xff]   ;;  %v772_v23 = vld [vmem:[%s1176_s0 + $0x58] sm:$0xff]  }
   0x9   :  { %v282_v37 = vmax.f32 %v218_v29, 0.0  ;;  %v283_v38 = vmax.f32 %v219_v30, 0.0  ;;  %v492_v39 = vunpack.c.l.bf16 %v765_v26  ;;  %v284_v42 = vmax.f32 %v220_v33, 0.0 }
   0xa   :  { %v605_v36 = vpack.c.bf16 %v279_v28, %v278_v27  ;;  %v610_v41 = vpack.c.bf16 %v281_v32, %v280_v31  ;;  %v285_v43 = vmax.f32 %v221_v34, 0.0  ;;  %v493_v44 = vunpack.c.h.bf16 %v765_v26 }
   0xb   :  { %v615_v46 = vpack.c.bf16 %v283_v38, %v282_v37  ;;  %v154_v47 = vmul.f32 %v852_v1, %v492_v39  ;;  %v496_v48 = vunpack.c.l.bf16 %v766_v35  ;;  %v497_v49 = vunpack.c.h.bf16 %v766_v35 }
   0xc   :  { %606 = vst [vmem:[%s1179_s3] sm:$0xff] %v605_v36   ;;  %v620_v50 = vpack.c.bf16 %v285_v43, %v284_v42  ;;  %v155_v51 = vmul.f32 %v852_v1, %v493_v44  ;;  %v500_v52 = vunpack.c.l.bf16 %v767_v40  ;;  %v501_v53 = vunpack.c.h.bf16 %v767_v40  ;;  %v773_v36 = vld [vmem:[%s1176_s0 + $0x60] sm:$0xff]  }
   0xd   :  { %793 = vst [vmem:[%s1179_s3 + $0x8] sm:$0xff] %v610_v41   ;;  %v222_v54 = vadd.f32 %v857_v4, %v154_v47  ;;  %v156_v55 = vmul.f32 %v852_v1, %v496_v48  ;;  %v157_v56 = vmul.f32 %v852_v1, %v497_v49  ;;  %v504_v57 = vunpack.c.l.bf16 %v768_v45 }
   0xe   :  { %794 = vst [vmem:[%s1179_s3 + $0x10] sm:$0xff] %v615_v46   ;;  %v223_v58 = vadd.f32 %v857_v4, %v155_v51  ;;  %v158_v59 = vmul.f32 %v852_v1, %v500_v52  ;;  %v159_v60 = vmul.f32 %v852_v1, %v501_v53  ;;  %v505_v61 = vunpack.c.h.bf16 %v768_v45  ;;  %v774_v53 = vld [vmem:[%s1176_s0 + $0x68] sm:$0xff]  }
   0xf   :  { %795 = vst [vmem:[%s1179_s3 + $0x18] sm:$0xff] %v620_v50   ;;  %v286_v63 = vmax.f32 %v222_v54, 0.0  ;;  %v224_v0 = vadd.f32 %v857_v4, %v156_v55  ;;  %v225_v2 = vadd.f32 %v857_v4, %v157_v56  ;;  %v160_v3 = vmul.f32 %v852_v1, %v504_v57 }
  0x10   :  { %v287_v5 = vmax.f32 %v223_v58, 0.0  ;;  %v226_v6 = vadd.f32 %v857_v4, %v158_v59  ;;  %v227_v7 = vadd.f32 %v857_v4, %v159_v60  ;;  %v161_v8 = vmul.f32 %v852_v1, %v505_v61  ;;  %v775_v58 = vld [vmem:[%s1176_s0 + $0x70] sm:$0xff]  }
  0x11   :  { %v288_v9 = vmax.f32 %v224_v0, 0.0  ;;  %v289_v10 = vmax.f32 %v225_v2, 0.0  ;;  %v228_v11 = vadd.f32 %v857_v4, %v160_v3  ;;  %v508_v12 = vunpack.c.l.bf16 %v769_v62 }
  0x12   :  { %v625_v14 = vpack.c.bf16 %v287_v5, %v286_v63  ;;  %v290_v15 = vmax.f32 %v226_v6, 0.0  ;;  %v291_v16 = vmax.f32 %v227_v7, 0.0  ;;  %v229_v17 = vadd.f32 %v857_v4, %v161_v8  ;;  %v776_v63 = vld [vmem:[%s1176_s0 + $0x78] sm:$0xff]  }
  0x13   :  { %v630_v19 = vpack.c.bf16 %v289_v10, %v288_v9  ;;  %v292_v20 = vmax.f32 %v228_v11, 0.0  ;;  %v509_v21 = vunpack.c.h.bf16 %v769_v62  ;;  %v162_v22 = vmul.f32 %v852_v1, %v508_v12 }
  0x14   :  { %796 = vst [vmem:[%s1179_s3 + $0x20] sm:$0xff] %v625_v14   ;;  %v635_v24 = vpack.c.bf16 %v291_v16, %v290_v15  ;;  %v293_v25 = vmax.f32 %v229_v17, 0.0  ;;  %v512_v26 = vunpack.c.l.bf16 %v770_v13  ;;  %v513_v27 = vunpack.c.h.bf16 %v770_v13  ;;  %v777_v14 = vld [vmem:[%s1176_s0 + $0x80] sm:$0xff]  }
  0x15   :  { %797 = vst [vmem:[%s1179_s3 + $0x28] sm:$0xff] %v630_v19   ;;  %v163_v28 = vmul.f32 %v852_v1, %v509_v21  ;;  %v230_v29 = vadd.f32 %v857_v4, %v162_v22  ;;  %v516_v30 = vunpack.c.l.bf16 %v771_v18  ;;  %v517_v31 = vunpack.c.h.bf16 %v771_v18 }
  0x16   :  { %798 = vst [vmem:[%s1179_s3 + $0x30] sm:$0xff] %v635_v24   ;;  %v640_v32 = vpack.c.bf16 %v293_v25, %v292_v20  ;;  %v164_v33 = vmul.f32 %v852_v1, %v512_v26  ;;  %v165_v34 = vmul.f32 %v852_v1, %v513_v27  ;;  %v520_v35 = vunpack.c.l.bf16 %v772_v23  ;;  %v778_v27 = vld [vmem:[%s1176_s0 + $0x88] sm:$0xff]  }
  0x17   :  { %v231_v37 = vadd.f32 %v857_v4, %v163_v28  ;;  %v294_v38 = vmax.f32 %v230_v29, 0.0  ;;  %v166_v39 = vmul.f32 %v852_v1, %v516_v30  ;;  %v167_v40 = vmul.f32 %v852_v1, %v517_v31 }
  0x18   :  { %799 = vst [vmem:[%s1179_s3 + $0x38] sm:$0xff] %v640_v32   ;;  %v232_v41 = vadd.f32 %v857_v4, %v164_v33  ;;  %v233_v42 = vadd.f32 %v857_v4, %v165_v34  ;;  %v521_v43 = vunpack.c.h.bf16 %v772_v23  ;;  %v168_v44 = vmul.f32 %v852_v1, %v520_v35 }
  0x19   :  { %v295_v45 = vmax.f32 %v231_v37, 0.0  ;;  %v234_v46 = vadd.f32 %v857_v4, %v166_v39  ;;  %v235_v47 = vadd.f32 %v857_v4, %v167_v40  ;;  %v524_v48 = vunpack.c.l.bf16 %v773_v36 }
  0x1a   :  { %v296_v49 = vmax.f32 %v232_v41, 0.0  ;;  %v297_v50 = vmax.f32 %v233_v42, 0.0  ;;  %v169_v51 = vmul.f32 %v852_v1, %v521_v43  ;;  %v236_v52 = vadd.f32 %v857_v4, %v168_v44  ;;  %v780_v41 = vld [vmem:[%s1176_s0 + $0x98] sm:$0xff]  }
  0x1b   :  { %v645_v54 = vpack.c.bf16 %v295_v45, %v294_v38  ;;  %v298_v55 = vmax.f32 %v234_v46, 0.0  ;;  %v299_v56 = vmax.f32 %v235_v47, 0.0  ;;  %v525_v57 = vunpack.c.h.bf16 %v773_v36  ;;  %v779_v36 = vld [vmem:[%s1176_s0 + $0x90] sm:$0xff]  }
  0x1c   :  { %v650_v59 = vpack.c.bf16 %v297_v50, %v296_v49  ;;  %v237_v60 = vadd.f32 %v857_v4, %v169_v51  ;;  %v300_v61 = vmax.f32 %v236_v52, 0.0  ;;  %v170_v62 = vmul.f32 %v852_v1, %v524_v48 }
  0x1d   :  { %800 = vst [vmem:[%s1179_s3 + $0x40] sm:$0xff] %v645_v54   ;;  %v655_v0 = vpack.c.bf16 %v299_v56, %v298_v55  ;;  %v171_v2 = vmul.f32 %v852_v1, %v525_v57  ;;  %v528_v3 = vunpack.c.l.bf16 %v774_v53  ;;  %v529_v5 = vunpack.c.h.bf16 %v774_v53  ;;  %v781_v54 = vld [vmem:[%s1176_s0 + $0xa0] sm:$0xff]  }
  0x1e   :  { %801 = vst [vmem:[%s1179_s3 + $0x48] sm:$0xff] %v650_v59   ;;  %v301_v6 = vmax.f32 %v237_v60, 0.0  ;;  %v238_v7 = vadd.f32 %v857_v4, %v170_v62  ;;  %v532_v8 = vunpack.c.l.bf16 %v775_v58  ;;  %v533_v9 = vunpack.c.h.bf16 %v775_v58 }
  0x1f   :  { %802 = vst [vmem:[%s1179_s3 + $0x50] sm:$0xff] %v655_v0   ;;  %v239_v10 = vadd.f32 %v857_v4, %v171_v2  ;;  %v172_v11 = vmul.f32 %v852_v1, %v528_v3  ;;  %v173_v12 = vmul.f32 %v852_v1, %v529_v5  ;;  %v536_v13 = vunpack.c.l.bf16 %v776_v63  ;;  %v782_v5 = vld [vmem:[%s1176_s0 + $0xa8] sm:$0xff]  }
  0x20   :  { %v660_v15 = vpack.c.bf16 %v301_v6, %v300_v61  ;;  %v302_v16 = vmax.f32 %v238_v7, 0.0  ;;  %v174_v17 = vmul.f32 %v852_v1, %v532_v8  ;;  %v175_v18 = vmul.f32 %v852_v1, %v533_v9 }
  0x21   :  { %v303_v19 = vmax.f32 %v239_v10, 0.0  ;;  %v240_v20 = vadd.f32 %v857_v4, %v172_v11  ;;  %v241_v21 = vadd.f32 %v857_v4, %v173_v12  ;;  %v537_v22 = vunpack.c.h.bf16 %v776_v63 }
  0x22   :  { %803 = vst [vmem:[%s1179_s3 + $0x58] sm:$0xff] %v660_v15   ;;  %v242_v23 = vadd.f32 %v857_v4, %v174_v17  ;;  %v243_v24 = vadd.f32 %v857_v4, %v175_v18  ;;  %v176_v25 = vmul.f32 %v852_v1, %v536_v13  ;;  %v540_v26 = vunpack.c.l.bf16 %v777_v14 }
  0x23   :  { %v665_v28 = vpack.c.bf16 %v303_v19, %v302_v16  ;;  %v304_v29 = vmax.f32 %v240_v20, 0.0  ;;  %v305_v30 = vmax.f32 %v241_v21, 0.0  ;;  %v177_v31 = vmul.f32 %v852_v1, %v537_v22 }
  0x24   :  { %v306_v32 = vmax.f32 %v242_v23, 0.0  ;;  %v307_v33 = vmax.f32 %v243_v24, 0.0  ;;  %v244_v34 = vadd.f32 %v857_v4, %v176_v25  ;;  %v541_v35 = vunpack.c.h.bf16 %v777_v14  ;;  %v783_v14 = vld [vmem:[%s1176_s0 + $0xb0] sm:$0xff]   ;;  %v784_v23 = vld [vmem:[%s1176_s0 + $0xb8] sm:$0xff]  }
  0x25   :  { %804 = vst [vmem:[%s1179_s3 + $0x60] sm:$0xff] %v665_v28   ;;  %v670_v37 = vpack.c.bf16 %v305_v30, %v304_v29  ;;  %v245_v38 = vadd.f32 %v857_v4, %v177_v31  ;;  %v178_v39 = vmul.f32 %v852_v1, %v540_v26  ;;  %v544_v40 = vunpack.c.l.bf16 %v778_v27 }
  0x26   :  { %v675_v42 = vpack.c.bf16 %v307_v33, %v306_v32  ;;  %v308_v43 = vmax.f32 %v244_v34, 0.0  ;;  %v179_v44 = vmul.f32 %v852_v1, %v541_v35  ;;  %v545_v45 = vunpack.c.h.bf16 %v778_v27  ;;  %v785_v32 = vld [vmem:[%s1176_s0 + $0xc0] sm:$0xff]  }
  0x27   :  { %805 = vst [vmem:[%s1179_s3 + $0x68] sm:$0xff] %v670_v37   ;;  %v309_v46 = vmax.f32 %v245_v38, 0.0  ;;  %v246_v47 = vadd.f32 %v857_v4, %v178_v39  ;;  %v180_v48 = vmul.f32 %v852_v1, %v544_v40  ;;  %v548_v49 = vunpack.c.l.bf16 %v779_v36 }
  0x28   :  { %806 = vst [vmem:[%s1179_s3 + $0x70] sm:$0xff] %v675_v42   ;;  %v247_v50 = vadd.f32 %v857_v4, %v179_v44  ;;  %v181_v51 = vmul.f32 %v852_v1, %v545_v45  ;;  %v549_v52 = vunpack.c.h.bf16 %v779_v36  ;;  %v552_v53 = vunpack.c.l.bf16 %v780_v41  ;;  %v786_v45 = vld [vmem:[%s1176_s0 + $0xc8] sm:$0xff]  }
  0x29   :  { %v680_v55 = vpack.c.bf16 %v309_v46, %v308_v43  ;;  %v310_v56 = vmax.f32 %v246_v47, 0.0  ;;  %v248_v57 = vadd.f32 %v857_v4, %v180_v48  ;;  %v182_v58 = vmul.f32 %v852_v1, %v548_v49 }
  0x2a   :  { %v311_v59 = vmax.f32 %v247_v50, 0.0  ;;  %v249_v60 = vadd.f32 %v857_v4, %v181_v51  ;;  %v183_v61 = vmul.f32 %v852_v1, %v549_v52  ;;  %v553_v62 = vunpack.c.h.bf16 %v780_v41 }
  0x2b   :  { %807 = vst [vmem:[%s1179_s3 + $0x78] sm:$0xff] %v680_v55   ;;  %v312_v63 = vmax.f32 %v248_v57, 0.0  ;;  %v250_v0 = vadd.f32 %v857_v4, %v182_v58  ;;  %v184_v2 = vmul.f32 %v852_v1, %v552_v53  ;;  %v556_v3 = vunpack.c.l.bf16 %v781_v54 }
  0x2c   :  { %v685_v6 = vpack.c.bf16 %v311_v59, %v310_v56  ;;  %v313_v7 = vmax.f32 %v249_v60, 0.0  ;;  %v251_v8 = vadd.f32 %v857_v4, %v183_v61  ;;  %v185_v9 = vmul.f32 %v852_v1, %v553_v62 }
  0x2d   :  { %v314_v10 = vmax.f32 %v250_v0, 0.0  ;;  %v252_v11 = vadd.f32 %v857_v4, %v184_v2  ;;  %v557_v12 = vunpack.c.h.bf16 %v781_v54  ;;  %v186_v13 = vmul.f32 %v852_v1, %v556_v3  ;;  %v787_v54 = vld [vmem:[%s1176_s0 + $0xd0] sm:$0xff]  }
  0x2e   :  { %808 = vst [vmem:[%s1179_s3 + $0x80] sm:$0xff] %v685_v6   ;;  %v690_v15 = vpack.c.bf16 %v313_v7, %v312_v63  ;;  %v315_v16 = vmax.f32 %v251_v8, 0.0  ;;  %v253_v17 = vadd.f32 %v857_v4, %v185_v9  ;;  %v560_v18 = vunpack.c.l.bf16 %v782_v5  ;;  %v788_v63 = vld [vmem:[%s1176_s0 + $0xd8] sm:$0xff]  }
  0x2f   :  { %v316_v19 = vmax.f32 %v252_v11, 0.0  ;;  %v187_v20 = vmul.f32 %v852_v1, %v557_v12  ;;  %v254_v21 = vadd.f32 %v857_v4, %v186_v13  ;;  %v561_v22 = vunpack.c.h.bf16 %v782_v5 }
  0x30   :  { %809 = vst [vmem:[%s1179_s3 + $0x88] sm:$0xff] %v690_v15   ;;  %v695_v24 = vpack.c.bf16 %v315_v16, %v314_v10  ;;  %v317_v25 = vmax.f32 %v253_v17, 0.0  ;;  %v188_v26 = vmul.f32 %v852_v1, %v560_v18  ;;  %v564_v27 = vunpack.c.l.bf16 %v783_v14  ;;  %v789_v10 = vld [vmem:[%s1176_s0 + $0xe0] sm:$0xff]  }
  0x31   :  { %v255_v28 = vadd.f32 %v857_v4, %v187_v20  ;;  %v318_v29 = vmax.f32 %v254_v21, 0.0  ;;  %v189_v30 = vmul.f32 %v852_v1, %v561_v22  ;;  %v565_v31 = vunpack.c.h.bf16 %v783_v14 }
  0x32   :  { %810 = vst [vmem:[%s1179_s3 + $0x90] sm:$0xff] %v695_v24   ;;  %v700_v33 = vpack.c.bf16 %v317_v25, %v316_v19  ;;  %v256_v34 = vadd.f32 %v857_v4, %v188_v26  ;;  %v190_v35 = vmul.f32 %v852_v1, %v564_v27  ;;  %v568_v36 = vunpack.c.l.bf16 %v784_v23 }
  0x33   :  { %v319_v37 = vmax.f32 %v255_v28, 0.0  ;;  %v257_v38 = vadd.f32 %v857_v4, %v189_v30  ;;  %v191_v39 = vmul.f32 %v852_v1, %v565_v31  ;;  %v569_v40 = vunpack.c.h.bf16 %v784_v23  ;;  %v790_v23 = vld [vmem:[%s1176_s0 + $0xe8] sm:$0xff]  }
  0x34   :  { %811 = vst [vmem:[%s1179_s3 + $0x98] sm:$0xff] %v700_v33   ;;  %v320_v41 = vmax.f32 %v256_v34, 0.0  ;;  %v258_v42 = vadd.f32 %v857_v4, %v190_v35  ;;  %v192_v43 = vmul.f32 %v852_v1, %v568_v36  ;;  %v572_v44 = vunpack.c.l.bf16 %v785_v32 }
  0x35   :  { %v705_v46 = vpack.c.bf16 %v319_v37, %v318_v29  ;;  %v321_v47 = vmax.f32 %v257_v38, 0.0  ;;  %v259_v48 = vadd.f32 %v857_v4, %v191_v39  ;;  %v193_v49 = vmul.f32 %v852_v1, %v569_v40 }
  0x36   :  { %v322_v50 = vmax.f32 %v258_v42, 0.0  ;;  %v260_v51 = vadd.f32 %v857_v4, %v192_v43  ;;  %v573_v52 = vunpack.c.h.bf16 %v785_v32  ;;  %v194_v53 = vmul.f32 %v852_v1, %v572_v44  ;;  %v791_v32 = vld [vmem:[%s1176_s0 + $0xf0] sm:$0xff]  }
  0x37   :  { %812 = vst [vmem:[%s1179_s3 + $0xa0] sm:$0xff] %v705_v46   ;;  %v710_v55 = vpack.c.bf16 %v321_v47, %v320_v41  ;;  %v323_v56 = vmax.f32 %v259_v48, 0.0  ;;  %v261_v57 = vadd.f32 %v857_v4, %v193_v49  ;;  %v576_v58 = vunpack.c.l.bf16 %v786_v45  ;;  %v792_v41 = vld [vmem:[%s1176_s0 + $0xf8] sm:$0xff]  }
  0x38   :  { %v324_v59 = vmax.f32 %v260_v51, 0.0  ;;  %v195_v60 = vmul.f32 %v852_v1, %v573_v52  ;;  %v262_v61 = vadd.f32 %v857_v4, %v194_v53  ;;  %v577_v62 = vunpack.c.h.bf16 %v786_v45 }
  0x39   :  { %813 = vst [vmem:[%s1179_s3 + $0xa8] sm:$0xff] %v710_v55   ;;  %v715_v0 = vpack.c.bf16 %v323_v56, %v322_v50  ;;  %v325_v2 = vmax.f32 %v261_v57, 0.0  ;;  %v196_v3 = vmul.f32 %v852_v1, %v576_v58  ;;  %v580_v5 = vunpack.c.l.bf16 %v787_v54 }
  0x3a   :  { %v263_v6 = vadd.f32 %v857_v4, %v195_v60  ;;  %v326_v7 = vmax.f32 %v262_v61, 0.0  ;;  %v197_v8 = vmul.f32 %v852_v1, %v577_v62  ;;  %v581_v9 = vunpack.c.h.bf16 %v787_v54 }
  0x3b   :  { %814 = vst [vmem:[%s1179_s3 + $0xb0] sm:$0xff] %v715_v0   ;;  %v720_v11 = vpack.c.bf16 %v325_v2, %v324_v59  ;;  %v264_v12 = vadd.f32 %v857_v4, %v196_v3  ;;  %v198_v13 = vmul.f32 %v852_v1, %v580_v5  ;;  %v584_v14 = vunpack.c.l.bf16 %v788_v63 }
  0x3c   :  { %v327_v15 = vmax.f32 %v263_v6, 0.0  ;;  %v265_v16 = vadd.f32 %v857_v4, %v197_v8  ;;  %v199_v17 = vmul.f32 %v852_v1, %v581_v9  ;;  %v585_v18 = vunpack.c.h.bf16 %v788_v63 }
  0x3d   :  { %815 = vst [vmem:[%s1179_s3 + $0xb8] sm:$0xff] %v720_v11   ;;  %v328_v19 = vmax.f32 %v264_v12, 0.0  ;;  %v266_v20 = vadd.f32 %v857_v4, %v198_v13  ;;  %v200_v21 = vmul.f32 %v852_v1, %v584_v14  ;;  %v588_v22 = vunpack.c.l.bf16 %v789_v10 }
  0x3e   :  { %v725_v24 = vpack.c.bf16 %v327_v15, %v326_v7  ;;  %v329_v25 = vmax.f32 %v265_v16, 0.0  ;;  %v267_v26 = vadd.f32 %v857_v4, %v199_v17  ;;  %v201_v27 = vmul.f32 %v852_v1, %v585_v18 }
  0x3f   :  { %v330_v28 = vmax.f32 %v266_v20, 0.0  ;;  %v268_v29 = vadd.f32 %v857_v4, %v200_v21  ;;  %v589_v30 = vunpack.c.h.bf16 %v789_v10  ;;  %v202_v31 = vmul.f32 %v852_v1, %v588_v22 }
  0x40   :  { %816 = vst [vmem:[%s1179_s3 + $0xc0] sm:$0xff] %v725_v24   ;;  %v730_v33 = vpack.c.bf16 %v329_v25, %v328_v19  ;;  %v331_v34 = vmax.f32 %v267_v26, 0.0  ;;  %v269_v35 = vadd.f32 %v857_v4, %v201_v27  ;;  %v592_v36 = vunpack.c.l.bf16 %v790_v23 }
  0x41   :  { %v332_v37 = vmax.f32 %v268_v29, 0.0  ;;  %v203_v38 = vmul.f32 %v852_v1, %v589_v30  ;;  %v270_v39 = vadd.f32 %v857_v4, %v202_v31  ;;  %v593_v40 = vunpack.c.h.bf16 %v790_v23 }
  0x42   :  { %817 = vst [vmem:[%s1179_s3 + $0xc8] sm:$0xff] %v730_v33   ;;  %v735_v42 = vpack.c.bf16 %v331_v34, %v330_v28  ;;  %v333_v43 = vmax.f32 %v269_v35, 0.0  ;;  %v204_v44 = vmul.f32 %v852_v1, %v592_v36  ;;  %v596_v45 = vunpack.c.l.bf16 %v791_v32 }
  0x43   :  { %v271_v46 = vadd.f32 %v857_v4, %v203_v38  ;;  %v334_v47 = vmax.f32 %v270_v39, 0.0  ;;  %v205_v48 = vmul.f32 %v852_v1, %v593_v40  ;;  %v597_v49 = vunpack.c.h.bf16 %v791_v32 }
  0x44   :  { %818 = vst [vmem:[%s1179_s3 + $0xd0] sm:$0xff] %v735_v42   ;;  %v740_v50 = vpack.c.bf16 %v333_v43, %v332_v37  ;;  %v272_v51 = vadd.f32 %v857_v4, %v204_v44  ;;  %v206_v52 = vmul.f32 %v852_v1, %v596_v45  ;;  %v600_v53 = vunpack.c.l.bf16 %v792_v41 }
  0x45   :  { %v335_v54 = vmax.f32 %v271_v46, 0.0  ;;  %v273_v55 = vadd.f32 %v857_v4, %v205_v48  ;;  %v207_v56 = vmul.f32 %v852_v1, %v597_v49  ;;  %v601_v57 = vunpack.c.h.bf16 %v792_v41 }
  0x46   :  { %819 = vst [vmem:[%s1179_s3 + $0xd8] sm:$0xff] %v740_v50   ;;  %v336_v58 = vmax.f32 %v272_v51, 0.0  ;;  %v274_v59 = vadd.f32 %v857_v4, %v206_v52  ;;  %v208_v60 = vmul.f32 %v852_v1, %v600_v53 }
  0x47   :  { %v745_v61 = vpack.c.bf16 %v335_v54, %v334_v47  ;;  %v337_v62 = vmax.f32 %v273_v55, 0.0  ;;  %v275_v63 = vadd.f32 %v857_v4, %v207_v56  ;;  %v209_v0 = vmul.f32 %v852_v1, %v601_v57 }
  0x48   :  { %v338_v2 = vmax.f32 %v274_v59, 0.0  ;;  %v276_v3 = vadd.f32 %v857_v4, %v208_v60 }
  0x49   :  { %820 = vst [vmem:[%s1179_s3 + $0xe0] sm:$0xff] %v745_v61   ;;  %v750_v5 = vpack.c.bf16 %v337_v62, %v336_v58  ;;  %v339_v6 = vmax.f32 %v275_v63, 0.0  ;;  %v277_v7 = vadd.f32 %v857_v4, %v209_v0 }
  0x4a   :  { %v340_v8 = vmax.f32 %v276_v3, 0.0 }
  0x4b   :  { %821 = vst [vmem:[%s1179_s3 + $0xe8] sm:$0xff] %v750_v5   ;;  %v755_v9 = vpack.c.bf16 %v339_v6, %v338_v2  ;;  %v341_v10 = vmax.f32 %v277_v7, 0.0 }
  0x4d   :  { %822 = vst [vmem:[%s1179_s3 + $0xf0] sm:$0xff] %v755_v9   ;;  %v760_v1 = vpack.c.bf16 %v341_v10, %v340_v8 }
  0x4f   :  { %823 = vst [vmem:[%s1179_s3 + $0xf8] sm:$0xff] %v760_v1  }

// kernel: bottleneck_forward.9
= control target key start
LH: loop header
LB: loop body
LE: loop exit
PB: predicated region body
PF: predicated region fallthrough
CT: control target
= control target key end

     0   :  { %s1125_s12 = smov 0   ;;  %s1127_s13 = smov 0   ;;  %s1257_s0 = inlined_call_operand.vmem [shape: bf16[128,1152], index: 0, kind: input, shape index: {}]   ;;  %s1258_s1 = inlined_call_operand.vmem [shape: bf16[1152,128], index: 1, kind: input, shape index: {}]   ;;  %s1259_s2 = inlined_call_operand.vmem [shape: bf16[128,128], index: 2, kind: output, shape index: {0}]   ;;  %s1260_s3 = inlined_call_operand.vmem [shape: f32[1,8,128], index: 3, kind: output, shape index: {1}]  }
   0x1   :  { %s1129_s14 = smov 0   ;;  %s1131_s15 = smov 0  }
   0x2   :  { %s1133_s16 = smov 0  }
   0x3 LB: > { %s26_s17 = sadd.s32 1, %s1098_s15  ;;  %p49_p1 = scmp.ne.s32.totalorder %s1090_s13, %s1086_s12  ;;  %s1102_s16 = sphi %s1133_s16, %s14_s16   ;;  %s1098_s15 = sphi %s1131_s15, %s1264_s15   ;;  %s1094_s14 = sphi %s1129_s14, %s1263_s14   ;;  %s1090_s13 = sphi %s1127_s13, %s1262_s13   ;;  %s1086_s12 = sphi %s1125_s12, %s1261_s12  }
   0x4   : > { %p27_p0 = scmp.ge.s32.totalorder %s26_s17, 9  ;;  %p50_p2 = scmp.eq.s32.totalorder %s1102_s16, 0 }
   0x5   : > { %s42_s19 = sadd.s32 1, %s1090_s13  ;;  %p858_p5 = scmp.ge.s32.totalorder %s1102_s16, 9 }
   0x6   : > { %s1266_s17 = smov (%p27_p0, %s26_s17), 0  ;;  %p51_p3 = por %p50_p2, %p49_p1 }
   0x7   : > { %s38_s18 = ssub.s32 %s1098_s15, %s1266_s17  ;;  %159 = sbr.rel (%p858_p5) target bundleno = 32 (0x20), region = 16 }
   0x8   : > { %p40_p4 = scmp.eq.s32.totalorder %s38_s18, 0 }
   0xa   : > { %s1160_s20 = scalar_select %p40_p4, %s1090_s13, %s42_s19  }
   0xc   : > { %162 = sbr.rel (!%p51_p3) target bundleno = 32 (0x20), region = 20  ;;  %s164_s21 = sand.u32 (%p51_p3), 1, %s1090_s13  }
   0xd   : > { %s860_s22 = sshll.u32 (%p51_p3), %s1098_s15, 2  ;;  %s859_s23 = sshll.u32 (%p51_p3), %s164_s21, 6 }
   0xe   : > { %s1168_s26 = scalar_lea.vmem (%p51_p3), %s1257_s0, %s860_s22  ;;  %s166_s27 = scalar_lea.vmem (%p51_p3), [#allocation3], %s859_s23 }
   0xf   : > { %v188_v0 = vld [vmem:[%s1168_s26] sm:$0xf] (%p51_p3)  ;;  %v190_v1 = vld [vmem:[%s1168_s26 + $0x24] sm:$0xf] (%p51_p3)  ;;  %v192_v2 = vld [vmem:[%s1168_s26 + $0x48] sm:$0xf] (%p51_p3) }
  0x10   : > { %189 = vst [vmem:[%s166_s27] sm:$0xf] (%p51_p3), %v188_v0  ;;  %v194_v3 = vld [vmem:[%s1168_s26 + $0x6c] sm:$0xf] (%p51_p3)  ;;  %v196_v4 = vld [vmem:[%s1168_s26 + $0x90] sm:$0xf] (%p51_p3) }
  0x11   : > { %191 = vst [vmem:[%s166_s27 + $0x4] sm:$0xf] %v190_v1  ;;  %v198_v5 = vld [vmem:[%s1168_s26 + $0xb4] sm:$0xf]  ;;  %v200_v6 = vld [vmem:[%s1168_s26 + $0xd8] sm:$0xf] }
  0x12   : > { %193 = vst [vmem:[%s166_s27 + $0x8] sm:$0xf] %v192_v2  ;;  %v202_v7 = vld [vmem:[%s1168_s26 + $0xfc] sm:$0xf]  ;;  %v204_v8 = vld [vmem:[%s1168_s26 + $0x120] sm:$0xf] }
  0x13   : > { %195 = vst [vmem:[%s166_s27 + $0xc] sm:$0xf] %v194_v3  ;;  %v206_v9 = vld [vmem:[%s1168_s26 + $0x144] sm:$0xf]  ;;  %v208_v10 = vld [vmem:[%s1168_s26 + $0x168] sm:$0xf] }
  0x14   : > { %197 = vst [vmem:[%s166_s27 + $0x10] sm:$0xf] %v196_v4  ;;  %v210_v11 = vld [vmem:[%s1168_s26 + $0x18c] sm:$0xf]  ;;  %v212_v12 = vld [vmem:[%s1168_s26 + $0x1b0] sm:$0xf] }
  0x15   : > { %199 = vst [vmem:[%s166_s27 + $0x14] sm:$0xf] %v198_v5  ;;  %v214_v13 = vld [vmem:[%s1168_s26 + $0x1d4] sm:$0xf]  ;;  %v216_v14 = vld [vmem:[%s1168_s26 + $0x1f8] sm:$0xf] }
  0x16   : > { %201 = vst [vmem:[%s166_s27 + $0x18] sm:$0xf] %v200_v6  ;;  %v218_v15 = vld [vmem:[%s1168_s26 + $0x21c] sm:$0xf] }
  0x17   : > { %203 = vst [vmem:[%s166_s27 + $0x1c] sm:$0xf] %v202_v7 }
  0x18   : > { %205 = vst [vmem:[%s166_s27 + $0x20] sm:$0xf] %v204_v8 }
  0x19   : > { %207 = vst [vmem:[%s166_s27 + $0x24] sm:$0xf] %v206_v9 }
  0x1a   : > { %209 = vst [vmem:[%s166_s27 + $0x28] sm:$0xf] %v208_v10 }
  0x1b   : > { %211 = vst [vmem:[%s166_s27 + $0x2c] sm:$0xf] %v210_v11 }
  0x1c   : > { %213 = vst [vmem:[%s166_s27 + $0x30] sm:$0xf] %v212_v12 }
  0x1d   : > { %215 = vst [vmem:[%s166_s27 + $0x34] sm:$0xf] %v214_v13 }
  0x1e   : > { %217 = vst [vmem:[%s166_s27 + $0x38] sm:$0xf] %v216_v14 }
  0x1f   : > { %219 = vst [vmem:[%s166_s27 + $0x3c] sm:$0xf] %v218_v15 }
  0x20 PF: > { %p861_p6 = scmp.ge.s32.totalorder %s1102_s16, 1  ;;  %p286_p7 = scmp.lt.s32.totalorder %s1102_s16, 10 }
  0x22   : > { %p287_p8 = pnand %p861_p6, %p286_p7 }
  0x23   : > { %s293_s28 = sand.u32 (!%p287_p8), 1, %s1086_s12   ;;  %s863_s29 = sshll.u32 (!%p287_p8), %s1094_s14, 4 }
  0x24   : > { %290 = sbr.rel (%p287_p8) target bundleno = 303 (0x12f), region = 65  ;;  %s862_s30 = sshll.u32 (!%p287_p8), %s293_s28, 6 }
  0x25   : > { %p336_p9 = scmp.lt.s32.totalorder (!%p287_p8), %s863_s29, 143  ;;  %s1195_s8 = scalar_lea.vmem (!%p287_p8), [#allocation3], %s862_s30 }
  0x26   : > { %p865_p10 = scmp.ne.s32.totalorder (!%p287_p8), %s1094_s14, 0 }
  0x29   : > { %s1268_s29 = smov (!%p336_p9, %s863_s29), 143  ;;  %363 = sbr.rel (%p865_p10) target bundleno = 63 (0x3f), region = 73 }
  0x2a   : > { %s864_s4 = sshll.u32 %s1268_s29, 2 }
  0x2b   : > { %s1193_s7 = scalar_lea.vmem %s1258_s1, %s864_s4 }
  0x2e   : > { %v1104_v16 = vmov 0.0  }
  0x2f   : > { %364 = vst [vmem:[#allocation2 + $0x30] sm:$0xff] %v1104_v16 }
  0x30   : > { %365 = vst [vmem:[#allocation2] sm:$0xff] %v1104_v16 }
  0x31   : > { %366 = vst [vmem:[#allocation2 + $0x58] sm:$0xff] %v1104_v16 }
  0x32   : > { %367 = vst [vmem:[#allocation2 + $0x18] sm:$0xff] %v1104_v16 }
  0x33   : > { %368 = vst [vmem:[#allocation2 + $0x50] sm:$0xff] %v1104_v16 }
  0x34   : > { %369 = vst [vmem:[#allocation2 + $0x68] sm:$0xff] %v1104_v16 }
  0x35   : > { %370 = vst [vmem:[#allocation2 + $0x8] sm:$0xff] %v1104_v16 }
  0x36   : > { %371 = vst [vmem:[#allocation2 + $0x48] sm:$0xff] %v1104_v16 }
  0x37   : > { %372 = vst [vmem:[#allocation2 + $0x40] sm:$0xff] %v1104_v16 }
  0x38   : > { %373 = vst [vmem:[#allocation2 + $0x20] sm:$0xff] %v1104_v16 }
  0x39   : > { %374 = vst [vmem:[#allocation2 + $0x10] sm:$0xff] %v1104_v16 }
  0x3a   : > { %375 = vst [vmem:[#allocation2 + $0x38] sm:$0xff] %v1104_v16 }
  0x3b   : > { %376 = vst [vmem:[#allocation2 + $0x60] sm:$0xff] %v1104_v16 }
  0x3c   : > { %377 = vst [vmem:[#allocation2 + $0x70] sm:$0xff] %v1104_v16 }
  0x3d   : > { %378 = vst [vmem:[#allocation2 + $0x78] sm:$0xff] %v1104_v16 }
  0x3e   : > { %379 = vst [vmem:[#allocation2 + $0x28] sm:$0xff] %v1104_v16 }
  0x3f PF: > { %v951_v17 = vld [vmem:[%s1193_s7 + $0x38] sm:$0xff]  ;;  %v950_v18 = vld [vmem:[%s1193_s7 + $0x30] sm:$0xff]  ;;  %v949_v19 = vld [vmem:[%s1193_s7 + $0x28] sm:$0xff]  ;;  %p930_p11 = scmp.ne.s32.totalorder %s1094_s14, 8 }
  0x40   : > { %524 = vmatpush.bf16.msra.mxu0 %v951_v17  ;;  %999 = vmatpush.bf16.msra.mxu1 %v951_v17  ;;  %v948_v20 = vld [vmem:[%s1193_s7 + $0x20] sm:$0xff]  ;;  %v947_v21 = vld [vmem:[%s1193_s7 + $0x18] sm:$0xff]  ;;  %v946_v22 = vld [vmem:[%s1193_s7 + $0x10] sm:$0xff] }
  0x41   : > { %1000 = vmatpush.bf16.msra.mxu2 %v951_v17  ;;  %1001 = vmatpush.bf16.msra.mxu3 %v951_v17  ;;  %v945_v23 = vld [vmem:[%s1193_s7 + $0x8] sm:$0xff]  ;;  %v944_v24 = vld [vmem:[%s1193_s7] sm:$0xff]  ;;  %v938_v26 = vld [vmem:[%s1195_s8 + $0x10] sm:$0xff] }
  0x42   : > { %v936_v25 = vld [vmem:[%s1195_s8] sm:$0xff]  ;;  %v942_v28 = vld [vmem:[%s1195_s8 + $0x30] sm:$0xff]  ;;  %v937_v29 = vld [vmem:[%s1195_s8 + $0x8] sm:$0xff] }
  0x43   : > { %v940_v27 = vld [vmem:[%s1195_s8 + $0x20] sm:$0xff]  ;;  %v939_v30 = vld [vmem:[%s1195_s8 + $0x18] sm:$0xff]  ;;  %v941_v31 = vld [vmem:[%s1195_s8 + $0x28] sm:$0xff] }
  0x44   : > { %525 = vmatpush.bf16.msra.mxu0 %v950_v18  ;;  %1002 = vmatpush.bf16.msra.mxu1 %v950_v18  ;;  %v943_v32 = vld [vmem:[%s1195_s8 + $0x38] sm:$0xff]  ;;  %v380_v33 = vld [vmem:[#allocation2 + $0x30] sm:$0xff]  ;;  %v388_v39 = vld [vmem:[#allocation2 + $0x40] sm:$0xff] }
  0x45   : > { %1003 = vmatpush.bf16.msra.mxu2 %v950_v18  ;;  %1004 = vmatpush.bf16.msra.mxu3 %v950_v18  ;;  %v384_v34 = vld [vmem:[#allocation2 + $0x50] sm:$0xff]  ;;  %v392_v40 = vld [vmem:[#allocation2 + $0x60] sm:$0xff]  ;;  %v385_v42 = vld [vmem:[#allocation2 + $0x68] sm:$0xff] }
  0x46   : > { %v381_v41 = vld [vmem:[#allocation2] sm:$0xff]  ;;  %v393_v52 = vld [vmem:[#allocation2 + $0x70] sm:$0xff]  ;;  %v382_v53 = vld [vmem:[#allocation2 + $0x58] sm:$0xff] }
  0x47   : > { %v389_v51 = vld [vmem:[#allocation2 + $0x20] sm:$0xff]  ;;  %v386_v54 = vld [vmem:[#allocation2 + $0x8] sm:$0xff]  ;;  %v390_v63 = vld [vmem:[#allocation2 + $0x10] sm:$0xff] }
  0x48   : > { %526 = vmatpush.bf16.msra.mxu0 %v949_v19  ;;  %1005 = vmatpush.bf16.msra.mxu1 %v949_v19  ;;  %v394_v0 = vld [vmem:[#allocation2 + $0x78] sm:$0xff]  ;;  %v387_v2 = vld [vmem:[#allocation2 + $0x48] sm:$0xff] }
  0x49   : > { %1006 = vmatpush.bf16.msra.mxu2 %v949_v19  ;;  %1007 = vmatpush.bf16.msra.mxu3 %v949_v19  ;;  %v383_v1 = vld [vmem:[#allocation2 + $0x18] sm:$0xff]  ;;  %v395_v12 = vld [vmem:[#allocation2 + $0x28] sm:$0xff] }
  0x4a   : > { %v391_v11 = vld [vmem:[#allocation2 + $0x38] sm:$0xff] }
  0x4c   : > { %527 = vmatpush.bf16.msra.mxu0 %v948_v20  ;;  %1008 = vmatpush.bf16.msra.mxu1 %v948_v20 }
  0x4d   : > { %1009 = vmatpush.bf16.msra.mxu2 %v948_v20  ;;  %1010 = vmatpush.bf16.msra.mxu3 %v948_v20 }
  0x50   : > { %528 = vmatpush.bf16.msra.mxu0 %v947_v21  ;;  %1011 = vmatpush.bf16.msra.mxu1 %v947_v21 }
  0x51   : > { %1012 = vmatpush.bf16.msra.mxu2 %v947_v21  ;;  %1013 = vmatpush.bf16.msra.mxu3 %v947_v21 }
  0x54   : > { %529 = vmatpush.bf16.msra.mxu0 %v946_v22  ;;  %1014 = vmatpush.bf16.msra.mxu1 %v946_v22 }
  0x55   : > { %1015 = vmatpush.bf16.msra.mxu2 %v946_v22  ;;  %1016 = vmatpush.bf16.msra.mxu3 %v946_v22 }
  0x58   : > { %530 = vmatpush.bf16.msra.mxu0 %v945_v23  ;;  %1017 = vmatpush.bf16.msra.mxu1 %v945_v23 }
  0x59   : > { %1018 = vmatpush.bf16.msra.mxu2 %v945_v23  ;;  %1019 = vmatpush.bf16.msra.mxu3 %v945_v23 }
  0x5c   : > { %531 = vmatpush.bf16.msra.mxu0 %v944_v24  ;;  %1020 = vmatpush.bf16.msra.mxu1 %v944_v24 }
  0x5d   : > { %1021 = vmatpush.bf16.msra.mxu2 %v944_v24  ;;  %1022 = vmatpush.bf16.msra.mxu3 %v944_v24 }
  0x5f   : > { %532 = vmatmul.bf16.vlgmr.msra.gmra.mxu0 %v936_v25  ;;  %542 = vmatmul.bf16.vlgmr.msra.gmra.mxu1 %v938_v26 }
  0x60   : > { %552 = vmatmul.bf16.vlgmr.msra.gmra.mxu2 %v940_v27  ;;  %562 = vmatmul.bf16.vlgmr.msra.gmra.mxu3 %v942_v28 }
  0x6f   : > { %537 = vmatmul.bf16.gmra.mxu0 %v937_v29  ;;  %547 = vmatmul.bf16.gmra.mxu1 %v939_v30 }
  0x70   : > { %557 = vmatmul.bf16.gmra.mxu2 %v941_v31  ;;  %567 = vmatmul.bf16.gmra.mxu3 %v943_v32 }
  0xdc   : > { %v533_v35 = vpop.f32.mrf.mxu0  ;;  %v543_v36 = vpop.f32.mrf.mxu1 }
  0xdd   : > { %v573_v37 = vadd.f32 %v533_v35, %v380_v33  ;;  %v577_v38 = vadd.f32 %v543_v36, %v384_v34 }
  0xdf   : > { %589 = vst [vmem:[#allocation2 + $0x30] sm:$0xff] %v573_v37 }
  0xe0   : > { %593 = vst [vmem:[#allocation2 + $0x50] sm:$0xff] %v577_v38 }
  0xe3   : > { %v553_v43 = vpop.f32.mrf.mxu2  ;;  %v563_v44 = vpop.f32.mrf.mxu3 }
  0xe4   : > { %v581_v45 = vadd.f32 %v553_v43, %v388_v39  ;;  %v585_v46 = vadd.f32 %v563_v44, %v392_v40  ;;  %v535_v47 = vpop.f32.mrf.mxu0  ;;  %v545_v48 = vpop.f32.mrf.mxu1 }
  0xe5   : > { %v574_v49 = vadd.f32 %v535_v47, %v381_v41  ;;  %v578_v50 = vadd.f32 %v545_v48, %v385_v42 }
  0xe6   : > { %597 = vst [vmem:[#allocation2 + $0x40] sm:$0xff] %v581_v45 }
  0xe7   : > { %601 = vst [vmem:[#allocation2 + $0x60] sm:$0xff] %v585_v46 }
  0xe8   : > { %590 = vst [vmem:[#allocation2] sm:$0xff] %v574_v49 }
  0xe9   : > { %594 = vst [vmem:[#allocation2 + $0x68] sm:$0xff] %v578_v50 }
  0xeb   : > { %v555_v55 = vpop.f32.mrf.mxu2  ;;  %v565_v56 = vpop.f32.mrf.mxu3 }
  0xec   : > { %v582_v57 = vadd.f32 %v555_v55, %v389_v51  ;;  %v586_v58 = vadd.f32 %v565_v56, %v393_v52  ;;  %v538_v59 = vpop.f32.mrf.mxu0  ;;  %v548_v60 = vpop.f32.mrf.mxu1 }
  0xed   : > { %v575_v61 = vadd.f32 %v538_v59, %v382_v53  ;;  %v579_v62 = vadd.f32 %v548_v60, %v386_v54 }
  0xee   : > { %598 = vst [vmem:[#allocation2 + $0x20] sm:$0xff] %v582_v57 }
  0xef   : > { %602 = vst [vmem:[#allocation2 + $0x70] sm:$0xff] %v586_v58 }
  0xf0   : > { %591 = vst [vmem:[#allocation2 + $0x58] sm:$0xff] %v575_v61 }
  0xf1   : > { %595 = vst [vmem:[#allocation2 + $0x8] sm:$0xff] %v579_v62 }
  0xf3   : > { %v558_v3 = vpop.f32.mrf.mxu2  ;;  %v568_v4 = vpop.f32.mrf.mxu3 }
  0xf4   : > { %v583_v5 = vadd.f32 %v558_v3, %v390_v63  ;;  %v587_v6 = vadd.f32 %v568_v4, %v394_v0  ;;  %v540_v7 = vpop.f32.mrf.mxu0  ;;  %v550_v8 = vpop.f32.mrf.mxu1 }
  0xf5   : > { %v576_v9 = vadd.f32 %v540_v7, %v383_v1  ;;  %v580_v10 = vadd.f32 %v550_v8, %v387_v2 }
  0xf6   : > { %599 = vst [vmem:[#allocation2 + $0x10] sm:$0xff] %v583_v5 }
  0xf7   : > { %603 = vst [vmem:[#allocation2 + $0x78] sm:$0xff] %v587_v6 }
  0xf8   : > { %592 = vst [vmem:[#allocation2 + $0x18] sm:$0xff] %v576_v9 }
  0xf9   : > { %596 = vst [vmem:[#allocation2 + $0x48] sm:$0xff] %v580_v10 }
  0xfb   : > { %v560_v13 = vpop.f32.mrf.mxu2  ;;  %v570_v14 = vpop.f32.mrf.mxu3  ;;  %608 = sbr.rel (%p930_p11) target bundleno = 303 (0x12f), region = 77 }
  0xfc   : > { %v584_v15 = vadd.f32 %v560_v13, %v391_v11  ;;  %v588_v16 = vadd.f32 %v570_v14, %v395_v12 }
  0xfe   : > { %600 = vst [vmem:[#allocation2 + $0x38] sm:$0xff] %v584_v15 }
  0xff   : > { %604 = vst [vmem:[#allocation2 + $0x28] sm:$0xff] %v588_v16 }
 0x100   : > { %v609_v17 = vld [vmem:[#allocation2 + $0x30] sm:$0xff]  ;;  %v610_v18 = vld [vmem:[#allocation2] sm:$0xff]  ;;  %v611_v19 = vld [vmem:[#allocation2 + $0x58] sm:$0xff] }
 0x101   : > { %v955_v20 = vpack.c.bf16 %v610_v18, %v609_v17  ;;  %v657_v21 = vadd.f32 %v610_v18, %v609_v17  ;;  %v678_v22 = vmul.f32 %v609_v17, %v609_v17  ;;  %v679_v23 = vmul.f32 %v610_v18, %v610_v18  ;;  %v612_v24 = vld [vmem:[#allocation2 + $0x18] sm:$0xff]  ;;  %v613_v25 = vld [vmem:[#allocation2 + $0x50] sm:$0xff]  ;;  %v614_v26 = vld [vmem:[#allocation2 + $0x68] sm:$0xff] }
 0x102   : > { %v960_v27 = vpack.c.bf16 %v612_v24, %v611_v19  ;;  %v680_v28 = vmul.f32 %v611_v19, %v611_v19  ;;  %v965_v29 = vpack.c.bf16 %v614_v26, %v613_v25  ;;  %v615_v30 = vld [vmem:[#allocation2 + $0x8] sm:$0xff]  ;;  %v681_v33 = vmul.f32 %v612_v24, %v612_v24  ;;  %v617_v35 = vld [vmem:[#allocation2 + $0x40] sm:$0xff]  ;;  %v619_v39 = vld [vmem:[#allocation2 + $0x10] sm:$0xff] }
 0x103   : > { %956 = vst [vmem:[%s1259_s2] sm:$0xff] %v955_v20   ;;  %v694_v31 = vadd.f32 %v679_v23, %v678_v22  ;;  %v658_v32 = vadd.f32 %v657_v21, %v611_v19  ;;  %v616_v34 = vld [vmem:[#allocation2 + $0x48] sm:$0xff]  ;;  %v618_v36 = vld [vmem:[#allocation2 + $0x20] sm:$0xff]  ;;  %v682_v42 = vmul.f32 %v613_v25, %v613_v25  ;;  %v622_v45 = vld [vmem:[#allocation2 + $0x70] sm:$0xff]  ;;  %v683_v50 = vmul.f32 %v614_v26, %v614_v26 }
 0x104   : > { %992 = vst [vmem:[%s1259_s2 + $0x8] sm:$0xff] %v960_v27   ;;  %v970_v37 = vpack.c.bf16 %v616_v34, %v615_v30  ;;  %v975_v38 = vpack.c.bf16 %v618_v36, %v617_v35  ;;  %v621_v44 = vld [vmem:[#allocation2 + $0x60] sm:$0xff]  ;;  %v623_v51 = vld [vmem:[#allocation2 + $0x78] sm:$0xff]  ;;  %v684_v56 = vmul.f32 %v615_v30, %v615_v30  ;;  %v685_v59 = vmul.f32 %v616_v34, %v616_v34 }
 0x105   : > { %v659_v40 = vadd.f32 %v658_v32, %v612_v24  ;;  %v695_v41 = vadd.f32 %v694_v31, %v680_v28  ;;  %993 = vst [vmem:[%s1259_s2 + $0x10] sm:$0xff] %v965_v29   ;;  %v620_v43 = vld [vmem:[#allocation2 + $0x38] sm:$0xff]  ;;  %v985_v47 = vpack.c.bf16 %v622_v45, %v621_v44  ;;  %v686_v62 = vmul.f32 %v617_v35, %v617_v35 }
 0x106   : > { %994 = vst [vmem:[%s1259_s2 + $0x18] sm:$0xff] %v970_v37   ;;  %v980_v46 = vpack.c.bf16 %v620_v43, %v619_v39  ;;  %v624_v52 = vld [vmem:[#allocation2 + $0x28] sm:$0xff]  ;;  %v687_v1 = vmul.f32 %v618_v36, %v618_v36  ;;  %v688_v4 = vmul.f32 %v619_v39, %v619_v39  ;;  %v689_v7 = vmul.f32 %v620_v43, %v620_v43 }
 0x107   : > { %v696_v48 = vadd.f32 %v695_v41, %v681_v33  ;;  %v660_v49 = vadd.f32 %v659_v40, %v613_v25  ;;  %995 = vst [vmem:[%s1259_s2 + $0x20] sm:$0xff] %v975_v38   ;;  %v990_v53 = vpack.c.bf16 %v624_v52, %v623_v51  ;;  %v690_v10 = vmul.f32 %v621_v44, %v621_v44 }
 0x108   : > { %996 = vst [vmem:[%s1259_s2 + $0x28] sm:$0xff] %v980_v46   ;;  %v691_v13 = vmul.f32 %v622_v45, %v622_v45  ;;  %v692_v16 = vmul.f32 %v623_v51, %v623_v51  ;;  %v693_v19 = vmul.f32 %v624_v52, %v624_v52 }
 0x109   : > { %v661_v54 = vadd.f32 %v660_v49, %v614_v26  ;;  %v697_v55 = vadd.f32 %v696_v48, %v682_v42  ;;  %997 = vst [vmem:[%s1259_s2 + $0x30] sm:$0xff] %v985_v47   ;;  %v715_v26 = vlaneseq }
 0x10a   : > { %998 = vst [vmem:[%s1259_s2 + $0x38] sm:$0xff] %v990_v53  }
 0x10b   : > { %v698_v57 = vadd.f32 %v697_v55, %v683_v50  ;;  %v662_v58 = vadd.f32 %v661_v54, %v615_v30  ;;  %v716_v31 = vshrl.u32 %v715_v26, 7 }
 0x10d   : > { %v663_v60 = vadd.f32 %v662_v58, %v616_v34  ;;  %v699_v61 = vadd.f32 %v698_v57, %v684_v56  ;;  %vm717_vm0 = vcmp.lt.s32.totalorder %v716_v31, 4 }
 0x10f   : > { %v700_v63 = vadd.f32 %v699_v61, %v685_v59  ;;  %v664_v0 = vadd.f32 %v663_v60, %v617_v35 }
 0x111   : > { %v665_v2 = vadd.f32 %v664_v0, %v618_v36  ;;  %v701_v3 = vadd.f32 %v700_v63, %v686_v62 }
 0x113   : > { %v702_v5 = vadd.f32 %v701_v3, %v687_v1  ;;  %v666_v6 = vadd.f32 %v665_v2, %v619_v39 }
 0x115   : > { %v667_v8 = vadd.f32 %v666_v6, %v620_v43  ;;  %v703_v9 = vadd.f32 %v702_v5, %v688_v4 }
 0x117   : > { %v704_v11 = vadd.f32 %v703_v9, %v689_v7  ;;  %v668_v12 = vadd.f32 %v667_v8, %v621_v44 }
 0x119   : > { %v669_v14 = vadd.f32 %v668_v12, %v622_v45  ;;  %v705_v15 = vadd.f32 %v704_v11, %v690_v10 }
 0x11b   : > { %v706_v17 = vadd.f32 %v705_v15, %v691_v13  ;;  %v670_v18 = vadd.f32 %v669_v14, %v623_v51 }
 0x11d   : > { %v671_v20 = vadd.f32 %v670_v18, %v624_v52  ;;  %v707_v21 = vadd.f32 %v706_v17, %v692_v16 }
 0x11f   : > { %v672_v22 = vrot.slane %v671_v20, 4  ;;  %v708_v23 = vadd.f32 %v707_v21, %v693_v19 }
 0x121   : > { %v673_v24 = vadd.f32 %v672_v22, %v671_v20  ;;  %v709_v25 = vrot.slane %v708_v23, 4 }
 0x123   : > { %v674_v27 = vrot.slane %v673_v24, 2  ;;  %v710_v28 = vadd.f32 %v709_v25, %v708_v23 }
 0x125   : > { %v675_v29 = vadd.f32 %v674_v27, %v673_v24  ;;  %v711_v30 = vrot.slane %v710_v28, 2 }
 0x127   : > { %v676_v32 = vrot.slane %v675_v29, 1  ;;  %v712_v33 = vadd.f32 %v711_v30, %v710_v28 }
 0x129   : > { %v677_v34 = vadd.f32 %v676_v32, %v675_v29  ;;  %v713_v35 = vrot.slane %v712_v33, 1 }
 0x12b   : > { %v714_v36 = vadd.f32 %v713_v35, %v712_v33 }
 0x12d   : > { %v718_v37 = vsel %vm717_vm0, %v677_v34, %v714_v36 }
 0x12e   : > { %719 = vst [vmem:[%s1260_s3] sm:$0xff] %v718_v37 }
 0x12f PF: > { %s14_s16 = sadd.s32 1, %s1102_s16   ;;  %s1261_s12 = smov %s1090_s13 }
 0x130   : > { %p11_p12 = scmp.ge.s32.totalorder %s14_s16, 11   ;;  %s1262_s13 = smov %s1160_s20 }
 0x131   : > { %s1263_s14 = smov %s1098_s15  ;;  %s1264_s15 = smov %s1266_s17 }
 0x132   :  { %13 = sbr.rel (!%p11_p12) target bundleno = 3 (0x3), region = 127 }

// kernel: bottleneck_forward.10
= control target key start
LH: loop header
LB: loop body
LE: loop exit
PB: predicated region body
PF: predicated region fallthrough
CT: control target
= control target key end

     0   :  { %s336_s0 = inlined_call_operand.vmem [shape: bf16[128,128], index: 0, kind: input, shape index: {}]   ;;  %s337_s1 = inlined_call_operand.vmem [shape: f32[1,128], index: 1, kind: input, shape index: {}]   ;;  %s338_s2 = inlined_call_operand.vmem [shape: f32[1,128], index: 2, kind: input, shape index: {}]   ;;  %s339_s3 = inlined_call_operand.vmem [shape: bf16[128,128], index: 3, kind: output, shape index: {}]  }
   0x1   :  { %v139_v0 = vld [vmem:[%s336_s0] sm:$0xff]   ;;  %v210_v5 = vld [vmem:[%s336_s0 + $0x8] sm:$0xff]   ;;  %v211_v8 = vld [vmem:[%s336_s0 + $0x10] sm:$0xff]  }
   0x2   :  { %v252_v1 = vld [vmem:[%s337_s1] ss:$0 sm:$0xff]  ;;  %v140_v2 = vunpack.c.l.bf16 %v139_v0  ;;  %v141_v3 = vunpack.c.h.bf16 %v139_v0  ;;  %v144_v6 = vunpack.c.l.bf16 %v210_v5  ;;  %v145_v7 = vunpack.c.h.bf16 %v210_v5  ;;  %v212_v9 = vld [vmem:[%s336_s0 + $0x18] sm:$0xff]   ;;  %v214_v35 = vld [vmem:[%s336_s0 + $0x28] sm:$0xff]  }
   0x3   :  { %v257_v4 = vld [vmem:[%s338_s2] ss:$0 sm:$0xff]  ;;  %v148_v12 = vunpack.c.l.bf16 %v211_v8  ;;  %v149_v13 = vunpack.c.h.bf16 %v211_v8  ;;  %v152_v16 = vunpack.c.l.bf16 %v212_v9  ;;  %v153_v17 = vunpack.c.h.bf16 %v212_v9  ;;  %v215_v40 = vld [vmem:[%s336_s0 + $0x30] sm:$0xff]   ;;  %v216_v45 = vld [vmem:[%s336_s0 + $0x38] sm:$0xff]  }
   0x4   :  { %v50_v10 = vmul.f32 %v252_v1, %v140_v2  ;;  %v51_v11 = vmul.f32 %v252_v1, %v141_v3  ;;  %v52_v14 = vmul.f32 %v252_v1, %v144_v6  ;;  %v53_v15 = vmul.f32 %v252_v1, %v145_v7  ;;  %v213_v26 = vld [vmem:[%s336_s0 + $0x20] sm:$0xff]  }
   0x5   :  { %v54_v20 = vmul.f32 %v252_v1, %v148_v12  ;;  %v55_v21 = vmul.f32 %v252_v1, %v149_v13  ;;  %v56_v24 = vmul.f32 %v252_v1, %v152_v16  ;;  %v57_v25 = vmul.f32 %v252_v1, %v153_v17 }
   0x6   :  { %v70_v18 = vadd.f32 %v257_v4, %v50_v10  ;;  %v71_v19 = vadd.f32 %v257_v4, %v51_v11  ;;  %v72_v22 = vadd.f32 %v257_v4, %v52_v14  ;;  %v73_v23 = vadd.f32 %v257_v4, %v53_v15 }
   0x7   :  { %v74_v29 = vadd.f32 %v257_v4, %v54_v20  ;;  %v75_v30 = vadd.f32 %v257_v4, %v55_v21  ;;  %v76_v33 = vadd.f32 %v257_v4, %v56_v24  ;;  %v77_v34 = vadd.f32 %v257_v4, %v57_v25 }
   0x8   :  { %v86_v27 = vmax.f32 %v70_v18, 0.0  ;;  %v87_v28 = vmax.f32 %v71_v19, 0.0  ;;  %v88_v31 = vmax.f32 %v72_v22, 0.0  ;;  %v89_v32 = vmax.f32 %v73_v23, 0.0 }
   0x9   :  { %v90_v37 = vmax.f32 %v74_v29, 0.0  ;;  %v91_v38 = vmax.f32 %v75_v30, 0.0  ;;  %v156_v39 = vunpack.c.l.bf16 %v213_v26  ;;  %v92_v42 = vmax.f32 %v76_v33, 0.0 }
   0xa   :  { %v173_v36 = vpack.c.bf16 %v87_v28, %v86_v27  ;;  %v178_v41 = vpack.c.bf16 %v89_v32, %v88_v31  ;;  %v93_v43 = vmax.f32 %v77_v34, 0.0  ;;  %v157_v44 = vunpack.c.h.bf16 %v213_v26 }
   0xb   :  { %v183_v46 = vpack.c.bf16 %v91_v38, %v90_v37  ;;  %v58_v47 = vmul.f32 %v252_v1, %v156_v39  ;;  %v160_v48 = vunpack.c.l.bf16 %v214_v35  ;;  %v161_v49 = vunpack.c.h.bf16 %v214_v35 }
   0xc   :  { %174 = vst [vmem:[%s339_s3] sm:$0xff] %v173_v36   ;;  %v188_v50 = vpack.c.bf16 %v93_v43, %v92_v42  ;;  %v59_v51 = vmul.f32 %v252_v1, %v157_v44  ;;  %v164_v52 = vunpack.c.l.bf16 %v215_v40  ;;  %v165_v53 = vunpack.c.h.bf16 %v215_v40 }
   0xd   :  { %217 = vst [vmem:[%s339_s3 + $0x8] sm:$0xff] %v178_v41   ;;  %v78_v54 = vadd.f32 %v257_v4, %v58_v47  ;;  %v60_v55 = vmul.f32 %v252_v1, %v160_v48  ;;  %v61_v56 = vmul.f32 %v252_v1, %v161_v49  ;;  %v168_v57 = vunpack.c.l.bf16 %v216_v45 }
   0xe   :  { %218 = vst [vmem:[%s339_s3 + $0x10] sm:$0xff] %v183_v46   ;;  %v79_v58 = vadd.f32 %v257_v4, %v59_v51  ;;  %v62_v59 = vmul.f32 %v252_v1, %v164_v52  ;;  %v63_v60 = vmul.f32 %v252_v1, %v165_v53  ;;  %v169_v61 = vunpack.c.h.bf16 %v216_v45 }
   0xf   :  { %219 = vst [vmem:[%s339_s3 + $0x18] sm:$0xff] %v188_v50   ;;  %v94_v62 = vmax.f32 %v78_v54, 0.0  ;;  %v80_v63 = vadd.f32 %v257_v4, %v60_v55  ;;  %v81_v0 = vadd.f32 %v257_v4, %v61_v56  ;;  %v64_v2 = vmul.f32 %v252_v1, %v168_v57 }
  0x10   :  { %v95_v3 = vmax.f32 %v79_v58, 0.0  ;;  %v82_v5 = vadd.f32 %v257_v4, %v62_v59  ;;  %v83_v6 = vadd.f32 %v257_v4, %v63_v60  ;;  %v65_v7 = vmul.f32 %v252_v1, %v169_v61 }
  0x11   :  { %v96_v8 = vmax.f32 %v80_v63, 0.0  ;;  %v97_v9 = vmax.f32 %v81_v0, 0.0  ;;  %v84_v10 = vadd.f32 %v257_v4, %v64_v2 }
  0x12   :  { %v193_v11 = vpack.c.bf16 %v95_v3, %v94_v62  ;;  %v98_v12 = vmax.f32 %v82_v5, 0.0  ;;  %v99_v13 = vmax.f32 %v83_v6, 0.0  ;;  %v85_v14 = vadd.f32 %v257_v4, %v65_v7 }
  0x13   :  { %v198_v15 = vpack.c.bf16 %v97_v9, %v96_v8  ;;  %v100_v16 = vmax.f32 %v84_v10, 0.0 }
  0x14   :  { %220 = vst [vmem:[%s339_s3 + $0x20] sm:$0xff] %v193_v11   ;;  %v203_v17 = vpack.c.bf16 %v99_v13, %v98_v12  ;;  %v101_v18 = vmax.f32 %v85_v14, 0.0 }
  0x15   :  { %221 = vst [vmem:[%s339_s3 + $0x28] sm:$0xff] %v198_v15  }
  0x16   :  { %222 = vst [vmem:[%s339_s3 + $0x30] sm:$0xff] %v203_v17   ;;  %v208_v1 = vpack.c.bf16 %v101_v18, %v100_v16 }
  0x18   :  { %223 = vst [vmem:[%s339_s3 + $0x38] sm:$0xff] %v208_v1  }

// kernel: bottleneck_forward.11
= control target key start
LH: loop header
LB: loop body
LE: loop exit
PB: predicated region body
PF: predicated region fallthrough
CT: control target
= control target key end

     0   :  { %s1232_s12 = smov 0   ;;  %s1234_s13 = smov 0   ;;  %s1494_s0 = inlined_call_operand.vmem [shape: bf16[128,128], index: 0, kind: input, shape index: {}]   ;;  %s1495_s1 = inlined_call_operand.vmem [shape: bf16[128,512], index: 1, kind: input, shape index: {}]   ;;  %s1496_s2 = inlined_call_operand.vmem [shape: bf16[128,512], index: 2, kind: output, shape index: {0}]   ;;  %s1497_s3 = inlined_call_operand.vmem [shape: f32[1,8,512], index: 3, kind: output, shape index: {1}]  }
   0x1   :  { %s1236_s14 = smov 0   ;;  %s1238_s15 = smov 0  }
   0x2   :  { %s1240_s16 = smov 0  }
   0x3 LB: > { %s23_s17 = sadd.s32 1, %s1206_s15  ;;  %s976_s18 = sadd.s32 4294967295, %s1210_s16   ;;  %s1210_s16 = sphi %s1240_s16, %s14_s16   ;;  %s1206_s15 = sphi %s1238_s15, %s1502_s15   ;;  %s1202_s14 = sphi %s1236_s14, %s1501_s14   ;;  %s1198_s13 = sphi %s1234_s13, %s1500_s13   ;;  %s1194_s12 = sphi %s1232_s12, %s1499_s12  }
   0x4   : > { %p24_p0 = scmp.ge.s32.totalorder %s23_s17, 2  ;;  %p66_p1 = scmp.ne.s32.totalorder %s1198_s13, %s1194_s12 }
   0x5   : > { %p67_p2 = scmp.eq.s32.totalorder %s1210_s16, 0  ;;  %p98_p4 = scmp.eq.s32.totalorder %s976_s18, 1 }
   0x6   : > { %s1504_s17 = smov (%p24_p0, %s23_s17), 0  ;;  %s59_s20 = sadd.s32 1, %s1198_s13 }
   0x7   : > { %p68_p3 = por %p67_p2, %p66_p1  ;;  %s56_s19 = ssub.s32 %s1206_s15, %s1504_s17 }
   0x8   : > { %p57_p5 = scmp.eq.s32.totalorder %s56_s19, 0  ;;  %p1267_p6 = por %p98_p4, %p66_p1 }
   0x9   : > { %p980_p7 = scmp.ge.s32.totalorder %s1210_s16, 2 }
   0xa   : > { %s1272_s22 = scalar_select %p57_p5, %s1198_s13, %s59_s20  }
   0xb   : > { %157 = sbr.rel (%p980_p7) target bundleno = 36 (0x24), region = 20 }
  0x10   : > { %160 = sbr.rel (!%p68_p3) target bundleno = 36 (0x24), region = 24  ;;  %s162_s23 = sand.u32 (%p68_p3), 1, %s1198_s13  }
  0x11   : > { %s1090_s24 = sshll.u32 (%p68_p3), %s1206_s15, 3  ;;  %s981_s25 = sshll.u32 (%p68_p3), %s162_s23, 7 }
  0x12   : > { %s1280_s28 = scalar_lea.vmem (%p68_p3), %s1495_s1, %s1090_s24  ;;  %s164_s29 = scalar_lea.vmem (%p68_p3), [#allocation2], %s981_s25 }
  0x13   : > { %v226_v0 = vld [vmem:[%s1280_s28] sm:$0xff] (%p68_p3)  ;;  %v228_v1 = vld [vmem:[%s1280_s28 + $0x10] sm:$0xff] (%p68_p3) }
  0x14   : > { %v230_v2 = vld [vmem:[%s1280_s28 + $0x20] sm:$0xff] (%p68_p3)  ;;  %227 = vst [vmem:[%s164_s29] sm:$0xff] (%p68_p3), %v226_v0  ;;  %v232_v3 = vld [vmem:[%s1280_s28 + $0x30] sm:$0xff] (%p68_p3) }
  0x15   : > { %229 = vst [vmem:[%s164_s29 + $0x8] sm:$0xff] %v228_v1  ;;  %v234_v4 = vld [vmem:[%s1280_s28 + $0x40] sm:$0xff]  ;;  %v236_v5 = vld [vmem:[%s1280_s28 + $0x50] sm:$0xff] }
  0x16   : > { %231 = vst [vmem:[%s164_s29 + $0x10] sm:$0xff] %v230_v2  ;;  %v238_v6 = vld [vmem:[%s1280_s28 + $0x60] sm:$0xff]  ;;  %v240_v7 = vld [vmem:[%s1280_s28 + $0x70] sm:$0xff] }
  0x17   : > { %233 = vst [vmem:[%s164_s29 + $0x18] sm:$0xff] %v232_v3  ;;  %v242_v8 = vld [vmem:[%s1280_s28 + $0x80] sm:$0xff]  ;;  %v244_v9 = vld [vmem:[%s1280_s28 + $0x90] sm:$0xff] }
  0x18   : > { %235 = vst [vmem:[%s164_s29 + $0x20] sm:$0xff] %v234_v4  ;;  %v246_v10 = vld [vmem:[%s1280_s28 + $0xa0] sm:$0xff]  ;;  %v248_v11 = vld [vmem:[%s1280_s28 + $0xb0] sm:$0xff] }
  0x19   : > { %237 = vst [vmem:[%s164_s29 + $0x28] sm:$0xff] %v236_v5  ;;  %v250_v12 = vld [vmem:[%s1280_s28 + $0xc0] sm:$0xff]  ;;  %v252_v13 = vld [vmem:[%s1280_s28 + $0xd0] sm:$0xff] }
  0x1a   : > { %239 = vst [vmem:[%s164_s29 + $0x30] sm:$0xff] %v238_v6  ;;  %v254_v14 = vld [vmem:[%s1280_s28 + $0xe0] sm:$0xff]  ;;  %v256_v15 = vld [vmem:[%s1280_s28 + $0xf0] sm:$0xff] }
  0x1b   : > { %241 = vst [vmem:[%s164_s29 + $0x38] sm:$0xff] %v240_v7 }
  0x1c   : > { %243 = vst [vmem:[%s164_s29 + $0x40] sm:$0xff] %v242_v8 }
  0x1d   : > { %245 = vst [vmem:[%s164_s29 + $0x48] sm:$0xff] %v244_v9 }
  0x1e   : > { %247 = vst [vmem:[%s164_s29 + $0x50] sm:$0xff] %v246_v10 }
  0x1f   : > { %249 = vst [vmem:[%s164_s29 + $0x58] sm:$0xff] %v248_v11 }
  0x20   : > { %251 = vst [vmem:[%s164_s29 + $0x60] sm:$0xff] %v250_v12 }
  0x21   : > { %253 = vst [vmem:[%s164_s29 + $0x68] sm:$0xff] %v252_v13 }
  0x22   : > { %255 = vst [vmem:[%s164_s29 + $0x70] sm:$0xff] %v254_v14 }
  0x23   : > { %257 = vst [vmem:[%s164_s29 + $0x78] sm:$0xff] %v256_v15 }
  0x24 PF: > { %p984_p8 = scmp.ge.s32.totalorder %s1210_s16, 1  ;;  %p262_p9 = scmp.lt.s32.totalorder %s1210_s16, 3 }
  0x26   : > { %p263_p10 = pnand %p984_p8, %p262_p9 }
  0x27   : > { %s269_s30 = sand.u32 (!%p263_p10), 1, %s1194_s12  }
  0x28   : > { %266 = sbr.rel (%p263_p10) target bundleno = 296 (0x128), region = 62  ;;  %s1301_s4 = sshll.u32 (!%p263_p10), %s269_s30, 7 }
  0x29   : > { %s1304_s5 = scalar_lea.vmem (!%p263_p10), [#allocation2], %s1301_s4  ;;  %s1363_s29 = scalar_lea.vmem (!%p263_p10), [#allocation3], %s1301_s4 }
  0x2a   : > { %s987_s30 = sshll.u32 (!%p263_p10), %s1202_s14, 1 }
  0x2b   : > { %p317_p11 = scmp.lt.s32.totalorder (!%p263_p10), %s987_s30, 3 }
  0x2d   : > { %v1079_v16 = vld [vmem:[%s1304_s5 + $0x70] sm:$0xf]  ;;  %v1114_v17 = vld [vmem:[%s1304_s5 + $0x74] sm:$0xf0]  ;;  %v1113_v18 = vld [vmem:[%s1304_s5 + $0x74] sm:$0xf] }
  0x2e   : > { %v1080_v19 = vor.u32 %v1114_v17, %v1079_v16  ;;  %v1081_v20 = vld [vmem:[%s1304_s5 + $0x78] sm:$0xf0]  ;;  %v1071_v21 = vld [vmem:[%s1304_s5 + $0x60] sm:$0xf]  ;;  %v1112_v22 = vld [vmem:[%s1304_s5 + $0x64] sm:$0xf0] }
  0x2f   : > { %v1084_v23 = vor.u32 %v1113_v18, %v1081_v20  ;;  %v1111_v24 = vld [vmem:[%s1304_s5 + $0x64] sm:$0xf]  ;;  %v1073_v25 = vld [vmem:[%s1304_s5 + $0x68] sm:$0xf0]  ;;  %v1072_v26 = vor.u32 %v1112_v22, %v1071_v21  ;;  %v1063_v28 = vld [vmem:[%s1304_s5 + $0x50] sm:$0xf] }
  0x30   : > { %484 = vmatpush.bf16.msra.mxu0 %v1080_v19  ;;  %1116 = vmatpush.bf16.msra.mxu2 %v1080_v19  ;;  %v1076_v27 = vor.u32 %v1111_v24, %v1073_v25  ;;  %v1110_v29 = vld [vmem:[%s1304_s5 + $0x54] sm:$0xf0]  ;;  %v1109_v30 = vld [vmem:[%s1304_s5 + $0x54] sm:$0xf]  ;;  %v1065_v31 = vld [vmem:[%s1304_s5 + $0x58] sm:$0xf0] }
  0x31   : > { %533 = vmatpush.bf16.msra.mxu1 %v1084_v23  ;;  %1124 = vmatpush.bf16.msra.mxu3 %v1084_v23  ;;  %v1064_v32 = vor.u32 %v1110_v29, %v1063_v28  ;;  %v1068_v33 = vor.u32 %v1109_v30, %v1065_v31  ;;  %v1055_v34 = vld [vmem:[%s1304_s5 + $0x40] sm:$0xf]  ;;  %v1108_v35 = vld [vmem:[%s1304_s5 + $0x44] sm:$0xf0]  ;;  %v1107_v36 = vld [vmem:[%s1304_s5 + $0x44] sm:$0xf] }
  0x32   : > { %v1057_v37 = vld [vmem:[%s1304_s5 + $0x48] sm:$0xf0]  ;;  %v1056_v38 = vor.u32 %v1108_v35, %v1055_v34  ;;  %v1047_v40 = vld [vmem:[%s1304_s5 + $0x30] sm:$0xf]  ;;  %v1106_v41 = vld [vmem:[%s1304_s5 + $0x34] sm:$0xf0] }
  0x33   : > { %v1060_v39 = vor.u32 %v1107_v36, %v1057_v37  ;;  %v1105_v42 = vld [vmem:[%s1304_s5 + $0x34] sm:$0xf]  ;;  %v1049_v43 = vld [vmem:[%s1304_s5 + $0x38] sm:$0xf0]  ;;  %v1048_v44 = vor.u32 %v1106_v41, %v1047_v40  ;;  %v1039_v46 = vld [vmem:[%s1304_s5 + $0x20] sm:$0xf] }
  0x34   : > { %485 = vmatpush.bf16.msra.mxu0 %v1072_v26  ;;  %1117 = vmatpush.bf16.msra.mxu2 %v1072_v26  ;;  %v1052_v45 = vor.u32 %v1105_v42, %v1049_v43  ;;  %v1104_v47 = vld [vmem:[%s1304_s5 + $0x24] sm:$0xf0]  ;;  %v1103_v48 = vld [vmem:[%s1304_s5 + $0x24] sm:$0xf]  ;;  %v1041_v49 = vld [vmem:[%s1304_s5 + $0x28] sm:$0xf0] }
  0x35   : > { %534 = vmatpush.bf16.msra.mxu1 %v1076_v27  ;;  %1125 = vmatpush.bf16.msra.mxu3 %v1076_v27  ;;  %v1040_v50 = vor.u32 %v1104_v47, %v1039_v46  ;;  %v1044_v51 = vor.u32 %v1103_v48, %v1041_v49  ;;  %v1031_v52 = vld [vmem:[%s1304_s5 + $0x10] sm:$0xf]  ;;  %v1102_v53 = vld [vmem:[%s1304_s5 + $0x14] sm:$0xf0]  ;;  %v1101_v54 = vld [vmem:[%s1304_s5 + $0x14] sm:$0xf] }
  0x36   : > { %v1033_v55 = vld [vmem:[%s1304_s5 + $0x18] sm:$0xf0]  ;;  %v1032_v56 = vor.u32 %v1102_v53, %v1031_v52  ;;  %v1023_v58 = vld [vmem:[%s1304_s5] sm:$0xf]  ;;  %v1100_v59 = vld [vmem:[%s1304_s5 + $0x4] sm:$0xf0] }
  0x37   : > { %v1036_v57 = vor.u32 %v1101_v54, %v1033_v55  ;;  %v1099_v60 = vld [vmem:[%s1304_s5 + $0x4] sm:$0xf]  ;;  %v1025_v61 = vld [vmem:[%s1304_s5 + $0x8] sm:$0xf0]  ;;  %v1024_v62 = vor.u32 %v1100_v59, %v1023_v58  ;;  %v1093_v4 = vld [vmem:[%s1494_s0 + $0x10] sm:$0xff]  ;;  %s1506_s30 = smov (!%p317_p11, %s987_s30), 3 }
  0x38   : > { %486 = vmatpush.bf16.msra.mxu0 %v1064_v32  ;;  %1118 = vmatpush.bf16.msra.mxu2 %v1064_v32  ;;  %v1028_v63 = vor.u32 %v1099_v60, %v1025_v61  ;;  %v1091_v0 = vld [vmem:[%s1494_s0] sm:$0xff]  ;;  %v1092_v2 = vld [vmem:[%s1494_s0 + $0x8] sm:$0xff]  ;;  %v1097_v5 = vld [vmem:[%s1494_s0 + $0x30] sm:$0xff]  ;;  %s988_s4 = sshll.u32 %s1506_s30, 3  ;;  %s1115_s8 = sshll.u32 (%p1267_p6), %s1202_s14, 3 }
  0x39   : > { %535 = vmatpush.bf16.msra.mxu1 %v1068_v33  ;;  %1126 = vmatpush.bf16.msra.mxu3 %v1068_v33  ;;  %v1095_v1 = vld [vmem:[%s1494_s0 + $0x20] sm:$0xff]  ;;  %v1096_v3 = vld [vmem:[%s1494_s0 + $0x28] sm:$0xff]  ;;  %v1094_v6 = vld [vmem:[%s1494_s0 + $0x18] sm:$0xff]  ;;  %s322_s7 = scalar_lea.vmem %s1497_s3, %s988_s4  ;;  %s758_s11 = scalar_lea.vmem (%p1267_p6), %s1496_s2, %s1115_s8 }
  0x3a   : > { %v1098_v7 = vld [vmem:[%s1494_s0 + $0x38] sm:$0xff] }
  0x3c   : > { %487 = vmatpush.bf16.msra.mxu0 %v1056_v38  ;;  %1119 = vmatpush.bf16.msra.mxu2 %v1056_v38 }
  0x3d   : > { %536 = vmatpush.bf16.msra.mxu1 %v1060_v39  ;;  %1127 = vmatpush.bf16.msra.mxu3 %v1060_v39 }
  0x40   : > { %488 = vmatpush.bf16.msra.mxu0 %v1048_v44  ;;  %1120 = vmatpush.bf16.msra.mxu2 %v1048_v44 }
  0x41   : > { %537 = vmatpush.bf16.msra.mxu1 %v1052_v45  ;;  %1128 = vmatpush.bf16.msra.mxu3 %v1052_v45 }
  0x44   : > { %489 = vmatpush.bf16.msra.mxu0 %v1040_v50  ;;  %1121 = vmatpush.bf16.msra.mxu2 %v1040_v50 }
  0x45   : > { %538 = vmatpush.bf16.msra.mxu1 %v1044_v51  ;;  %1129 = vmatpush.bf16.msra.mxu3 %v1044_v51 }
  0x48   : > { %490 = vmatpush.bf16.msra.mxu0 %v1032_v56  ;;  %1122 = vmatpush.bf16.msra.mxu2 %v1032_v56 }
  0x49   : > { %539 = vmatpush.bf16.msra.mxu1 %v1036_v57  ;;  %1130 = vmatpush.bf16.msra.mxu3 %v1036_v57 }
  0x4c   : > { %491 = vmatpush.bf16.msra.mxu0 %v1024_v62  ;;  %1123 = vmatpush.bf16.msra.mxu2 %v1024_v62 }
  0x4d   : > { %540 = vmatpush.bf16.msra.mxu1 %v1028_v63  ;;  %1131 = vmatpush.bf16.msra.mxu3 %v1028_v63 }
  0x4f   : > { %492 = vmatmul.bf16.vlgmr.msra.gmra.mxu0 %v1091_v0  ;;  %512 = vmatmul.bf16.vlgmr.msra.gmra.mxu2 %v1095_v1 }
  0x50   : > { %541 = vmatmul.bf16.vlgmr.msra.gmra.mxu1 %v1091_v0  ;;  %561 = vmatmul.bf16.vlgmr.msra.gmra.mxu3 %v1095_v1 }
  0x5f   : > { %497 = vmatmul.bf16.gmra.mxu0 %v1092_v2  ;;  %517 = vmatmul.bf16.gmra.mxu2 %v1096_v3 }
  0x60   : > { %546 = vmatmul.bf16.gmra.mxu1 %v1092_v2  ;;  %566 = vmatmul.bf16.gmra.mxu3 %v1096_v3 }
  0x6f   : > { %502 = vmatmul.bf16.gmra.mxu0 %v1093_v4  ;;  %522 = vmatmul.bf16.gmra.mxu2 %v1097_v5 }
  0x70   : > { %551 = vmatmul.bf16.gmra.mxu1 %v1093_v4  ;;  %571 = vmatmul.bf16.gmra.mxu3 %v1097_v5 }
  0x7f   : > { %507 = vmatmul.bf16.gmra.mxu0 %v1094_v6  ;;  %527 = vmatmul.bf16.gmra.mxu2 %v1098_v7 }
  0x80   : > { %556 = vmatmul.bf16.gmra.mxu1 %v1094_v6  ;;  %576 = vmatmul.bf16.gmra.mxu3 %v1098_v7 }
  0xcc   : > { %v493_v8 = vpop.f32.mrf.mxu0 }
  0xcd   : > { %v542_v9 = vpop.f32.mrf.mxu1  ;;  %v656_v43 = vmul.f32 %v493_v8, %v493_v8 }
  0xce   : > { %v582_v10 = vpack.c.bf16 %v542_v9, %v493_v8  ;;  %v657_v46 = vmul.f32 %v542_v9, %v542_v9 }
  0xd0   : > { %598 = vst [vmem:[%s1363_s29] sm:$0xff] %v582_v10 }
  0xd2   : > { %v1366_v11 = vpop.f32.mrf.mxu2 }
  0xd3   : > { %v1368_v12 = vpop.f32.mrf.mxu3 }
  0xd4   : > { %v495_v13 = vpop.f32.mrf.mxu0  ;;  %v590_v14 = vpack.c.bf16 %v1368_v12, %v1366_v11 }
  0xd5   : > { %v544_v15 = vpop.f32.mrf.mxu1  ;;  %v658_v41 = vmul.f32 %v495_v13, %v495_v13  ;;  %v614_v44 = vadd.f32 %v495_v13, %v493_v8 }
  0xd6   : > { %v583_v16 = vpack.c.bf16 %v544_v15, %v495_v13  ;;  %606 = vst [vmem:[%s1363_s29 + $0x40] sm:$0xff] %v590_v14  ;;  %v659_v42 = vmul.f32 %v544_v15, %v544_v15  ;;  %v635_v47 = vadd.f32 %v544_v15, %v542_v9 }
  0xd7   : > { %v688_v50 = vadd.f32 %v658_v41, %v656_v43 }
  0xd8   : > { %599 = vst [vmem:[%s1363_s29 + $0x8] sm:$0xff] %v583_v16  ;;  %v709_v54 = vadd.f32 %v659_v42, %v657_v46 }
  0xda   : > { %v1374_v17 = vpop.f32.mrf.mxu2 }
  0xdb   : > { %v1376_v18 = vpop.f32.mrf.mxu3 }
  0xdc   : > { %v498_v19 = vpop.f32.mrf.mxu0  ;;  %v591_v20 = vpack.c.bf16 %v1376_v18, %v1374_v17 }
  0xdd   : > { %v547_v21 = vpop.f32.mrf.mxu1  ;;  %v660_v45 = vmul.f32 %v498_v19, %v498_v19  ;;  %v615_v51 = vadd.f32 %v614_v44, %v498_v19  ;;  %v673_v44 = vmul.f32 %v1368_v12, %v1368_v12 }
  0xde   : > { %v584_v22 = vpack.c.bf16 %v547_v21, %v498_v19  ;;  %607 = vst [vmem:[%s1363_s29 + $0x48] sm:$0xff] %v591_v20  ;;  %v661_v48 = vmul.f32 %v547_v21, %v547_v21  ;;  %v636_v55 = vadd.f32 %v635_v47, %v547_v21  ;;  %v674_v47 = vmul.f32 %v1374_v17, %v1374_v17 }
  0xdf   : > { %v689_v59 = vadd.f32 %v688_v50, %v660_v45 }
  0xe0   : > { %600 = vst [vmem:[%s1363_s29 + $0x10] sm:$0xff] %v584_v22  ;;  %v710_v63 = vadd.f32 %v709_v54, %v661_v48 }
  0xe2   : > { %v1382_v23 = vpop.f32.mrf.mxu2 }
  0xe3   : > { %v1384_v24 = vpop.f32.mrf.mxu3 }
  0xe4   : > { %v500_v25 = vpop.f32.mrf.mxu0  ;;  %v592_v26 = vpack.c.bf16 %v1384_v24, %v1382_v23 }
  0xe5   : > { %v549_v27 = vpop.f32.mrf.mxu1  ;;  %v662_v52 = vmul.f32 %v500_v25, %v500_v25  ;;  %v616_v60 = vadd.f32 %v615_v51, %v500_v25  ;;  %v675_v51 = vmul.f32 %v1376_v18, %v1376_v18 }
  0xe6   : > { %v585_v28 = vpack.c.bf16 %v549_v27, %v500_v25  ;;  %608 = vst [vmem:[%s1363_s29 + $0x50] sm:$0xff] %v592_v26  ;;  %v663_v56 = vmul.f32 %v549_v27, %v549_v27  ;;  %v637_v0 = vadd.f32 %v636_v55, %v549_v27  ;;  %v676_v55 = vmul.f32 %v1382_v23, %v1382_v23 }
  0xe7   : > { %v690_v3 = vadd.f32 %v689_v59, %v662_v52 }
  0xe8   : > { %601 = vst [vmem:[%s1363_s29 + $0x18] sm:$0xff] %v585_v28  ;;  %v711_v6 = vadd.f32 %v710_v63, %v663_v56 }
  0xea   : > { %v1390_v29 = vpop.f32.mrf.mxu2 }
  0xeb   : > { %v1392_v30 = vpop.f32.mrf.mxu3 }
  0xec   : > { %v503_v31 = vpop.f32.mrf.mxu0  ;;  %v593_v32 = vpack.c.bf16 %v1392_v30, %v1390_v29  ;;  %v679_v63 = vmul.f32 %v1392_v30, %v1392_v30 }
  0xed   : > { %v552_v33 = vpop.f32.mrf.mxu1  ;;  %v664_v61 = vmul.f32 %v503_v31, %v503_v31  ;;  %v617_v4 = vadd.f32 %v616_v60, %v503_v31 }
  0xee   : > { %v586_v34 = vpack.c.bf16 %v552_v33, %v503_v31  ;;  %609 = vst [vmem:[%s1363_s29 + $0x58] sm:$0xff] %v593_v32  ;;  %v665_v1 = vmul.f32 %v552_v33, %v552_v33  ;;  %v638_v7 = vadd.f32 %v637_v0, %v552_v33 }
  0xef   : > { %v691_v9 = vadd.f32 %v690_v3, %v664_v61 }
  0xf0   : > { %602 = vst [vmem:[%s1363_s29 + $0x20] sm:$0xff] %v586_v34  ;;  %v712_v14 = vadd.f32 %v711_v6, %v665_v1 }
  0xf2   : > { %v1398_v35 = vpop.f32.mrf.mxu2 }
  0xf3   : > { %v1400_v36 = vpop.f32.mrf.mxu3  ;;  %v680_v1 = vmul.f32 %v1398_v35, %v1398_v35 }
  0xf4   : > { %v505_v37 = vpop.f32.mrf.mxu0  ;;  %v594_v38 = vpack.c.bf16 %v1400_v36, %v1398_v35  ;;  %v681_v3 = vmul.f32 %v1400_v36, %v1400_v36 }
  0xf5   : > { %v554_v39 = vpop.f32.mrf.mxu1  ;;  %v666_v5 = vmul.f32 %v505_v37, %v505_v37  ;;  %v618_v10 = vadd.f32 %v617_v4, %v505_v37 }
  0xf6   : > { %v587_v40 = vpack.c.bf16 %v554_v39, %v505_v37  ;;  %610 = vst [vmem:[%s1363_s29 + $0x60] sm:$0xff] %v594_v38  ;;  %v667_v8 = vmul.f32 %v554_v39, %v554_v39  ;;  %v639_v15 = vadd.f32 %v638_v7, %v554_v39  ;;  %v672_v39 = vmul.f32 %v1366_v11, %v1366_v11 }
  0xf7   : > { %v692_v20 = vadd.f32 %v691_v9, %v666_v5 }
  0xf8   : > { %603 = vst [vmem:[%s1363_s29 + $0x28] sm:$0xff] %v587_v40  ;;  %v713_v25 = vadd.f32 %v712_v14, %v667_v8 }
  0xfa   : > { %v1406_v49 = vpop.f32.mrf.mxu2 }
  0xfb   : > { %v1408_v53 = vpop.f32.mrf.mxu3  ;;  %v682_v5 = vmul.f32 %v1406_v49, %v1406_v49 }
  0xfc   : > { %v508_v57 = vpop.f32.mrf.mxu0  ;;  %v595_v58 = vpack.c.bf16 %v1408_v53, %v1406_v49  ;;  %v683_v7 = vmul.f32 %v1408_v53, %v1408_v53 }
  0xfd   : > { %v557_v62 = vpop.f32.mrf.mxu1  ;;  %v668_v13 = vmul.f32 %v508_v57, %v508_v57  ;;  %v619_v21 = vadd.f32 %v618_v10, %v508_v57 }
  0xfe   : > { %v588_v2 = vpack.c.bf16 %v557_v62, %v508_v57  ;;  %611 = vst [vmem:[%s1363_s29 + $0x68] sm:$0xff] %v595_v58  ;;  %v669_v16 = vmul.f32 %v557_v62, %v557_v62  ;;  %v640_v26 = vadd.f32 %v639_v15, %v557_v62  ;;  %v677_v58 = vmul.f32 %v1384_v24, %v1384_v24 }
  0xff   : > { %v693_v31 = vadd.f32 %v692_v20, %v668_v13 }
 0x100   : > { %604 = vst [vmem:[%s1363_s29 + $0x30] sm:$0xff] %v588_v2  ;;  %v714_v38 = vadd.f32 %v713_v25, %v669_v16 }
 0x102   : > { %v528_v19 = vpop.f32.mrf.mxu2 }
 0x103   : > { %v577_v22 = vpop.f32.mrf.mxu3  ;;  %v684_v10 = vmul.f32 %v528_v19, %v528_v19 }
 0x104   : > { %v510_v27 = vpop.f32.mrf.mxu0  ;;  %v596_v28 = vpack.c.bf16 %v577_v22, %v528_v19  ;;  %v685_v15 = vmul.f32 %v577_v22, %v577_v22 }
 0x105   : > { %v620_v32 = vadd.f32 %v619_v21, %v510_v27  ;;  %v670_v33 = vmul.f32 %v510_v27, %v510_v27  ;;  %v559_v34 = vpop.f32.mrf.mxu1 }
 0x106   : > { %v589_v37 = vpack.c.bf16 %v559_v34, %v510_v27  ;;  %v641_v40 = vadd.f32 %v640_v26, %v559_v34  ;;  %v671_v41 = vmul.f32 %v559_v34, %v559_v34  ;;  %612 = vst [vmem:[%s1363_s29 + $0x70] sm:$0xff] %v596_v28  ;;  %v730_v34 = vlaneseq }
 0x107   : > { %v621_v42 = vadd.f32 %v620_v32, %v1366_v11  ;;  %v694_v43 = vadd.f32 %v693_v31, %v670_v33 }
 0x108   : > { %605 = vst [vmem:[%s1363_s29 + $0x38] sm:$0xff] %v589_v37  ;;  %v642_v45 = vadd.f32 %v641_v40, %v1368_v12  ;;  %v715_v46 = vadd.f32 %v714_v38, %v671_v41 }
 0x109   : > { %v622_v48 = vadd.f32 %v621_v42, %v1374_v17  ;;  %v695_v50 = vadd.f32 %v694_v43, %v672_v39  ;;  %v731_v43 = vshrl.u32 %v730_v34, 7 }
 0x10a   : > { %v643_v52 = vadd.f32 %v642_v45, %v1376_v18  ;;  %v716_v11 = vadd.f32 %v715_v46, %v673_v44  ;;  %v530_v54 = vpop.f32.mrf.mxu2  ;;  %v678_v18 = vmul.f32 %v1390_v29, %v1390_v29 }
 0x10b   : > { %v623_v12 = vadd.f32 %v622_v48, %v1382_v23  ;;  %v696_v56 = vadd.f32 %v695_v50, %v674_v47  ;;  %v579_v57 = vpop.f32.mrf.mxu3  ;;  %v686_v21 = vmul.f32 %v530_v54, %v530_v54  ;;  %vm732_vm0 = vcmp.lt.s32.totalorder %v731_v43, 4 }
 0x10c   : > { %v644_v17 = vadd.f32 %v643_v52, %v1384_v24  ;;  %v717_v59 = vadd.f32 %v716_v11, %v675_v51  ;;  %v597_v60 = vpack.c.bf16 %v579_v57, %v530_v54 }
 0x10d   : > { %v697_v61 = vadd.f32 %v696_v56, %v676_v55  ;;  %v624_v62 = vadd.f32 %v623_v12, %v1390_v29 }
 0x10e   : > { %v718_v0 = vadd.f32 %v717_v59, %v677_v58  ;;  %v645_v23 = vadd.f32 %v644_v17, %v1392_v30  ;;  %613 = vst [vmem:[%s1363_s29 + $0x78] sm:$0xff] %v597_v60  ;;  %v817_v58 = vld [vmem:[%s1363_s29] sm:$0xff] (%p1267_p6)  ;;  %v819_v17 = vld [vmem:[%s1363_s29 + $0x8] sm:$0xff] (%p1267_p6)  ;;  %v821_v59 = vld [vmem:[%s1363_s29 + $0x10] sm:$0xff] (%p1267_p6) }
 0x10f   : > { %v625_v24 = vadd.f32 %v624_v62, %v1398_v35  ;;  %v698_v2 = vadd.f32 %v697_v61, %v678_v18  ;;  %818 = vst [vmem:[%s758_s11] sm:$0xff] (%p1267_p6), %v817_v58  ;;  %v823_v60 = vld [vmem:[%s1363_s29 + $0x18] sm:$0xff] (%p1267_p6)  ;;  %v825_v18 = vld [vmem:[%s1363_s29 + $0x20] sm:$0xff] (%p1267_p6)  ;;  %v827_v61 = vld [vmem:[%s1363_s29 + $0x28] sm:$0xff] (%p1267_p6) }
 0x110   : > { %v646_v4 = vadd.f32 %v645_v23, %v1400_v36  ;;  %v719_v29 = vadd.f32 %v718_v0, %v679_v63  ;;  %820 = vst [vmem:[%s758_s11 + $0x10] sm:$0xff] (%p1267_p6), %v819_v17  ;;  %v829_v62 = vld [vmem:[%s1363_s29 + $0x30] sm:$0xff] (%p1267_p6)  ;;  %v831_v63 = vld [vmem:[%s1363_s29 + $0x38] sm:$0xff] (%p1267_p6)  ;;  %v833_v0 = vld [vmem:[%s1363_s29 + $0x40] sm:$0xff] (%p1267_p6) }
 0x111   : > { %v626_v6 = vadd.f32 %v625_v24, %v1406_v49  ;;  %v699_v30 = vadd.f32 %v698_v2, %v680_v1  ;;  %v687_v49 = vmul.f32 %v579_v57, %v579_v57  ;;  %822 = vst [vmem:[%s758_s11 + $0x20] sm:$0xff] (%p1267_p6), %v821_v59  ;;  %v835_v23 = vld [vmem:[%s1363_s29 + $0x48] sm:$0xff] (%p1267_p6)  ;;  %v837_v1 = vld [vmem:[%s1363_s29 + $0x50] sm:$0xff] (%p1267_p6)  ;;  %v839_v24 = vld [vmem:[%s1363_s29 + $0x58] sm:$0xff] (%p1267_p6) }
 0x112   : > { %v647_v8 = vadd.f32 %v646_v4, %v1408_v53  ;;  %v720_v35 = vadd.f32 %v719_v29, %v681_v3  ;;  %824 = vst [vmem:[%s758_s11 + $0x30] sm:$0xff] (%p1267_p6), %v823_v60  ;;  %v841_v2 = vld [vmem:[%s1363_s29 + $0x60] sm:$0xff] (%p1267_p6)  ;;  %v843_v3 = vld [vmem:[%s1363_s29 + $0x68] sm:$0xff] (%p1267_p6)  ;;  %v845_v4 = vld [vmem:[%s1363_s29 + $0x70] sm:$0xff] (%p1267_p6) }
 0x113   : > { %v627_v9 = vadd.f32 %v626_v6, %v528_v19  ;;  %v700_v13 = vadd.f32 %v699_v30, %v682_v5  ;;  %826 = vst [vmem:[%s758_s11 + $0x40] sm:$0xff] (%p1267_p6), %v825_v18 }
 0x114   : > { %v648_v14 = vadd.f32 %v647_v8, %v577_v22  ;;  %v721_v16 = vadd.f32 %v720_v35, %v683_v7  ;;  %828 = vst [vmem:[%s758_s11 + $0x50] sm:$0xff] (%p1267_p6), %v827_v61 }
 0x115   : > { %v701_v36 = vadd.f32 %v700_v13, %v684_v10  ;;  %v628_v20 = vadd.f32 %v627_v9, %v530_v54  ;;  %830 = vst [vmem:[%s758_s11 + $0x60] sm:$0xff] (%p1267_p6), %v829_v62  ;;  %v847_v29 = vld [vmem:[%s1363_s29 + $0x78] sm:$0xff] (%p1267_p6) }
 0x116   : > { %v722_v25 = vadd.f32 %v721_v16, %v685_v15  ;;  %v649_v26 = vadd.f32 %v648_v14, %v579_v57  ;;  %832 = vst [vmem:[%s758_s11 + $0x70] sm:$0xff] (%p1267_p6), %v831_v63 }
 0x117   : > { %v629_v27 = vrot.slane %v628_v20, 4  ;;  %v702_v28 = vadd.f32 %v701_v36, %v686_v21  ;;  %834 = vst [vmem:[%s758_s11 + $0x80] sm:$0xff] (%p1267_p6), %v833_v0 }
 0x118   : > { %v650_v31 = vrot.slane %v649_v26, 4  ;;  %v723_v32 = vadd.f32 %v722_v25, %v687_v49  ;;  %836 = vst [vmem:[%s758_s11 + $0x90] sm:$0xff] (%p1267_p6), %v835_v23 }
 0x119   : > { %v630_v53 = vadd.f32 %v629_v27, %v628_v20  ;;  %v703_v33 = vrot.slane %v702_v28, 4  ;;  %838 = vst [vmem:[%s758_s11 + $0xa0] sm:$0xff] (%p1267_p6), %v837_v1 }
 0x11a   : > { %v651_v19 = vadd.f32 %v650_v31, %v649_v26  ;;  %v724_v38 = vrot.slane %v723_v32, 4  ;;  %840 = vst [vmem:[%s758_s11 + $0xb0] sm:$0xff] (%p1267_p6), %v839_v24 }
 0x11b   : > { %v631_v37 = vrot.slane %v630_v53, 2  ;;  %v704_v22 = vadd.f32 %v703_v33, %v702_v28  ;;  %842 = vst [vmem:[%s758_s11 + $0xc0] sm:$0xff] (%p1267_p6), %v841_v2 }
 0x11c   : > { %v652_v40 = vrot.slane %v651_v19, 2  ;;  %v725_v41 = vadd.f32 %v724_v38, %v723_v32  ;;  %844 = vst [vmem:[%s758_s11 + $0xd0] sm:$0xff] (%p1267_p6), %v843_v3 }
 0x11d   : > { %v632_v39 = vadd.f32 %v631_v37, %v630_v53  ;;  %v705_v42 = vrot.slane %v704_v22, 2  ;;  %846 = vst [vmem:[%s758_s11 + $0xe0] sm:$0xff] (%p1267_p6), %v845_v4 }
 0x11e   : > { %v653_v44 = vadd.f32 %v652_v40, %v651_v19  ;;  %v726_v45 = vrot.slane %v725_v41, 2  ;;  %848 = vst [vmem:[%s758_s11 + $0xf0] sm:$0xff] (%p1267_p6), %v847_v29 }
 0x11f   : > { %v633_v46 = vrot.slane %v632_v39, 1  ;;  %v706_v47 = vadd.f32 %v705_v42, %v704_v22 }
 0x120   : > { %v654_v48 = vrot.slane %v653_v44, 1  ;;  %v727_v50 = vadd.f32 %v726_v45, %v725_v41 }
 0x121   : > { %v707_v51 = vrot.slane %v706_v47, 1  ;;  %v634_v11 = vadd.f32 %v633_v46, %v632_v39 }
 0x122   : > { %v728_v52 = vrot.slane %v727_v50, 1  ;;  %v655_v55 = vadd.f32 %v654_v48, %v653_v44 }
 0x123   : > { %v708_v54 = vadd.f32 %v707_v51, %v706_v47  ;;  %752 = sbr.rel (!%p1267_p6) target bundleno = 296 (0x128), region = 70 }
 0x124   : > { %v729_v12 = vadd.f32 %v728_v52, %v727_v50 }
 0x125   : > { %v733_v56 = vsel %vm732_vm0, %v634_v11, %v708_v54 }
 0x126   : > { %735 = vst [vmem:[%s322_s7] sm:$0xff] %v733_v56  ;;  %v734_v57 = vsel %vm732_vm0, %v655_v55, %v729_v12 }
 0x127   : > { %736 = vst [vmem:[%s322_s7 + $0x8] sm:$0xff] %v734_v57 }
 0x128 PF: > { %s14_s16 = sadd.s32 1, %s1210_s16   ;;  %s1499_s12 = smov %s1198_s13 }
 0x129   : > { %p11_p12 = scmp.ge.s32.totalorder %s14_s16, 4   ;;  %s1500_s13 = smov %s1272_s22 }
 0x12a   : > { %s1501_s14 = smov %s1206_s15  ;;  %s1502_s15 = smov %s1504_s17 }
 0x12b   :  { %13 = sbr.rel (!%p11_p12) target bundleno = 3 (0x3), region = 154 }

// kernel: bottleneck_forward.12
= control target key start
LH: loop header
LB: loop body
LE: loop exit
PB: predicated region body
PF: predicated region fallthrough
CT: control target
= control target key end

     0   :  { %s1138_s12 = smov 0   ;;  %s1140_s13 = smov 0   ;;  %s1364_s0 = inlined_call_operand.vmem [shape: bf16[128,64], index: 0, kind: input, shape index: {}]   ;;  %s1365_s1 = inlined_call_operand.vmem [shape: bf16[64,512], index: 1, kind: input, shape index: {}]   ;;  %s1366_s2 = inlined_call_operand.vmem [shape: bf16[128,512], index: 2, kind: output, shape index: {0}]   ;;  %s1367_s3 = inlined_call_operand.vmem [shape: f32[1,8,512], index: 3, kind: output, shape index: {1}]  }
   0x1   :  { %s1142_s14 = smov 0   ;;  %s1144_s15 = smov 0  }
   0x2   :  { %s1146_s16 = smov 0  }
   0x3 LB: > { %s23_s17 = sadd.s32 1, %s1112_s15  ;;  %s914_s18 = sadd.s32 4294967295, %s1116_s16   ;;  %s1116_s16 = sphi %s1146_s16, %s14_s16   ;;  %s1112_s15 = sphi %s1144_s15, %s1372_s15   ;;  %s1108_s14 = sphi %s1142_s14, %s1371_s14   ;;  %s1104_s13 = sphi %s1140_s13, %s1370_s13   ;;  %s1100_s12 = sphi %s1138_s12, %s1369_s12  }
   0x4   : > { %p24_p0 = scmp.ge.s32.totalorder %s23_s17, 2  ;;  %p66_p1 = scmp.ne.s32.totalorder %s1104_s13, %s1100_s12 }
   0x5   : > { %p67_p2 = scmp.eq.s32.totalorder %s1116_s16, 0  ;;  %p98_p4 = scmp.eq.s32.totalorder %s914_s18, 1 }
   0x6   : > { %s1374_s17 = smov (%p24_p0, %s23_s17), 0  ;;  %s59_s20 = sadd.s32 1, %s1104_s13 }
   0x7   : > { %p68_p3 = por %p67_p2, %p66_p1  ;;  %s56_s19 = ssub.s32 %s1112_s15, %s1374_s17 }
   0x8   : > { %p57_p5 = scmp.eq.s32.totalorder %s56_s19, 0  ;;  %p1173_p6 = por %p98_p4, %p66_p1 }
   0x9   : > { %p918_p7 = scmp.ge.s32.totalorder %s1116_s16, 2 }
   0xa   : > { %s1178_s22 = scalar_select %p57_p5, %s1104_s13, %s59_s20  }
   0xb   : > { %157 = sbr.rel (%p918_p7) target bundleno = 28 (0x1c), region = 20 }
  0x10   : > { %160 = sbr.rel (!%p68_p3) target bundleno = 28 (0x1c), region = 24  ;;  %s162_s23 = sand.u32 (%p68_p3), 1, %s1104_s13  }
  0x11   : > { %s1012_s24 = sshll.u32 (%p68_p3), %s1112_s15, 3  ;;  %s919_s25 = sshll.u32 (%p68_p3), %s162_s23, 6 }
  0x12   : > { %s167_s28 = scalar_lea.vmem (%p68_p3), %s1365_s1, %s1012_s24  ;;  %s164_s29 = scalar_lea.vmem (%p68_p3), [#allocation2], %s919_s25 }
  0x13   : > { %v210_v0 = vld [vmem:[%s167_s28] sm:$0xff] (%p68_p3)  ;;  %v212_v1 = vld [vmem:[%s167_s28 + $0x10] sm:$0xff] (%p68_p3) }
  0x14   : > { %v214_v2 = vld [vmem:[%s167_s28 + $0x20] sm:$0xff] (%p68_p3)  ;;  %211 = vst [vmem:[%s164_s29] sm:$0xff] (%p68_p3), %v210_v0  ;;  %v216_v3 = vld [vmem:[%s167_s28 + $0x30] sm:$0xff] (%p68_p3) }
  0x15   : > { %213 = vst [vmem:[%s164_s29 + $0x8] sm:$0xff] %v212_v1  ;;  %v218_v4 = vld [vmem:[%s167_s28 + $0x40] sm:$0xff]  ;;  %v220_v5 = vld [vmem:[%s167_s28 + $0x50] sm:$0xff] }
  0x16   : > { %215 = vst [vmem:[%s164_s29 + $0x10] sm:$0xff] %v214_v2  ;;  %v222_v6 = vld [vmem:[%s167_s28 + $0x60] sm:$0xff]  ;;  %v224_v7 = vld [vmem:[%s167_s28 + $0x70] sm:$0xff] }
  0x17   : > { %217 = vst [vmem:[%s164_s29 + $0x18] sm:$0xff] %v216_v3 }
  0x18   : > { %219 = vst [vmem:[%s164_s29 + $0x20] sm:$0xff] %v218_v4 }
  0x19   : > { %221 = vst [vmem:[%s164_s29 + $0x28] sm:$0xff] %v220_v5 }
  0x1a   : > { %223 = vst [vmem:[%s164_s29 + $0x30] sm:$0xff] %v222_v6 }
  0x1b   : > { %225 = vst [vmem:[%s164_s29 + $0x38] sm:$0xff] %v224_v7 }
  0x1c PF: > { %p922_p8 = scmp.ge.s32.totalorder %s1116_s16, 1  ;;  %p230_p9 = scmp.lt.s32.totalorder %s1116_s16, 3 }
  0x1e   : > { %p231_p10 = pnand %p922_p8, %p230_p9 }
  0x1f   : > { %s237_s30 = sand.u32 (!%p231_p10), 1, %s1100_s12   ;;  %s925_s12 = sshll.u32 (!%p231_p10), %s1108_s14, 1 }
  0x20   : > { %234 = sbr.rel (%p231_p10) target bundleno = 272 (0x110), region = 62  ;;  %s923_s4 = sshll.u32 (!%p231_p10), %s237_s30, 6 }
  0x21   : > { %s239_s5 = scalar_lea.vmem (!%p231_p10), [#allocation2], %s923_s4  ;;  %s924_s4 = sshll.u32 (!%p231_p10), %s237_s30, 7 }
  0x22   : > { %p285_p11 = scmp.lt.s32.totalorder (!%p231_p10), %s925_s12, 3 }
  0x25   : > { %v985_v8 = vld [vmem:[%s239_s5 + $0x30] sm:$0xf]  ;;  %v1028_v9 = vld [vmem:[%s239_s5 + $0x34] sm:$0xf0]  ;;  %v1027_v10 = vld [vmem:[%s239_s5 + $0x34] sm:$0xf] }
  0x26   : > { %v986_v11 = vor.u32 %v1028_v9, %v985_v8  ;;  %v987_v12 = vld [vmem:[%s239_s5 + $0x38] sm:$0xf0]  ;;  %v977_v13 = vld [vmem:[%s239_s5 + $0x20] sm:$0xf]  ;;  %v1026_v14 = vld [vmem:[%s239_s5 + $0x24] sm:$0xf0] }
  0x27   : > { %v990_v15 = vor.u32 %v1027_v10, %v987_v12  ;;  %v1025_v16 = vld [vmem:[%s239_s5 + $0x24] sm:$0xf]  ;;  %v979_v17 = vld [vmem:[%s239_s5 + $0x28] sm:$0xf0]  ;;  %v978_v18 = vor.u32 %v1026_v14, %v977_v13  ;;  %v969_v20 = vld [vmem:[%s239_s5 + $0x10] sm:$0xf] }
  0x28   : > { %426 = vmatpush.bf16.msra.mxu0 %v986_v11  ;;  %1030 = vmatpush.bf16.msra.mxu2 %v986_v11  ;;  %v982_v19 = vor.u32 %v1025_v16, %v979_v17  ;;  %v1024_v21 = vld [vmem:[%s239_s5 + $0x14] sm:$0xf0]  ;;  %v1023_v22 = vld [vmem:[%s239_s5 + $0x14] sm:$0xf]  ;;  %v971_v23 = vld [vmem:[%s239_s5 + $0x18] sm:$0xf0] }
  0x29   : > { %475 = vmatpush.bf16.msra.mxu1 %v990_v15  ;;  %1034 = vmatpush.bf16.msra.mxu3 %v990_v15  ;;  %v970_v24 = vor.u32 %v1024_v21, %v969_v20  ;;  %v974_v25 = vor.u32 %v1023_v22, %v971_v23  ;;  %v961_v26 = vld [vmem:[%s239_s5] sm:$0xf]  ;;  %v1022_v27 = vld [vmem:[%s239_s5 + $0x4] sm:$0xf0]  ;;  %v1021_v28 = vld [vmem:[%s239_s5 + $0x4] sm:$0xf] }
  0x2a   : > { %v963_v29 = vld [vmem:[%s239_s5 + $0x8] sm:$0xf0]  ;;  %v962_v30 = vor.u32 %v1022_v27, %v961_v26  ;;  %v1013_v32 = vld [vmem:[%s1364_s0] sm:$0xff]  ;;  %vm397_vm0 = vcmask 523264   ;;  %v1015_v36 = vld [vmem:[%s1364_s0 + $0x10] sm:$0xff]  ;;  %s1233_s5 = scalar_lea.vmem [#allocation3], %s924_s4 }
  0x2b   : > { %v966_v31 = vor.u32 %v1021_v28, %v963_v29  ;;  %v1017_v33 = vld [vmem:[%s1364_s0 + $0x20] sm:$0xff]  ;;  %v1014_v34 = vld [vmem:[%s1364_s0 + $0x8] sm:$0xff]  ;;  %v1019_v37 = vld [vmem:[%s1364_s0 + $0x30] sm:$0xff]  ;;  %s1376_s12 = smov (!%p285_p11, %s925_s12), 3  ;;  %s1029_s9 = sshll.u32 (%p1173_p6), %s1108_s14, 3 }
  0x2c   : > { %427 = vmatpush.bf16.msra.mxu0 %v978_v18  ;;  %1031 = vmatpush.bf16.msra.mxu2 %v978_v18  ;;  %v1018_v35 = vld [vmem:[%s1364_s0 + $0x28] sm:$0xff]  ;;  %v1016_v38 = vld [vmem:[%s1364_s0 + $0x18] sm:$0xff]  ;;  %s926_s30 = sshll.u32 %s1376_s12, 3  ;;  %s696_s18 = scalar_lea.vmem (%p1173_p6), %s1366_s2, %s1029_s9 }
  0x2d   : > { %476 = vmatpush.bf16.msra.mxu1 %v982_v19  ;;  %1035 = vmatpush.bf16.msra.mxu3 %v982_v19  ;;  %v1020_v39 = vld [vmem:[%s1364_s0 + $0x38] sm:$0xff]  ;;  %s290_s8 = scalar_lea.vmem %s1367_s3, %s926_s30 }
  0x30   : > { %428 = vmatpush.bf16.msra.mxu0 %v970_v24  ;;  %1032 = vmatpush.bf16.msra.mxu2 %v970_v24 }
  0x31   : > { %477 = vmatpush.bf16.msra.mxu1 %v974_v25  ;;  %1036 = vmatpush.bf16.msra.mxu3 %v974_v25 }
  0x34   : > { %429 = vmatpush.bf16.msra.mxu0 %v962_v30  ;;  %1033 = vmatpush.bf16.msra.mxu2 %v962_v30 }
  0x35   : > { %478 = vmatpush.bf16.msra.mxu1 %v966_v31  ;;  %1037 = vmatpush.bf16.msra.mxu3 %v966_v31 }
  0x37   : > { %991 = vmatmul.msk.bf16.vlgmr.msra.gmra.mxu0 %vm397_vm0, %v1013_v32  ;;  %995 = vmatmul.msk.bf16.vlgmr.msra.gmra.mxu2 %vm397_vm0, %v1017_v33 }
  0x38   : > { %999 = vmatmul.msk.bf16.vlgmr.msra.gmra.mxu1 %vm397_vm0, %v1013_v32  ;;  %1003 = vmatmul.msk.bf16.vlgmr.msra.gmra.mxu3 %vm397_vm0, %v1017_v33 }
  0x47   : > { %992 = vmatmul.msk.bf16.gmra.mxu0 %vm397_vm0, %v1014_v34  ;;  %996 = vmatmul.msk.bf16.gmra.mxu2 %vm397_vm0, %v1018_v35 }
  0x48   : > { %1000 = vmatmul.msk.bf16.gmra.mxu1 %vm397_vm0, %v1014_v34  ;;  %1004 = vmatmul.msk.bf16.gmra.mxu3 %vm397_vm0, %v1018_v35 }
  0x57   : > { %993 = vmatmul.msk.bf16.gmra.mxu0 %vm397_vm0, %v1015_v36  ;;  %997 = vmatmul.msk.bf16.gmra.mxu2 %vm397_vm0, %v1019_v37 }
  0x58   : > { %1001 = vmatmul.msk.bf16.gmra.mxu1 %vm397_vm0, %v1015_v36  ;;  %1005 = vmatmul.msk.bf16.gmra.mxu3 %vm397_vm0, %v1019_v37 }
  0x67   : > { %994 = vmatmul.msk.bf16.gmra.mxu0 %vm397_vm0, %v1016_v38  ;;  %998 = vmatmul.msk.bf16.gmra.mxu2 %vm397_vm0, %v1020_v39 }
  0x68   : > { %1002 = vmatmul.msk.bf16.gmra.mxu1 %vm397_vm0, %v1016_v38  ;;  %1006 = vmatmul.msk.bf16.gmra.mxu3 %vm397_vm0, %v1020_v39 }
  0xb4   : > { %v431_v40 = vpop.f32.mrf.mxu0 }
  0xb5   : > { %v480_v41 = vpop.f32.mrf.mxu1  ;;  %v594_v11 = vmul.f32 %v431_v40, %v431_v40 }
  0xb6   : > { %v520_v42 = vpack.c.bf16 %v480_v41, %v431_v40  ;;  %v595_v14 = vmul.f32 %v480_v41, %v480_v41 }
  0xb8   : > { %536 = vst [vmem:[%s1233_s5] sm:$0xff] %v520_v42 }
  0xba   : > { %v1236_v43 = vpop.f32.mrf.mxu2 }
  0xbb   : > { %v1238_v44 = vpop.f32.mrf.mxu3 }
  0xbc   : > { %v433_v45 = vpop.f32.mrf.mxu0  ;;  %v528_v46 = vpack.c.bf16 %v1238_v44, %v1236_v43 }
  0xbd   : > { %v482_v47 = vpop.f32.mrf.mxu1  ;;  %v596_v9 = vmul.f32 %v433_v45, %v433_v45  ;;  %v552_v12 = vadd.f32 %v433_v45, %v431_v40 }
  0xbe   : > { %v521_v48 = vpack.c.bf16 %v482_v47, %v433_v45  ;;  %544 = vst [vmem:[%s1233_s5 + $0x40] sm:$0xff] %v528_v46  ;;  %v597_v10 = vmul.f32 %v482_v47, %v482_v47  ;;  %v573_v15 = vadd.f32 %v482_v47, %v480_v41 }
  0xbf   : > { %v626_v18 = vadd.f32 %v596_v9, %v594_v11 }
  0xc0   : > { %537 = vst [vmem:[%s1233_s5 + $0x8] sm:$0xff] %v521_v48  ;;  %v647_v22 = vadd.f32 %v597_v10, %v595_v14 }
  0xc2   : > { %v1244_v49 = vpop.f32.mrf.mxu2 }
  0xc3   : > { %v1246_v50 = vpop.f32.mrf.mxu3 }
  0xc4   : > { %v436_v51 = vpop.f32.mrf.mxu0  ;;  %v529_v52 = vpack.c.bf16 %v1246_v50, %v1244_v49 }
  0xc5   : > { %v485_v53 = vpop.f32.mrf.mxu1  ;;  %v598_v13 = vmul.f32 %v436_v51, %v436_v51  ;;  %v553_v19 = vadd.f32 %v552_v12, %v436_v51  ;;  %v611_v12 = vmul.f32 %v1238_v44, %v1238_v44 }
  0xc6   : > { %v522_v54 = vpack.c.bf16 %v485_v53, %v436_v51  ;;  %545 = vst [vmem:[%s1233_s5 + $0x48] sm:$0xff] %v529_v52  ;;  %v599_v16 = vmul.f32 %v485_v53, %v485_v53  ;;  %v574_v23 = vadd.f32 %v573_v15, %v485_v53  ;;  %v612_v15 = vmul.f32 %v1244_v49, %v1244_v49 }
  0xc7   : > { %v627_v27 = vadd.f32 %v626_v18, %v598_v13 }
  0xc8   : > { %538 = vst [vmem:[%s1233_s5 + $0x10] sm:$0xff] %v522_v54  ;;  %v648_v31 = vadd.f32 %v647_v22, %v599_v16 }
  0xca   : > { %v1252_v55 = vpop.f32.mrf.mxu2 }
  0xcb   : > { %v1254_v56 = vpop.f32.mrf.mxu3 }
  0xcc   : > { %v438_v57 = vpop.f32.mrf.mxu0  ;;  %v530_v58 = vpack.c.bf16 %v1254_v56, %v1252_v55 }
  0xcd   : > { %v487_v59 = vpop.f32.mrf.mxu1  ;;  %v600_v20 = vmul.f32 %v438_v57, %v438_v57  ;;  %v554_v28 = vadd.f32 %v553_v19, %v438_v57  ;;  %v613_v19 = vmul.f32 %v1246_v50, %v1246_v50 }
  0xce   : > { %v523_v60 = vpack.c.bf16 %v487_v59, %v438_v57  ;;  %546 = vst [vmem:[%s1233_s5 + $0x50] sm:$0xff] %v530_v58  ;;  %v601_v24 = vmul.f32 %v487_v59, %v487_v59  ;;  %v575_v32 = vadd.f32 %v574_v23, %v487_v59  ;;  %v614_v23 = vmul.f32 %v1252_v55, %v1252_v55 }
  0xcf   : > { %v628_v35 = vadd.f32 %v627_v27, %v600_v20 }
  0xd0   : > { %539 = vst [vmem:[%s1233_s5 + $0x18] sm:$0xff] %v523_v60  ;;  %v649_v38 = vadd.f32 %v648_v31, %v601_v24 }
  0xd2   : > { %v1260_v61 = vpop.f32.mrf.mxu2 }
  0xd3   : > { %v1262_v62 = vpop.f32.mrf.mxu3 }
  0xd4   : > { %v441_v63 = vpop.f32.mrf.mxu0  ;;  %v531_v0 = vpack.c.bf16 %v1262_v62, %v1260_v61  ;;  %v617_v31 = vmul.f32 %v1262_v62, %v1262_v62 }
  0xd5   : > { %v490_v1 = vpop.f32.mrf.mxu1  ;;  %v602_v29 = vmul.f32 %v441_v63, %v441_v63  ;;  %v555_v36 = vadd.f32 %v554_v28, %v441_v63 }
  0xd6   : > { %v524_v2 = vpack.c.bf16 %v490_v1, %v441_v63  ;;  %547 = vst [vmem:[%s1233_s5 + $0x58] sm:$0xff] %v531_v0  ;;  %v603_v33 = vmul.f32 %v490_v1, %v490_v1  ;;  %v576_v39 = vadd.f32 %v575_v32, %v490_v1 }
  0xd7   : > { %v629_v41 = vadd.f32 %v628_v35, %v602_v29 }
  0xd8   : > { %540 = vst [vmem:[%s1233_s5 + $0x20] sm:$0xff] %v524_v2  ;;  %v650_v46 = vadd.f32 %v649_v38, %v603_v33 }
  0xda   : > { %v1268_v3 = vpop.f32.mrf.mxu2 }
  0xdb   : > { %v1270_v4 = vpop.f32.mrf.mxu3  ;;  %v618_v33 = vmul.f32 %v1268_v3, %v1268_v3 }
  0xdc   : > { %v443_v5 = vpop.f32.mrf.mxu0  ;;  %v532_v6 = vpack.c.bf16 %v1270_v4, %v1268_v3  ;;  %v619_v35 = vmul.f32 %v1270_v4, %v1270_v4 }
  0xdd   : > { %v492_v7 = vpop.f32.mrf.mxu1  ;;  %v604_v37 = vmul.f32 %v443_v5, %v443_v5  ;;  %v556_v42 = vadd.f32 %v555_v36, %v443_v5 }
  0xde   : > { %v525_v8 = vpack.c.bf16 %v492_v7, %v443_v5  ;;  %548 = vst [vmem:[%s1233_s5 + $0x60] sm:$0xff] %v532_v6  ;;  %v605_v40 = vmul.f32 %v492_v7, %v492_v7  ;;  %v577_v47 = vadd.f32 %v576_v39, %v492_v7  ;;  %v610_v7 = vmul.f32 %v1236_v43, %v1236_v43 }
  0xdf   : > { %v630_v52 = vadd.f32 %v629_v41, %v604_v37 }
  0xe0   : > { %541 = vst [vmem:[%s1233_s5 + $0x28] sm:$0xff] %v525_v8  ;;  %v651_v57 = vadd.f32 %v650_v46, %v605_v40 }
  0xe2   : > { %v1276_v17 = vpop.f32.mrf.mxu2 }
  0xe3   : > { %v1278_v21 = vpop.f32.mrf.mxu3  ;;  %v620_v37 = vmul.f32 %v1276_v17, %v1276_v17 }
  0xe4   : > { %v446_v25 = vpop.f32.mrf.mxu0  ;;  %v533_v26 = vpack.c.bf16 %v1278_v21, %v1276_v17  ;;  %v621_v39 = vmul.f32 %v1278_v21, %v1278_v21 }
  0xe5   : > { %v495_v30 = vpop.f32.mrf.mxu1  ;;  %v606_v45 = vmul.f32 %v446_v25, %v446_v25  ;;  %v557_v53 = vadd.f32 %v556_v42, %v446_v25 }
  0xe6   : > { %v526_v34 = vpack.c.bf16 %v495_v30, %v446_v25  ;;  %549 = vst [vmem:[%s1233_s5 + $0x68] sm:$0xff] %v533_v26  ;;  %v607_v48 = vmul.f32 %v495_v30, %v495_v30  ;;  %v578_v58 = vadd.f32 %v577_v47, %v495_v30  ;;  %v615_v26 = vmul.f32 %v1254_v56, %v1254_v56 }
  0xe7   : > { %v631_v63 = vadd.f32 %v630_v52, %v606_v45 }
  0xe8   : > { %542 = vst [vmem:[%s1233_s5 + $0x30] sm:$0xff] %v526_v34  ;;  %v652_v6 = vadd.f32 %v651_v57, %v607_v48 }
  0xea   : > { %v466_v51 = vpop.f32.mrf.mxu2 }
  0xeb   : > { %v515_v54 = vpop.f32.mrf.mxu3  ;;  %v622_v42 = vmul.f32 %v466_v51, %v466_v51 }
  0xec   : > { %v448_v59 = vpop.f32.mrf.mxu0  ;;  %v534_v60 = vpack.c.bf16 %v515_v54, %v466_v51  ;;  %v623_v47 = vmul.f32 %v515_v54, %v515_v54 }
  0xed   : > { %v558_v0 = vadd.f32 %v557_v53, %v448_v59  ;;  %v608_v1 = vmul.f32 %v448_v59, %v448_v59  ;;  %v497_v2 = vpop.f32.mrf.mxu1 }
  0xee   : > { %v527_v5 = vpack.c.bf16 %v497_v2, %v448_v59  ;;  %v579_v8 = vadd.f32 %v578_v58, %v497_v2  ;;  %v609_v9 = vmul.f32 %v497_v2, %v497_v2  ;;  %550 = vst [vmem:[%s1233_s5 + $0x70] sm:$0xff] %v534_v60  ;;  %v668_v2 = vlaneseq }
  0xef   : > { %v559_v10 = vadd.f32 %v558_v0, %v1236_v43  ;;  %v632_v11 = vadd.f32 %v631_v63, %v608_v1 }
  0xf0   : > { %543 = vst [vmem:[%s1233_s5 + $0x38] sm:$0xff] %v527_v5  ;;  %v580_v13 = vadd.f32 %v579_v8, %v1238_v44  ;;  %v653_v14 = vadd.f32 %v652_v6, %v609_v9 }
  0xf1   : > { %v560_v16 = vadd.f32 %v559_v10, %v1244_v49  ;;  %v633_v18 = vadd.f32 %v632_v11, %v610_v7  ;;  %v669_v11 = vshrl.u32 %v668_v2, 7 }
  0xf2   : > { %v581_v20 = vadd.f32 %v580_v13, %v1246_v50  ;;  %v654_v43 = vadd.f32 %v653_v14, %v611_v12  ;;  %v468_v22 = vpop.f32.mrf.mxu2  ;;  %v616_v50 = vmul.f32 %v1260_v61, %v1260_v61 }
  0xf3   : > { %v561_v44 = vadd.f32 %v560_v16, %v1252_v55  ;;  %v634_v24 = vadd.f32 %v633_v18, %v612_v15  ;;  %v517_v25 = vpop.f32.mrf.mxu3  ;;  %v624_v53 = vmul.f32 %v468_v22, %v468_v22  ;;  %vm670_vm1 = vcmp.lt.s32.totalorder %v669_v11, 4 }
  0xf4   : > { %v582_v49 = vadd.f32 %v581_v20, %v1254_v56  ;;  %v655_v27 = vadd.f32 %v654_v43, %v613_v19  ;;  %v535_v28 = vpack.c.bf16 %v517_v25, %v468_v22 }
  0xf5   : > { %v635_v29 = vadd.f32 %v634_v24, %v614_v23  ;;  %v562_v30 = vadd.f32 %v561_v44, %v1260_v61 }
  0xf6   : > { %v656_v32 = vadd.f32 %v655_v27, %v615_v26  ;;  %v583_v55 = vadd.f32 %v582_v49, %v1262_v62  ;;  %551 = vst [vmem:[%s1233_s5 + $0x78] sm:$0xff] %v535_v28  ;;  %v755_v26 = vld [vmem:[%s1233_s5] sm:$0xff] (%p1173_p6)  ;;  %v757_v49 = vld [vmem:[%s1233_s5 + $0x8] sm:$0xff] (%p1173_p6)  ;;  %v759_v27 = vld [vmem:[%s1233_s5 + $0x10] sm:$0xff] (%p1173_p6) }
  0xf7   : > { %v563_v56 = vadd.f32 %v562_v30, %v1268_v3  ;;  %v636_v34 = vadd.f32 %v635_v29, %v616_v50  ;;  %756 = vst [vmem:[%s696_s18] sm:$0xff] (%p1173_p6), %v755_v26  ;;  %v761_v28 = vld [vmem:[%s1233_s5 + $0x18] sm:$0xff] (%p1173_p6)  ;;  %v763_v50 = vld [vmem:[%s1233_s5 + $0x20] sm:$0xff] (%p1173_p6)  ;;  %v765_v29 = vld [vmem:[%s1233_s5 + $0x28] sm:$0xff] (%p1173_p6) }
  0xf8   : > { %v584_v36 = vadd.f32 %v583_v55, %v1270_v4  ;;  %v657_v61 = vadd.f32 %v656_v32, %v617_v31  ;;  %758 = vst [vmem:[%s696_s18 + $0x10] sm:$0xff] (%p1173_p6), %v757_v49  ;;  %v767_v30 = vld [vmem:[%s1233_s5 + $0x30] sm:$0xff] (%p1173_p6)  ;;  %v769_v31 = vld [vmem:[%s1233_s5 + $0x38] sm:$0xff] (%p1173_p6)  ;;  %v771_v32 = vld [vmem:[%s1233_s5 + $0x40] sm:$0xff] (%p1173_p6) }
  0xf9   : > { %v564_v38 = vadd.f32 %v563_v56, %v1276_v17  ;;  %v637_v62 = vadd.f32 %v636_v34, %v618_v33  ;;  %v625_v17 = vmul.f32 %v517_v25, %v517_v25  ;;  %760 = vst [vmem:[%s696_s18 + $0x20] sm:$0xff] (%p1173_p6), %v759_v27  ;;  %v773_v55 = vld [vmem:[%s1233_s5 + $0x48] sm:$0xff] (%p1173_p6)  ;;  %v775_v33 = vld [vmem:[%s1233_s5 + $0x50] sm:$0xff] (%p1173_p6)  ;;  %v777_v56 = vld [vmem:[%s1233_s5 + $0x58] sm:$0xff] (%p1173_p6) }
  0xfa   : > { %v585_v40 = vadd.f32 %v584_v36, %v1278_v21  ;;  %v658_v3 = vadd.f32 %v657_v61, %v619_v35  ;;  %762 = vst [vmem:[%s696_s18 + $0x30] sm:$0xff] (%p1173_p6), %v761_v28  ;;  %v779_v34 = vld [vmem:[%s1233_s5 + $0x60] sm:$0xff] (%p1173_p6)  ;;  %v781_v35 = vld [vmem:[%s1233_s5 + $0x68] sm:$0xff] (%p1173_p6)  ;;  %v783_v36 = vld [vmem:[%s1233_s5 + $0x70] sm:$0xff] (%p1173_p6) }
  0xfb   : > { %v565_v41 = vadd.f32 %v564_v38, %v466_v51  ;;  %v638_v45 = vadd.f32 %v637_v62, %v620_v37  ;;  %764 = vst [vmem:[%s696_s18 + $0x40] sm:$0xff] (%p1173_p6), %v763_v50 }
  0xfc   : > { %v586_v46 = vadd.f32 %v585_v40, %v515_v54  ;;  %v659_v48 = vadd.f32 %v658_v3, %v621_v39  ;;  %766 = vst [vmem:[%s696_s18 + $0x50] sm:$0xff] (%p1173_p6), %v765_v29 }
  0xfd   : > { %v639_v4 = vadd.f32 %v638_v45, %v622_v42  ;;  %v566_v52 = vadd.f32 %v565_v41, %v468_v22  ;;  %768 = vst [vmem:[%s696_s18 + $0x60] sm:$0xff] (%p1173_p6), %v767_v30  ;;  %v785_v61 = vld [vmem:[%s1233_s5 + $0x78] sm:$0xff] (%p1173_p6) }
  0xfe   : > { %v660_v57 = vadd.f32 %v659_v48, %v623_v47  ;;  %v587_v58 = vadd.f32 %v586_v46, %v517_v25  ;;  %770 = vst [vmem:[%s696_s18 + $0x70] sm:$0xff] (%p1173_p6), %v769_v31 }
  0xff   : > { %v567_v59 = vrot.slane %v566_v52, 4  ;;  %v640_v60 = vadd.f32 %v639_v4, %v624_v53  ;;  %772 = vst [vmem:[%s696_s18 + $0x80] sm:$0xff] (%p1173_p6), %v771_v32 }
 0x100   : > { %v588_v63 = vrot.slane %v587_v58, 4  ;;  %v661_v0 = vadd.f32 %v660_v57, %v625_v17  ;;  %774 = vst [vmem:[%s696_s18 + $0x90] sm:$0xff] (%p1173_p6), %v773_v55 }
 0x101   : > { %v568_v21 = vadd.f32 %v567_v59, %v566_v52  ;;  %v641_v1 = vrot.slane %v640_v60, 4  ;;  %776 = vst [vmem:[%s696_s18 + $0xa0] sm:$0xff] (%p1173_p6), %v775_v33 }
 0x102   : > { %v589_v51 = vadd.f32 %v588_v63, %v587_v58  ;;  %v662_v6 = vrot.slane %v661_v0, 4  ;;  %778 = vst [vmem:[%s696_s18 + $0xb0] sm:$0xff] (%p1173_p6), %v777_v56 }
 0x103   : > { %v569_v5 = vrot.slane %v568_v21, 2  ;;  %v642_v54 = vadd.f32 %v641_v1, %v640_v60  ;;  %780 = vst [vmem:[%s696_s18 + $0xc0] sm:$0xff] (%p1173_p6), %v779_v34 }
 0x104   : > { %v590_v8 = vrot.slane %v589_v51, 2  ;;  %v663_v9 = vadd.f32 %v662_v6, %v661_v0  ;;  %782 = vst [vmem:[%s696_s18 + $0xd0] sm:$0xff] (%p1173_p6), %v781_v35 }
 0x105   : > { %v570_v7 = vadd.f32 %v569_v5, %v568_v21  ;;  %v643_v10 = vrot.slane %v642_v54, 2  ;;  %784 = vst [vmem:[%s696_s18 + $0xe0] sm:$0xff] (%p1173_p6), %v783_v36 }
 0x106   : > { %v591_v12 = vadd.f32 %v590_v8, %v589_v51  ;;  %v664_v13 = vrot.slane %v663_v9, 2  ;;  %786 = vst [vmem:[%s696_s18 + $0xf0] sm:$0xff] (%p1173_p6), %v785_v61 }
 0x107   : > { %v571_v14 = vrot.slane %v570_v7, 1  ;;  %v644_v15 = vadd.f32 %v643_v10, %v642_v54 }
 0x108   : > { %v592_v16 = vrot.slane %v591_v12, 1  ;;  %v665_v18 = vadd.f32 %v664_v13, %v663_v9 }
 0x109   : > { %v645_v19 = vrot.slane %v644_v15, 1  ;;  %v572_v43 = vadd.f32 %v571_v14, %v570_v7 }
 0x10a   : > { %v666_v20 = vrot.slane %v665_v18, 1  ;;  %v593_v23 = vadd.f32 %v592_v16, %v591_v12 }
 0x10b   : > { %v646_v22 = vadd.f32 %v645_v19, %v644_v15  ;;  %690 = sbr.rel (!%p1173_p6) target bundleno = 272 (0x110), region = 70 }
 0x10c   : > { %v667_v44 = vadd.f32 %v666_v20, %v665_v18 }
 0x10d   : > { %v671_v24 = vsel %vm670_vm1, %v572_v43, %v646_v22 }
 0x10e   : > { %673 = vst [vmem:[%s290_s8] sm:$0xff] %v671_v24  ;;  %v672_v25 = vsel %vm670_vm1, %v593_v23, %v667_v44 }
 0x10f   : > { %674 = vst [vmem:[%s290_s8 + $0x8] sm:$0xff] %v672_v25 }
 0x110 PF: > { %s14_s16 = sadd.s32 1, %s1116_s16   ;;  %s1369_s12 = smov %s1104_s13 }
 0x111   : > { %p11_p12 = scmp.ge.s32.totalorder %s14_s16, 4   ;;  %s1370_s13 = smov %s1178_s22 }
 0x112   : > { %s1371_s14 = smov %s1112_s15  ;;  %s1372_s15 = smov %s1374_s17 }
 0x113   :  { %13 = sbr.rel (!%p11_p12) target bundleno = 3 (0x3), region = 154 }

// kernel: bottleneck_forward.13
= control target key start
LH: loop header
LB: loop body
LE: loop exit
PB: predicated region body
PF: predicated region fallthrough
CT: control target
= control target key end

     0   :  { %s1744_s0 = inlined_call_operand.vmem [shape: bf16[128,512], index: 0, kind: input, shape index: {}]   ;;  %s1745_s1 = inlined_call_operand.vmem [shape: f32[1,512], index: 1, kind: input, shape index: {}]   ;;  %s1746_s2 = inlined_call_operand.vmem [shape: f32[1,512], index: 2, kind: input, shape index: {}]   ;;  %s1747_s3 = inlined_call_operand.vmem [shape: bf16[128,512], index: 3, kind: input, shape index: {}]   ;;  %s1748_s4 = inlined_call_operand.vmem [shape: f32[1,512], index: 4, kind: input, shape index: {}]   ;;  %s1749_s5 = inlined_call_operand.vmem [shape: f32[1,512], index: 5, kind: input, shape index: {}]   ;;  %s1750_s6 = inlined_call_operand.hbm [shape: f32[128,512], index: 6, kind: output, shape index: {}]  }
   0x1   :  { %1751 = sst [smem:[#allocation7_spill]] %s1744_s0 }
   0x2   :  { %11 = vsyncpa [#allocation5], 0 }
   0x3   :  { %13 = vsyncpa [#allocation5 + $0x1], 0  ;;  %s1304_s21 = smov 0   ;;  %s1306_s22 = smov 0  }
   0x4   :  { %s1308_s23 = smov 0   ;;  %s1310_s24 = smov 0  }
   0x5   :  { %s1312_s25 = smov 0   ;;  %s1314_s26 = smov 0  }
   0x6 LB: > { %s1102_s27 = sadd.s32 4294967295, %s1264_s26   ;;  %s1103_s28 = sadd.s32 4294967294, %s1264_s26   ;;  %s1264_s26 = sphi %s1314_s26, %s19_s26   ;;  %s1260_s25 = sphi %s1312_s25, %s1760_s25   ;;  %s1256_s24 = sphi %s1310_s24, %s1759_s24   ;;  %s1252_s23 = sphi %s1308_s23, %s1758_s23   ;;  %s1248_s22 = sphi %s1306_s22, %s1757_s22   ;;  %s1244_s21 = sphi %s1304_s21, %s1756_s21  }
   0x7   : > { %s28_s29 = sadd.s32 1, %s1260_s25  ;;  %s40_s30 = sadd.s32 1, %s1252_s23 }
   0x8   : > { %p29_p0 = scmp.ge.s32.totalorder %s28_s29, 2  ;;  %p47_p1 = scmp.ne.s32.totalorder %s1252_s23, %s1248_s22 }
   0x9   : > { %p48_p2 = scmp.eq.s32.totalorder %s1264_s26, 0  ;;  %p211_p3 = scmp.eq.s32.totalorder %s1102_s27, 1 }
   0xa   : > { %s1762_s29 = smov (%p29_p0, %s28_s29), 0  ;;  %p216_p6 = scmp.ne.s32.totalorder %s1248_s22, %s1244_s21 }
   0xb   : > { %p1343_p4 = por %p48_p2, %p47_p1  ;;  %p1347_p5 = por %p211_p3, %p47_p1 }
   0xc   : > { %s36_s9 = ssub.s32 %s1260_s25, %s1762_s29  ;;  %p217_p8 = scmp.eq.s32.totalorder %s1103_s28, 1 }
   0xd   : > { %p38_p7 = scmp.eq.s32.totalorder %s36_s9, 0  ;;  %p1105_p10 = scmp.ge.s32.totalorder %s1264_s26, 2 }
   0xe   : > { %p1358_p9 = por %p217_p8, %p216_p6 }
   0xf   : > { %s1356_s10 = scalar_select %p38_p7, %s1252_s23, %s40_s30  }
  0x10   : > { %233 = sbr.rel (%p1105_p10) target bundleno = 67 (0x43), region = 16 }
  0x15   : > { %236 = sbr.rel (!%p1343_p4) target bundleno = 47 (0x2f), region = 20  ;;  %s238_s12 = sand.u32 (%p1343_p4), 1, %s1252_s23  }
  0x16   : > { %s1125_s13 = sshll.u32 (%p1343_p4), %s1260_s25, 3  ;;  %s1106_s14 = sshll.u32 (%p1343_p4), %s238_s12, 7 }
  0x17   : > { %s1755_s0 = sld [smem:[#allocation7_spill]] (%p1343_p4)  ;;  %s240_s18 = scalar_lea.vmem (%p1343_p4), [#allocation2], %s1106_s14 }
  0x1d   : > { %s1372_s17 = scalar_lea.vmem %s1755_s0, %s1125_s13 }
  0x1e   : > { %v305_v0 = vld [vmem:[%s1372_s17] sm:$0xff]  ;;  %v307_v1 = vld [vmem:[%s1372_s17 + $0x10] sm:$0xff] }
  0x1f   : > { %v309_v2 = vld [vmem:[%s1372_s17 + $0x20] sm:$0xff]  ;;  %306 = vst [vmem:[%s240_s18] sm:$0xff] %v305_v0  ;;  %v311_v3 = vld [vmem:[%s1372_s17 + $0x30] sm:$0xff] }
  0x20   : > { %308 = vst [vmem:[%s240_s18 + $0x8] sm:$0xff] %v307_v1  ;;  %v313_v4 = vld [vmem:[%s1372_s17 + $0x40] sm:$0xff]  ;;  %v315_v5 = vld [vmem:[%s1372_s17 + $0x50] sm:$0xff] }
  0x21   : > { %310 = vst [vmem:[%s240_s18 + $0x10] sm:$0xff] %v309_v2  ;;  %v317_v6 = vld [vmem:[%s1372_s17 + $0x60] sm:$0xff]  ;;  %v319_v7 = vld [vmem:[%s1372_s17 + $0x70] sm:$0xff] }
  0x22   : > { %312 = vst [vmem:[%s240_s18 + $0x18] sm:$0xff] %v311_v3  ;;  %v321_v8 = vld [vmem:[%s1372_s17 + $0x80] sm:$0xff]  ;;  %v323_v9 = vld [vmem:[%s1372_s17 + $0x90] sm:$0xff] }
  0x23   : > { %314 = vst [vmem:[%s240_s18 + $0x20] sm:$0xff] %v313_v4  ;;  %v325_v10 = vld [vmem:[%s1372_s17 + $0xa0] sm:$0xff]  ;;  %v327_v11 = vld [vmem:[%s1372_s17 + $0xb0] sm:$0xff] }
  0x24   : > { %316 = vst [vmem:[%s240_s18 + $0x28] sm:$0xff] %v315_v5  ;;  %v329_v12 = vld [vmem:[%s1372_s17 + $0xc0] sm:$0xff]  ;;  %v331_v13 = vld [vmem:[%s1372_s17 + $0xd0] sm:$0xff] }
  0x25   : > { %318 = vst [vmem:[%s240_s18 + $0x30] sm:$0xff] %v317_v6  ;;  %v333_v14 = vld [vmem:[%s1372_s17 + $0xe0] sm:$0xff]  ;;  %v335_v15 = vld [vmem:[%s1372_s17 + $0xf0] sm:$0xff] }
  0x26   : > { %320 = vst [vmem:[%s240_s18 + $0x38] sm:$0xff] %v319_v7 }
  0x27   : > { %322 = vst [vmem:[%s240_s18 + $0x40] sm:$0xff] %v321_v8 }
  0x28   : > { %324 = vst [vmem:[%s240_s18 + $0x48] sm:$0xff] %v323_v9 }
  0x29   : > { %326 = vst [vmem:[%s240_s18 + $0x50] sm:$0xff] %v325_v10 }
  0x2a   : > { %328 = vst [vmem:[%s240_s18 + $0x58] sm:$0xff] %v327_v11 }
  0x2b   : > { %330 = vst [vmem:[%s240_s18 + $0x60] sm:$0xff] %v329_v12 }
  0x2c   : > { %332 = vst [vmem:[%s240_s18 + $0x68] sm:$0xff] %v331_v13 }
  0x2d   : > { %334 = vst [vmem:[%s240_s18 + $0x70] sm:$0xff] %v333_v14 }
  0x2e   : > { %336 = vst [vmem:[%s240_s18 + $0x78] sm:$0xff] %v335_v15 }
  0x2f PF: > { %358 = sbr.rel (!%p1343_p4) target bundleno = 67 (0x43), region = 66  ;;  %s360_s19 = sand.u32 (%p1343_p4), 1, %s1252_s23  }
  0x30   : > { %s1126_s20 = sshll.u32 (%p1343_p4), %s1260_s25, 3  ;;  %s1109_s27 = sshll.u32 (%p1343_p4), %s360_s19, 7 }
  0x31   : > { %s1397_s9 = scalar_lea.vmem (%p1343_p4), %s1747_s3, %s1126_s20  ;;  %s362_s7 = scalar_lea.vmem (%p1343_p4), [#allocation3], %s1109_s27 }
  0x32   : > { %v427_v16 = vld [vmem:[%s1397_s9] sm:$0xff] (%p1343_p4)  ;;  %v429_v17 = vld [vmem:[%s1397_s9 + $0x10] sm:$0xff] (%p1343_p4) }
  0x33   : > { %v431_v18 = vld [vmem:[%s1397_s9 + $0x20] sm:$0xff] (%p1343_p4)  ;;  %428 = vst [vmem:[%s362_s7] sm:$0xff] (%p1343_p4), %v427_v16  ;;  %v433_v19 = vld [vmem:[%s1397_s9 + $0x30] sm:$0xff] (%p1343_p4) }
  0x34   : > { %430 = vst [vmem:[%s362_s7 + $0x8] sm:$0xff] %v429_v17  ;;  %v435_v20 = vld [vmem:[%s1397_s9 + $0x40] sm:$0xff]  ;;  %v437_v21 = vld [vmem:[%s1397_s9 + $0x50] sm:$0xff] }
  0x35   : > { %432 = vst [vmem:[%s362_s7 + $0x10] sm:$0xff] %v431_v18  ;;  %v439_v22 = vld [vmem:[%s1397_s9 + $0x60] sm:$0xff]  ;;  %v441_v23 = vld [vmem:[%s1397_s9 + $0x70] sm:$0xff] }
  0x36   : > { %434 = vst [vmem:[%s362_s7 + $0x18] sm:$0xff] %v433_v19  ;;  %v443_v24 = vld [vmem:[%s1397_s9 + $0x80] sm:$0xff]  ;;  %v445_v25 = vld [vmem:[%s1397_s9 + $0x90] sm:$0xff] }
  0x37   : > { %436 = vst [vmem:[%s362_s7 + $0x20] sm:$0xff] %v435_v20  ;;  %v447_v26 = vld [vmem:[%s1397_s9 + $0xa0] sm:$0xff]  ;;  %v449_v27 = vld [vmem:[%s1397_s9 + $0xb0] sm:$0xff] }
  0x38   : > { %438 = vst [vmem:[%s362_s7 + $0x28] sm:$0xff] %v437_v21  ;;  %v451_v28 = vld [vmem:[%s1397_s9 + $0xc0] sm:$0xff]  ;;  %v453_v29 = vld [vmem:[%s1397_s9 + $0xd0] sm:$0xff] }
  0x39   : > { %440 = vst [vmem:[%s362_s7 + $0x30] sm:$0xff] %v439_v22  ;;  %v455_v30 = vld [vmem:[%s1397_s9 + $0xe0] sm:$0xff]  ;;  %v457_v31 = vld [vmem:[%s1397_s9 + $0xf0] sm:$0xff] }
  0x3a   : > { %442 = vst [vmem:[%s362_s7 + $0x38] sm:$0xff] %v441_v23 }
  0x3b   : > { %444 = vst [vmem:[%s362_s7 + $0x40] sm:$0xff] %v443_v24 }
  0x3c   : > { %446 = vst [vmem:[%s362_s7 + $0x48] sm:$0xff] %v445_v25 }
  0x3d   : > { %448 = vst [vmem:[%s362_s7 + $0x50] sm:$0xff] %v447_v26 }
  0x3e   : > { %450 = vst [vmem:[%s362_s7 + $0x58] sm:$0xff] %v449_v27 }
  0x3f   : > { %452 = vst [vmem:[%s362_s7 + $0x60] sm:$0xff] %v451_v28 }
  0x40   : > { %454 = vst [vmem:[%s362_s7 + $0x68] sm:$0xff] %v453_v29 }
  0x41   : > { %456 = vst [vmem:[%s362_s7 + $0x70] sm:$0xff] %v455_v30 }
  0x42   : > { %458 = vst [vmem:[%s362_s7 + $0x78] sm:$0xff] %v457_v31 }
  0x43 PF: > { %p1112_p11 = scmp.ge.s32.totalorder %s1264_s26, 1  ;;  %p479_p12 = scmp.lt.s32.totalorder %s1264_s26, 3 }
  0x45   : > { %p480_p13 = pnand %p1112_p11, %p479_p12 }
  0x46   : > { %s1418_s12 = sand.u32 (!%p480_p13), 1, %s1248_s22   ;;  %s1116_s13 = sshll.u32 (!%p480_p13), %s1256_s24, 1 }
  0x47   : > { %483 = sbr.rel (%p480_p13) target bundleno = 162 (0xa2), region = 112  ;;  %s1113_s14 = sshll.u32 (!%p480_p13), %s1418_s12, 7 }
  0x48   : > { %p545_p0 = scmp.lt.s32.totalorder (!%p480_p13), %s1116_s13, 3  ;;  %s1422_s15 = scalar_lea.vmem (!%p480_p13), [#allocation2], %s1113_s14 }
  0x49   : > { %s1425_s16 = scalar_lea.vmem (!%p480_p13), [#allocation3], %s1113_s14  ;;  %s1115_s0 = sshll.u32 (!%p480_p13), %s1418_s12, 8 }
  0x4a   : > { %s945_s27 = scalar_lea.sflag (!%p480_p13), [#allocation5], %s1418_s12  ;;  %s1206_s14 = scalar_lea.hbm (!%p480_p13), %s1750_s6, 512 }
  0x4c   : > { %v568_v32 = vld [vmem:[%s1422_s15] sm:$0xff]  ;;  %v569_v34 = vld [vmem:[%s1422_s15 + $0x8] sm:$0xff]  ;;  %v1431_v40 = vld [vmem:[%s1422_s15 + $0x10] sm:$0xff]  ;;  %s1764_s13 = smov (!%p545_p0, %s1116_s13), 3 }
  0x4d   : > { %v724_v33 = vld [vmem:[%s1425_s16] sm:$0xff]  ;;  %v584_v35 = vunpack.c.l.bf16 %v568_v32  ;;  %v585_v37 = vunpack.c.h.bf16 %v568_v32  ;;  %v725_v39 = vld [vmem:[%s1425_s16 + $0x8] sm:$0xff]  ;;  %v1434_v41 = vld [vmem:[%s1425_s16 + $0x10] sm:$0xff]  ;;  %v586_v42 = vunpack.c.l.bf16 %v569_v34  ;;  %v587_v44 = vunpack.c.h.bf16 %v569_v34  ;;  %s547_s19 = scalar_lea.vmem %s1745_s1, %s1764_s13  ;;  %s552_s28 = scalar_lea.vmem %s1746_s2, %s1764_s13 }
  0x4e   : > { %v740_v36 = vunpack.c.l.bf16 %v724_v33  ;;  %v741_v38 = vunpack.c.h.bf16 %v724_v33  ;;  %v742_v43 = vunpack.c.l.bf16 %v725_v39  ;;  %v743_v45 = vunpack.c.h.bf16 %v725_v39  ;;  %v1439_v46 = vld [vmem:[%s1422_s15 + $0x18] sm:$0xff]  ;;  %v1445_v48 = vld [vmem:[%s1422_s15 + $0x20] sm:$0xff]  ;;  %v1455_v54 = vld [vmem:[%s1422_s15 + $0x28] sm:$0xff]  ;;  %s559_s7 = scalar_lea.vmem %s1748_s4, %s1764_s13  ;;  %s564_s17 = scalar_lea.vmem %s1749_s5, %s1764_s13 }
  0x4f   : > { %v1442_v47 = vld [vmem:[%s1425_s16 + $0x18] sm:$0xff]  ;;  %v588_v49 = vunpack.c.l.bf16 %v1431_v40  ;;  %v744_v50 = vunpack.c.l.bf16 %v1434_v41  ;;  %v589_v51 = vunpack.c.h.bf16 %v1431_v40  ;;  %v745_v52 = vunpack.c.h.bf16 %v1434_v41  ;;  %v1452_v53 = vld [vmem:[%s1425_s16 + $0x20] sm:$0xff]  ;;  %v1458_v55 = vld [vmem:[%s1425_s16 + $0x28] sm:$0xff]  ;;  %s1528_s13 = scalar_lea.vmem [#allocation4], %s1115_s0 }
  0x50   : > { %v590_v56 = vunpack.c.l.bf16 %v1439_v46  ;;  %v746_v57 = vunpack.c.l.bf16 %v1442_v47  ;;  %v591_v58 = vunpack.c.h.bf16 %v1439_v46  ;;  %v747_v59 = vunpack.c.h.bf16 %v1442_v47  ;;  %v616_v60 = vld [vmem:[%s547_s19] sm:$0x3]  ;;  %s960_s19 = sshll.u32 %s1528_s13, 4  ;;  %s961_s19 = int_to_ptr.vmem [resolvable:$true] %s960_s19 }
  0x51   : > { %v654_v61 = vld [vmem:[%s552_s28] sm:$0x3]  ;;  %v592_v62 = vunpack.c.l.bf16 %v1445_v48  ;;  %v748_v63 = vunpack.c.l.bf16 %v1452_v53  ;;  %v593_v0 = vunpack.c.h.bf16 %v1445_v48  ;;  %v749_v1 = vunpack.c.h.bf16 %v1452_v53 }
  0x52   : > { %v1484_v2 = vperm.slane %v616_v60, 0  ;;  %v1486_v3 = vperm.slane %v654_v61, 0  ;;  %v772_v4 = vld [vmem:[%s559_s7] sm:$0x3]  ;;  %v594_v6 = vunpack.c.l.bf16 %v1455_v54  ;;  %v750_v7 = vunpack.c.l.bf16 %v1458_v55 }
  0x53   : > { %v810_v5 = vld [vmem:[%s564_s17] sm:$0x3]  ;;  %v1490_v8 = vperm.slane %v772_v4, 0  ;;  %v1494_v10 = vperm.slane %v616_v60, 1  ;;  %v1496_v11 = vperm.slane %v654_v61, 1  ;;  %v1499_v13 = vperm.slane %v772_v4, 1 }
  0x54   : > { %v1492_v9 = vperm.slane %v810_v5, 0  ;;  %v622_v12 = vmul.f32 %v1484_v2, %v584_v35  ;;  %v1501_v14 = vperm.slane %v810_v5, 1  ;;  %v624_v15 = vmul.f32 %v1484_v2, %v586_v42 }
  0x55   : > { %v778_v16 = vmul.f32 %v1490_v8, %v740_v36  ;;  %v623_v17 = vmul.f32 %v1494_v10, %v585_v37  ;;  %v780_v18 = vmul.f32 %v1490_v8, %v742_v43  ;;  %v625_v19 = vmul.f32 %v1494_v10, %v587_v44 }
  0x56   : > { %v660_v20 = vadd.f32 %v1486_v3, %v622_v12  ;;  %v779_v21 = vmul.f32 %v1499_v13, %v741_v38  ;;  %v662_v22 = vadd.f32 %v1486_v3, %v624_v15  ;;  %v781_v23 = vmul.f32 %v1499_v13, %v743_v45 }
  0x57   : > { %v816_v24 = vadd.f32 %v1492_v9, %v778_v16  ;;  %v661_v25 = vadd.f32 %v1496_v11, %v623_v17  ;;  %v818_v26 = vadd.f32 %v1492_v9, %v780_v18  ;;  %v663_v27 = vadd.f32 %v1496_v11, %v625_v19 }
  0x58   : > { %v692_v28 = vmax.f32 %v660_v20, 0.0  ;;  %v817_v29 = vadd.f32 %v1501_v14, %v779_v21  ;;  %v694_v30 = vmax.f32 %v662_v22, 0.0  ;;  %v819_v31 = vadd.f32 %v1501_v14, %v781_v23 }
  0x59   : > { %v693_v32 = vmax.f32 %v661_v25, 0.0  ;;  %v695_v33 = vmax.f32 %v663_v27, 0.0  ;;  %v626_v34 = vmul.f32 %v1484_v2, %v588_v49  ;;  %v782_v35 = vmul.f32 %v1490_v8, %v744_v50 }
  0x5a   : > { %v848_v36 = vadd.f32 %v816_v24, %v692_v28  ;;  %v850_v37 = vadd.f32 %v818_v26, %v694_v30  ;;  %v627_v38 = vmul.f32 %v1494_v10, %v589_v51  ;;  %v783_v39 = vmul.f32 %v1499_v13, %v745_v52  ;;  %v574_v28 = vld [vmem:[%s1422_s15 + $0x30] sm:$0xff] }
  0x5b   : > { %v849_v40 = vadd.f32 %v817_v29, %v693_v32  ;;  %v851_v41 = vadd.f32 %v819_v31, %v695_v33  ;;  %v664_v42 = vadd.f32 %v1486_v3, %v626_v34  ;;  %v820_v43 = vadd.f32 %v1492_v9, %v782_v35  ;;  %v730_v29 = vld [vmem:[%s1425_s16 + $0x30] sm:$0xff] }
  0x5c   : > { %v880_v44 = vmax.f32 %v848_v36, 0.0  ;;  %v882_v45 = vmax.f32 %v850_v37, 0.0  ;;  %v665_v60 = vadd.f32 %v1496_v11, %v627_v38  ;;  %v821_v49 = vadd.f32 %v1501_v14, %v783_v39 }
  0x5d   : > { %v881_v61 = vmax.f32 %v849_v40, 0.0  ;;  %v883_v50 = vmax.f32 %v851_v41, 0.0  ;;  %v696_v4 = vmax.f32 %v664_v42, 0.0  ;;  %v628_v5 = vmul.f32 %v1484_v2, %v590_v56 }
  0x5e   : > { %912 = vst [vmem:[%s1528_s13] sm:$0xff] %v880_v44  ;;  %v697_v51 = vmax.f32 %v665_v60, 0.0  ;;  %v784_v52 = vmul.f32 %v1490_v8, %v746_v57  ;;  %v629_v12 = vmul.f32 %v1494_v10, %v591_v58  ;;  %v785_v56 = vmul.f32 %v1499_v13, %v747_v59  ;;  %v575_v60 = vld [vmem:[%s1422_s15 + $0x38] sm:$0xff] }
  0x5f   : > { %913 = vst [vmem:[%s1528_s13 + $0x8] sm:$0xff] %v881_v61  ;;  %v852_v15 = vadd.f32 %v820_v43, %v696_v4  ;;  %v666_v16 = vadd.f32 %v1486_v3, %v628_v5  ;;  %v630_v17 = vmul.f32 %v1484_v2, %v592_v62  ;;  %v786_v57 = vmul.f32 %v1490_v8, %v748_v63 }
  0x60   : > { %914 = vst [vmem:[%s1528_s13 + $0x10] sm:$0xff] %v882_v45  ;;  %v853_v46 = vadd.f32 %v821_v49, %v697_v51  ;;  %v822_v58 = vadd.f32 %v1492_v9, %v784_v52  ;;  %v667_v47 = vadd.f32 %v1496_v11, %v629_v12  ;;  %v823_v59 = vadd.f32 %v1501_v14, %v785_v56  ;;  %v731_v49 = vld [vmem:[%s1425_s16 + $0x38] sm:$0xff] }
  0x61   : > { %915 = vst [vmem:[%s1528_s13 + $0x18] sm:$0xff] %v883_v50  ;;  %v884_v18 = vmax.f32 %v852_v15, 0.0  ;;  %v698_v19 = vmax.f32 %v666_v16, 0.0  ;;  %v668_v20 = vadd.f32 %v1486_v3, %v630_v17  ;;  %v824_v62 = vadd.f32 %v1492_v9, %v786_v57 }
  0x62   : > { %v885_v21 = vmax.f32 %v853_v46, 0.0  ;;  %v699_v63 = vmax.f32 %v667_v47, 0.0  ;;  %v631_v22 = vmul.f32 %v1494_v10, %v593_v0  ;;  %v787_v23 = vmul.f32 %v1499_v13, %v749_v1  ;;  %v576_v46 = vld [vmem:[%s1422_s15 + $0x40] sm:$0xff] }
  0x63   : > { %916 = vst [vmem:[%s1528_s13 + $0x20] sm:$0xff] %v884_v18  ;;  %v854_v24 = vadd.f32 %v822_v58, %v698_v19  ;;  %v700_v25 = vmax.f32 %v668_v20, 0.0  ;;  %v632_v26 = vmul.f32 %v1484_v2, %v594_v6  ;;  %v788_v27 = vmul.f32 %v1490_v8, %v750_v7  ;;  %v732_v19 = vld [vmem:[%s1425_s16 + $0x40] sm:$0xff] }
  0x64   : > { %917 = vst [vmem:[%s1528_s13 + $0x28] sm:$0xff] %v885_v21  ;;  %v855_v48 = vadd.f32 %v823_v59, %v699_v63  ;;  %v669_v0 = vadd.f32 %v1496_v11, %v631_v22  ;;  %v825_v53 = vadd.f32 %v1501_v14, %v787_v23  ;;  %v595_v1 = vunpack.c.h.bf16 %v1455_v54 }
  0x65   : > { %v886_v30 = vmax.f32 %v854_v24, 0.0  ;;  %v856_v31 = vadd.f32 %v824_v62, %v700_v25  ;;  %v670_v6 = vadd.f32 %v1486_v3, %v632_v26  ;;  %v826_v32 = vadd.f32 %v1492_v9, %v788_v27 }
  0x66   : > { %v887_v7 = vmax.f32 %v855_v48, 0.0  ;;  %v701_v33 = vmax.f32 %v669_v0, 0.0  ;;  %v633_v34 = vmul.f32 %v1494_v10, %v595_v1  ;;  %v751_v35 = vunpack.c.h.bf16 %v1458_v55 }
  0x67   : > { %918 = vst [vmem:[%s1528_s13 + $0x30] sm:$0xff] %v886_v30  ;;  %v888_v54 = vmax.f32 %v856_v31, 0.0  ;;  %v702_v36 = vmax.f32 %v670_v6, 0.0  ;;  %v596_v37 = vunpack.c.l.bf16 %v574_v28  ;;  %v752_v38 = vunpack.c.l.bf16 %v730_v29  ;;  %v733_v31 = vld [vmem:[%s1425_s16 + $0x48] sm:$0xff] }
  0x68   : > { %919 = vst [vmem:[%s1528_s13 + $0x38] sm:$0xff] %v887_v7  ;;  %v857_v39 = vadd.f32 %v825_v53, %v701_v33  ;;  %v671_v40 = vadd.f32 %v1496_v11, %v633_v34  ;;  %v789_v41 = vmul.f32 %v1499_v13, %v751_v35  ;;  %v597_v42 = vunpack.c.h.bf16 %v574_v28  ;;  %v577_v53 = vld [vmem:[%s1422_s15 + $0x48] sm:$0xff] }
  0x69   : > { %920 = vst [vmem:[%s1528_s13 + $0x40] sm:$0xff] %v888_v54  ;;  %v858_v43 = vadd.f32 %v826_v32, %v702_v36  ;;  %v634_v44 = vmul.f32 %v1484_v2, %v596_v37  ;;  %v790_v55 = vmul.f32 %v1490_v8, %v752_v38  ;;  %v753_v45 = vunpack.c.h.bf16 %v730_v29 }
  0x6a   : > { %v889_v61 = vmax.f32 %v857_v39, 0.0  ;;  %v703_v50 = vmax.f32 %v671_v40, 0.0  ;;  %v827_v4 = vadd.f32 %v1501_v14, %v789_v41  ;;  %v635_v5 = vmul.f32 %v1494_v10, %v597_v42 }
  0x6b   : > { %v890_v51 = vmax.f32 %v858_v43, 0.0  ;;  %v672_v52 = vadd.f32 %v1486_v3, %v634_v44  ;;  %v828_v12 = vadd.f32 %v1492_v9, %v790_v55  ;;  %v791_v56 = vmul.f32 %v1499_v13, %v753_v45 }
  0x6c   : > { %921 = vst [vmem:[%s1528_s13 + $0x48] sm:$0xff] %v889_v61  ;;  %v859_v15 = vadd.f32 %v827_v4, %v703_v50  ;;  %v673_v16 = vadd.f32 %v1496_v11, %v635_v5  ;;  %v598_v17 = vunpack.c.l.bf16 %v575_v60  ;;  %v754_v57 = vunpack.c.l.bf16 %v731_v49  ;;  %v578_v61 = vld [vmem:[%s1422_s15 + $0x50] sm:$0xff] }
  0x6d   : > { %922 = vst [vmem:[%s1528_s13 + $0x50] sm:$0xff] %v890_v51  ;;  %v704_v58 = vmax.f32 %v672_v52, 0.0  ;;  %v829_v47 = vadd.f32 %v1501_v14, %v791_v56  ;;  %v599_v59 = vunpack.c.h.bf16 %v575_v60  ;;  %v755_v18 = vunpack.c.h.bf16 %v731_v49  ;;  %v734_v50 = vld [vmem:[%s1425_s16 + $0x50] sm:$0xff] }
  0x6e   : > { %v891_v20 = vmax.f32 %v859_v15, 0.0  ;;  %v705_v62 = vmax.f32 %v673_v16, 0.0  ;;  %v636_v21 = vmul.f32 %v1484_v2, %v598_v17  ;;  %v792_v63 = vmul.f32 %v1490_v8, %v754_v57 }
  0x6f   : > { %v860_v22 = vadd.f32 %v828_v12, %v704_v58  ;;  %v637_v23 = vmul.f32 %v1494_v10, %v599_v59  ;;  %v793_v24 = vmul.f32 %v1499_v13, %v755_v18  ;;  %v600_v25 = vunpack.c.l.bf16 %v576_v46 }
  0x70   : > { %923 = vst [vmem:[%s1528_s13 + $0x58] sm:$0xff] %v891_v20  ;;  %v861_v26 = vadd.f32 %v829_v47, %v705_v62  ;;  %v674_v27 = vadd.f32 %v1486_v3, %v636_v21  ;;  %v830_v48 = vadd.f32 %v1492_v9, %v792_v63  ;;  %v756_v0 = vunpack.c.l.bf16 %v732_v19 }
  0x71   : > { %v892_v1 = vmax.f32 %v860_v22, 0.0  ;;  %v675_v28 = vadd.f32 %v1496_v11, %v637_v23  ;;  %v831_v29 = vadd.f32 %v1501_v14, %v793_v24  ;;  %v638_v30 = vmul.f32 %v1484_v2, %v600_v25  ;;  %v579_v22 = vld [vmem:[%s1422_s15 + $0x58] sm:$0xff] }
  0x72   : > { %v893_v6 = vmax.f32 %v861_v26, 0.0  ;;  %v706_v32 = vmax.f32 %v674_v27, 0.0  ;;  %v794_v7 = vmul.f32 %v1490_v8, %v756_v0  ;;  %v601_v33 = vunpack.c.h.bf16 %v576_v46  ;;  %v735_v23 = vld [vmem:[%s1425_s16 + $0x58] sm:$0xff] }
  0x73   : > { %924 = vst [vmem:[%s1528_s13 + $0x60] sm:$0xff] %v892_v1  ;;  %v707_v34 = vmax.f32 %v675_v28, 0.0  ;;  %v676_v35 = vadd.f32 %v1486_v3, %v638_v30  ;;  %v757_v54 = vunpack.c.h.bf16 %v732_v19  ;;  %v602_v36 = vunpack.c.l.bf16 %v577_v53 }
  0x74   : > { %925 = vst [vmem:[%s1528_s13 + $0x68] sm:$0xff] %v893_v6  ;;  %v862_v37 = vadd.f32 %v830_v48, %v706_v32  ;;  %v832_v38 = vadd.f32 %v1492_v9, %v794_v7  ;;  %v639_v39 = vmul.f32 %v1494_v10, %v601_v33  ;;  %v758_v40 = vunpack.c.l.bf16 %v733_v31  ;;  %v580_v6 = vld [vmem:[%s1422_s15 + $0x60] sm:$0xff] }
  0x75   : > { %v863_v41 = vadd.f32 %v831_v29, %v707_v34  ;;  %v708_v42 = vmax.f32 %v676_v35, 0.0  ;;  %v795_v43 = vmul.f32 %v1499_v13, %v757_v54  ;;  %v640_v44 = vmul.f32 %v1484_v2, %v602_v36  ;;  %v736_v35 = vld [vmem:[%s1425_s16 + $0x60] sm:$0xff] }
  0x76   : > { %v894_v55 = vmax.f32 %v862_v37, 0.0  ;;  %v677_v45 = vadd.f32 %v1496_v11, %v639_v39  ;;  %v796_v60 = vmul.f32 %v1490_v8, %v758_v40  ;;  %v603_v49 = vunpack.c.h.bf16 %v577_v53 }
  0x77   : > { %v895_v4 = vmax.f32 %v863_v41, 0.0  ;;  %v864_v5 = vadd.f32 %v832_v38, %v708_v42  ;;  %v833_v51 = vadd.f32 %v1501_v14, %v795_v43  ;;  %v678_v52 = vadd.f32 %v1486_v3, %v640_v44 }
  0x78   : > { %926 = vst [vmem:[%s1528_s13 + $0x70] sm:$0xff] %v894_v55  ;;  %v709_v12 = vmax.f32 %v677_v45, 0.0  ;;  %v834_v56 = vadd.f32 %v1492_v9, %v796_v60  ;;  %v641_v15 = vmul.f32 %v1494_v10, %v603_v49  ;;  %v759_v16 = vunpack.c.h.bf16 %v733_v31  ;;  %v581_v60 = vld [vmem:[%s1422_s15 + $0x68] sm:$0xff] }
  0x79   : > { %927 = vst [vmem:[%s1528_s13 + $0x78] sm:$0xff] %v895_v4  ;;  %v896_v17 = vmax.f32 %v864_v5, 0.0  ;;  %v710_v57 = vmax.f32 %v678_v52, 0.0  ;;  %v604_v46 = vunpack.c.l.bf16 %v578_v61  ;;  %v760_v58 = vunpack.c.l.bf16 %v734_v50  ;;  %v737_v5 = vld [vmem:[%s1425_s16 + $0x68] sm:$0xff] }
  0x7a   : > { %v865_v47 = vadd.f32 %v833_v51, %v709_v12  ;;  %v679_v59 = vadd.f32 %v1496_v11, %v641_v15  ;;  %v797_v18 = vmul.f32 %v1499_v13, %v759_v16  ;;  %v605_v19 = vunpack.c.h.bf16 %v578_v61 }
  0x7b   : > { %928 = vst [vmem:[%s1528_s13 + $0x80] sm:$0xff] %v896_v17  ;;  %v866_v20 = vadd.f32 %v834_v56, %v710_v57  ;;  %v642_v62 = vmul.f32 %v1484_v2, %v604_v46  ;;  %v798_v21 = vmul.f32 %v1490_v8, %v760_v58  ;;  %v761_v63 = vunpack.c.h.bf16 %v734_v50 }
  0x7c   : > { %v897_v24 = vmax.f32 %v865_v47, 0.0  ;;  %v711_v25 = vmax.f32 %v679_v59, 0.0  ;;  %v835_v26 = vadd.f32 %v1501_v14, %v797_v18  ;;  %v643_v27 = vmul.f32 %v1494_v10, %v605_v19 }
  0x7d   : > { %v898_v48 = vmax.f32 %v866_v20, 0.0  ;;  %v680_v0 = vadd.f32 %v1486_v3, %v642_v62  ;;  %v836_v53 = vadd.f32 %v1492_v9, %v798_v21  ;;  %v799_v1 = vmul.f32 %v1499_v13, %v761_v63 }
  0x7e   : > { %929 = vst [vmem:[%s1528_s13 + $0x88] sm:$0xff] %v897_v24  ;;  %v867_v28 = vadd.f32 %v835_v26, %v711_v25  ;;  %v681_v29 = vadd.f32 %v1496_v11, %v643_v27  ;;  %v606_v30 = vunpack.c.l.bf16 %v579_v22  ;;  %v762_v31 = vunpack.c.l.bf16 %v735_v23  ;;  %v582_v24 = vld [vmem:[%s1422_s15 + $0x70] sm:$0xff] }
  0x7f   : > { %930 = vst [vmem:[%s1528_s13 + $0x90] sm:$0xff] %v898_v48  ;;  %v712_v32 = vmax.f32 %v680_v0, 0.0  ;;  %v837_v7 = vadd.f32 %v1501_v14, %v799_v1  ;;  %v607_v33 = vunpack.c.h.bf16 %v579_v22  ;;  %v763_v34 = vunpack.c.h.bf16 %v735_v23  ;;  %v738_v25 = vld [vmem:[%s1425_s16 + $0x70] sm:$0xff] }
  0x80   : > { %v899_v54 = vmax.f32 %v867_v28, 0.0  ;;  %v713_v36 = vmax.f32 %v681_v29, 0.0  ;;  %v644_v37 = vmul.f32 %v1484_v2, %v606_v30  ;;  %v800_v38 = vmul.f32 %v1490_v8, %v762_v31 }
  0x81   : > { %v868_v39 = vadd.f32 %v836_v53, %v712_v32  ;;  %v645_v40 = vmul.f32 %v1494_v10, %v607_v33  ;;  %v801_v41 = vmul.f32 %v1499_v13, %v763_v34  ;;  %v608_v42 = vunpack.c.l.bf16 %v580_v6 }
  0x82   : > { %931 = vst [vmem:[%s1528_s13 + $0x98] sm:$0xff] %v899_v54  ;;  %v869_v43 = vadd.f32 %v837_v7, %v713_v36  ;;  %v682_v44 = vadd.f32 %v1486_v3, %v644_v37  ;;  %v838_v55 = vadd.f32 %v1492_v9, %v800_v38  ;;  %v764_v45 = vunpack.c.l.bf16 %v736_v35 }
  0x83   : > { %v900_v49 = vmax.f32 %v868_v39, 0.0  ;;  %v683_v61 = vadd.f32 %v1496_v11, %v645_v40  ;;  %v839_v50 = vadd.f32 %v1501_v14, %v801_v41  ;;  %v646_v4 = vmul.f32 %v1484_v2, %v608_v42  ;;  %v583_v39 = vld [vmem:[%s1422_s15 + $0x78] sm:$0xff]  ;;  %s1127_s15 = sshll.u32 %s1256_s24, 4 }
  0x84   : > { %v901_v51 = vmax.f32 %v869_v43, 0.0  ;;  %v714_v52 = vmax.f32 %v682_v44, 0.0  ;;  %v802_v12 = vmul.f32 %v1490_v8, %v764_v45  ;;  %v609_v56 = vunpack.c.h.bf16 %v580_v6  ;;  %v739_v40 = vld [vmem:[%s1425_s16 + $0x78] sm:$0xff]  ;;  %s959_s18 = scalar_lea.hbm %s1750_s6, %s1127_s15 }
  0x85   : > { %932 = vst [vmem:[%s1528_s13 + $0xa0] sm:$0xff] %v900_v49  ;;  %v715_v15 = vmax.f32 %v683_v61, 0.0  ;;  %v684_v16 = vadd.f32 %v1486_v3, %v646_v4  ;;  %v765_v17 = vunpack.c.h.bf16 %v736_v35  ;;  %v610_v57 = vunpack.c.l.bf16 %v581_v60  ;;  %s962_s20 = sshll.u32 %s959_s18, 4  ;;  %s963_s20 = int_to_ptr.hbm [resolvable:$true] %s962_s20 }
  0x86   : > { %933 = vst [vmem:[%s1528_s13 + $0xa8] sm:$0xff] %v901_v51  ;;  %v870_v46 = vadd.f32 %v838_v55, %v714_v52  ;;  %v840_v58 = vadd.f32 %v1492_v9, %v802_v12  ;;  %v647_v47 = vmul.f32 %v1494_v10, %v609_v56  ;;  %v766_v59 = vunpack.c.l.bf16 %v737_v5  ;;  %s1200_s28 = sshra.s32 %s963_s20, 4  ;;  %s1201_s28 = int_to_ptr.hbm [resolvable:$true] %s1200_s28 }
  0x87   : > { %v871_v18 = vadd.f32 %v839_v50, %v715_v15  ;;  %v716_v19 = vmax.f32 %v684_v16, 0.0  ;;  %v803_v20 = vmul.f32 %v1499_v13, %v765_v17  ;;  %v648_v62 = vmul.f32 %v1484_v2, %v610_v57  ;;  %s1202_s30 = scalar_lea.hbm %s1201_s28, 256  ;;  %p1207_p4 = scmp.lt.s32.totalorder %s1201_s28, %s1750_s6 }
  0x88   : > { %v902_v21 = vmax.f32 %v870_v46, 0.0  ;;  %v685_v63 = vadd.f32 %v1496_v11, %v647_v47  ;;  %v804_v22 = vmul.f32 %v1490_v8, %v766_v59  ;;  %v611_v23 = vunpack.c.h.bf16 %v581_v60  ;;  %p1203_p1 = scmp.ne.s32.totalorder %s1201_s28, %s1202_s30  ;;  %p1208_p6 = scmp.lt.s32.totalorder %s1206_s14, %s1202_s30 }
  0x89   : > { %v903_v26 = vmax.f32 %v871_v18, 0.0  ;;  %v872_v27 = vadd.f32 %v840_v58, %v716_v19  ;;  %v841_v48 = vadd.f32 %v1501_v14, %v803_v20  ;;  %v686_v0 = vadd.f32 %v1486_v3, %v648_v62 }
  0x8a   : > { %934 = vst [vmem:[%s1528_s13 + $0xb0] sm:$0xff] %v902_v21  ;;  %v717_v53 = vmax.f32 %v685_v63, 0.0  ;;  %v842_v1 = vadd.f32 %v1492_v9, %v804_v22  ;;  %v649_v28 = vmul.f32 %v1494_v10, %v611_v23  ;;  %v767_v29 = vunpack.c.h.bf16 %v737_v5  ;;  %p1204_p2 = pnand %p1203_p1, %p1347_p5  ;;  %p1209_p7 = por %p1208_p6, %p1207_p4 }
  0x8b   : > { %935 = vst [vmem:[%s1528_s13 + $0xb8] sm:$0xff] %v903_v26  ;;  %v904_v30 = vmax.f32 %v872_v27, 0.0  ;;  %v718_v31 = vmax.f32 %v686_v0, 0.0  ;;  %v612_v6 = vunpack.c.l.bf16 %v582_v24  ;;  %v768_v32 = vunpack.c.l.bf16 %v738_v25 }
  0x8c   : > { %v873_v7 = vadd.f32 %v841_v48, %v717_v53  ;;  %v687_v33 = vadd.f32 %v1496_v11, %v649_v28  ;;  %v805_v34 = vmul.f32 %v1499_v13, %v767_v29  ;;  %v613_v35 = vunpack.c.h.bf16 %v582_v24  ;;  %p1205_p3 = pneg %p1204_p2 }
  0x8d   : > { %936 = vst [vmem:[%s1528_s13 + $0xc0] sm:$0xff] %v904_v30  ;;  %v874_v54 = vadd.f32 %v842_v1, %v718_v31  ;;  %v650_v36 = vmul.f32 %v1484_v2, %v612_v6  ;;  %v806_v37 = vmul.f32 %v1490_v8, %v768_v32  ;;  %v769_v38 = vunpack.c.h.bf16 %v738_v25 }
  0x8e   : > { %v905_v41 = vmax.f32 %v873_v7, 0.0  ;;  %v719_v42 = vmax.f32 %v687_v33, 0.0  ;;  %v843_v43 = vadd.f32 %v1501_v14, %v805_v34  ;;  %v651_v44 = vmul.f32 %v1494_v10, %v613_v35  ;;  %p1210_p8 = pnand %p1209_p7, %p1205_p3 }
  0x8f   : > { %v906_v55 = vmax.f32 %v874_v54, 0.0  ;;  %v688_v45 = vadd.f32 %v1486_v3, %v650_v36  ;;  %v844_v60 = vadd.f32 %v1492_v9, %v806_v37  ;;  %v807_v49 = vmul.f32 %v1499_v13, %v769_v38 }
  0x90   : > { %937 = vst [vmem:[%s1528_s13 + $0xc8] sm:$0xff] %v905_v41  ;;  %v875_v61 = vadd.f32 %v843_v43, %v719_v42  ;;  %v689_v50 = vadd.f32 %v1496_v11, %v651_v44  ;;  %v614_v4 = vunpack.c.l.bf16 %v583_v39  ;;  %v770_v5 = vunpack.c.l.bf16 %v739_v40 }
  0x91   : > { %938 = vst [vmem:[%s1528_s13 + $0xd0] sm:$0xff] %v906_v55  ;;  %v720_v51 = vmax.f32 %v688_v45, 0.0  ;;  %v845_v52 = vadd.f32 %v1501_v14, %v807_v49  ;;  %v615_v12 = vunpack.c.h.bf16 %v583_v39  ;;  %v771_v56 = vunpack.c.h.bf16 %v739_v40 }
  0x92   : > { %v907_v15 = vmax.f32 %v875_v61, 0.0  ;;  %v721_v16 = vmax.f32 %v689_v50, 0.0  ;;  %v652_v17 = vmul.f32 %v1484_v2, %v614_v4  ;;  %v808_v57 = vmul.f32 %v1490_v8, %v770_v5 }
  0x93   : > { %v876_v46 = vadd.f32 %v844_v60, %v720_v51  ;;  %v653_v58 = vmul.f32 %v1494_v10, %v615_v12  ;;  %v809_v47 = vmul.f32 %v1499_v13, %v771_v56 }
  0x94   : > { %939 = vst [vmem:[%s1528_s13 + $0xd8] sm:$0xff] %v907_v15  ;;  %v877_v59 = vadd.f32 %v845_v52, %v721_v16  ;;  %v690_v18 = vadd.f32 %v1486_v3, %v652_v17  ;;  %v846_v19 = vadd.f32 %v1492_v9, %v808_v57 }
  0x95   : > { %v908_v2 = vmax.f32 %v876_v46, 0.0  ;;  %v691_v8 = vadd.f32 %v1496_v11, %v653_v58  ;;  %v847_v10 = vadd.f32 %v1501_v14, %v809_v47 }
  0x96   : > { %v909_v20 = vmax.f32 %v877_v59, 0.0  ;;  %v722_v13 = vmax.f32 %v690_v18, 0.0 }
  0x97   : > { %940 = vst [vmem:[%s1528_s13 + $0xe0] sm:$0xff] %v908_v2  ;;  %v723_v62 = vmax.f32 %v691_v8, 0.0 }
  0x98   : > { %941 = vst [vmem:[%s1528_s13 + $0xe8] sm:$0xff] %v909_v20  ;;  %v878_v3 = vadd.f32 %v846_v19, %v722_v13 }
  0x99   : > { %v879_v9 = vadd.f32 %v847_v10, %v723_v62 }
  0x9a   : > { %v910_v21 = vmax.f32 %v878_v3, 0.0 }
  0x9b   : > { %v911_v63 = vmax.f32 %v879_v9, 0.0 }
  0x9c   : > { %942 = vst [vmem:[%s1528_s13 + $0xf0] sm:$0xff] %v910_v21 }
  0x9d   : > { %943 = vst [vmem:[%s1528_s13 + $0xf8] sm:$0xff] %v911_v63 }
  0x9e   : > { %1213 = shalt.err (!%p1210_p8)
}
  0x9f   : > { %s1266_s12 = smov 256   ;;  %s1267_s13 = smov 512  }
  0xa0   : > { %s1268_s15 = smov 16  }
  0xa1   : > { %1128 = dma.vmem_to_hbm [thread:$0]  (%p1347_p5), %s961_s19, 4096, %s963_s20, %s945_s27, %s1266_s12, %s1267_s13, %s1268_s15  }
  0xa2 PF: > { %s977_s24 = sand.u32 1, %s1244_s21   ;;  %p1131_p11 = pnand %p1105_p10, %p1358_p9 }
  0xa3   : > { %s978_s16 = scalar_lea.sflag [#allocation5], %s977_s24 }
  0xa4   : > { %p1132_p12 = pneg %p1131_p11 }
  0xa6   : > { %1239 = dma.done.wait (%p1132_p12), %s978_s16, 4096  }
  0xa7   : > { %1241 = vsyncadd (%p1132_p12), %s978_s16, 4294963200  ;;  %s19_s26 = sadd.s32 1, %s1264_s26   ;;  %s1756_s21 = smov %s1248_s22 }
  0xa8   : > { %p16_p13 = scmp.ge.s32.totalorder %s19_s26, 4   ;;  %s1757_s22 = smov %s1252_s23 }
  0xa9   : > { %s1758_s23 = smov %s1356_s10  ;;  %s1759_s24 = smov %s1260_s25 }
  0xaa   : > { %s1760_s25 = smov %s1762_s29  ;;  %18 = sbr.rel (!%p16_p13) target bundleno = 6 (0x6), region = 180 }
  0xaf   :  { %984 = vsyncpa [#allocation5], 1 }
  0xb0   :  { %986 = vsyncpa [#allocation5 + $0x1], 1 }

</bundles_post_ra>
